<compile_context>
chip_gen: v7x
topology: tpu7x:2x2x1
jax: 0.10.0
libtpu: 0.0.40
codegen_flags: <defaults>
</compile_context>

<pallas_src>
import functools
import math

import jax
import jax.numpy as jnp
from jax.experimental import pallas as pl
from jax.experimental.pallas import tpu as pltpu


# ----------------------------------------------------------------------------
# Kernel: one grid step == one block of Tb time steps of the stacked LSTM.
# ----------------------------------------------------------------------------
def _make_block_kernel(n_layer, H, Tb, B, has_wihs):
    def kernel(*refs):
        if has_wihs:
            (x_ref, h0_ref, c0_ref, wih0_ref, wihs_ref, whh_ref, b_ref,
             wl_ref, bl_ref, y_ref, extra_ref, hn_ref, cn_ref) = refs
        else:
            (x_ref, h0_ref, c0_ref, wih0_ref, whh_ref, b_ref,
             wl_ref, bl_ref, y_ref, extra_ref, hn_ref, cn_ref) = refs
            wihs_ref = None

        blk = pl.program_id(0)

        # hn/cn have a constant output index map, so their VMEM blocks are
        # resident across the whole grid and act as the recurrent state carry.
        @pl.when(blk == 0)
        def _init():
            hn_ref[...] = h0_ref[...]
            cn_ref[...] = c0_ref[...]

        wdt = wih0_ref.dtype  # matmul compute dtype (f32 or bf16)

        # Hoisted layer-0 input projection for the whole time block:
        # one (Tb*B, in_dim) x (in_dim, 4H) MXU matmul, f32 accumulation.
        g0 = jnp.dot(x_ref[...].astype(wdt), wih0_ref[...],
                     preferred_element_type=jnp.float32)          # (Tb*B, 4H)

        # Sequential recurrence over the Tb steps of this block (unrolled:
        # Tb and n_layer are small static ints, full scheduler visibility).
        for t in range(Tb):
            layer_h = None
            for l in range(n_layer):
                h_prev = hn_ref[l]                                 # (B, H) f32
                c_prev = cn_ref[l]                                 # (B, H) f32
                if l == 0:
                    gates = g0[t * B:(t + 1) * B, :]
                else:
                    gates = jnp.dot(layer_h.astype(wdt), wihs_ref[l - 1],
                                    preferred_element_type=jnp.float32)
                gates = gates + jnp.dot(h_prev.astype(wdt), whh_ref[l],
                                        preferred_element_type=jnp.float32)
                gates = gates + b_ref[l]                           # (1,4H) bcast

                # Gate columns were permuted to (i, f, o, g): one contiguous
                # sigmoid over 3H, one tanh over H.  Elementwise math in f32.
                sg = jax.nn.sigmoid(gates[:, :3 * H])
                i_g = sg[:, 0 * H:1 * H]
                f_g = sg[:, 1 * H:2 * H]
                o_g = sg[:, 2 * H:3 * H]
                g_g = jnp.tanh(gates[:, 3 * H:])

                c_new = f_g * c_prev + i_g * g_g
                h_new = o_g * jnp.tanh(c_new)
                hn_ref[l] = h_new
                cn_ref[l] = c_new
                layer_h = h_new

            # Accumulate last-layer h into the extra output block (VMEM).
            extra_ref[pl.ds(t * B, B), :] = layer_h

        # Deferred output Linear: one (Tb*B, H) x (H, out_dim) matmul and one
        # slab store for the whole block (no per-step 2-row matmuls/stores).
        h_all = extra_ref[...]
        y_ref[...] = (jnp.dot(h_all.astype(wdt), wl_ref[...],
                              preferred_element_type=jnp.float32) + bl_ref[...])

    return kernel


def _full_spec(arr):
    n = arr.ndim
    return pl.BlockSpec(arr.shape, lambda i, _n=n: (0,) * _n)


def _pick_time_block(T, B, cap):
    """Largest divisor of T <= cap whose (Tb*B) row block is sublane-aligned."""
    for tb in range(min(T, cap), 0, -1):
        if T % tb == 0 and (tb == T or (tb * B) % 8 == 0):
            return tb
    return T


def lstm_stack_pallas(xin, h0, c0, wih0, wihs, whh, b, wl, bl,
                      *, weights_dtype=jnp.float32, tb_cap=8):
    """Stacked LSTM + Linear head over a (T, B, in_dim) sequence."""
    T, B, in_dim = xin.shape
    n_layer, _, H = h0.shape
    out_dim = wl.shape[1]
    has_wihs = n_layer > 1

    Tb = _pick_time_block(T, B, tb_cap)
    n_blk = T // Tb

    # Permute gate columns from PyTorch (i, f, g, o) to (i, f, o, g) so the
    # kernel applies sigmoid to one contiguous 3H slice.  Plain-JAX, one-time.
    def perm(w):
        return jnp.concatenate(
            [w[..., :2 * H], w[..., 3 * H:4 * H], w[..., 2 * H:3 * H]], axis=-1)

    wih0_k = perm(wih0).astype(weights_dtype)
    whh_k = perm(whh).astype(weights_dtype)
    b_k = perm(b)                                   # bias stays f32
    wl_k = wl.astype(weights_dtype)
    wihs_k = perm(wihs).astype(weights_dtype) if has_wihs else None

    # Time-major 2D layout (T*B, in_dim): no in-kernel reshapes needed.
    x2d = xin.reshape(T * B, in_dim)

    kernel = _make_block_kernel(n_layer, H, Tb, B, has_wihs)

    in_specs = [pl.BlockSpec((Tb * B, in_dim), lambda i: (i, 0)),
                _full_spec(h0), _full_spec(c0), _full_spec(wih0_k)]
    args = [x2d, h0, c0, wih0_k]
    if has_wihs:
        in_specs.append(_full_spec(wihs_k))
        args.append(wihs_k)
    in_specs += [_full_spec(whh_k), _full_spec(b_k),
                 _full_spec(wl_k), _full_spec(bl)]
    args += [whh_k, b_k, wl_k, bl]

    out_specs = [
        pl.BlockSpec((Tb * B, out_dim), lambda i: (i, 0)),   # y (per block)
        pl.BlockSpec((Tb * B, H), lambda i: (i, 0)),         # extra (per block)
        pl.BlockSpec((n_layer, B, H), lambda i: (0, 0, 0)),  # h_n (resident)
        pl.BlockSpec((n_layer, B, H), lambda i: (0, 0, 0)),  # c_n (resident)
    ]
    out_shape = (
        jax.ShapeDtypeStruct((T * B, out_dim), jnp.float32),
        jax.ShapeDtypeStruct((T * B, H), jnp.float32),
        jax.ShapeDtypeStruct((n_layer, B, H), jnp.float32),
        jax.ShapeDtypeStruct((n_layer, B, H), jnp.float32),
    )

    flops = int(2 * T * B * in_dim * 4 * H                      # layer-0 ih
                + 2 * T * B * H * 4 * H * (n_layer - 1)         # ih, layers>=1
                + 2 * T * B * H * 4 * H * n_layer               # hh
                + 2 * T * B * H * out_dim)                      # linear head
    transcendentals = int(5 * T * n_layer * B * H)
    bytes_accessed = int(
        sum(a.size * a.dtype.itemsize for a in args)
        + sum(math.prod(s.shape) * jnp.dtype(s.dtype).itemsize
              for s in out_shape))

    # TODO(synk): for production sizes on v7x (64 MiB VMEM), stream per-layer
    # whh/wihs from HBM (memory_space=pl.ANY + manual double-buffer) instead of
    # keeping all weights fully resident.
    y2d, extra2d, hn, cn = pl.pallas_call(
        kernel,
        out_shape=out_shape,
        grid_spec=pltpu.PrefetchScalarGridSpec(
            num_scalar_prefetch=0,
            grid=(n_blk,),
            in_specs=in_specs,
            out_specs=out_specs,
            scratch_shapes=[]),
        compiler_params=pltpu.CompilerParams(
            dimension_semantics=("arbitrary",)),     # sequential recurrence
        cost_estimate=pl.CostEstimate(
            flops=flops, transcendentals=transcendentals,
            bytes_accessed=bytes_accessed),
    )(*args)

    return (y2d.reshape(T, B, out_dim), extra2d.reshape(T, B, H), hn, cn)


# ----------------------------------------------------------------------------
# Parameter init (matches nn.LSTM(in_dim, H, n_layer) + Linear(H, out_dim)).
# ----------------------------------------------------------------------------
def init_params(key, in_dim, out_dim, H, n_layer):
    ks = iter(jax.random.split(key, 5 * n_layer + 6))
    bound = 1.0 / float(H) ** 0.5

    def u(shape):
        return jax.random.uniform(next(ks), shape, jnp.float32, -bound, bound)

    wih0 = u((in_dim, 4 * H))                                    # W_ih_l0^T
    wihs = (jnp.stack([u((H, 4 * H)) for _ in range(n_layer - 1)])
            if n_layer > 1 else None)                            # W_ih_l{k>0}^T
    whh = jnp.stack([u((H, 4 * H)) for _ in range(n_layer)])     # W_hh^T
    b = jnp.stack([u((1, 4 * H)) + u((1, 4 * H))                 # b_ih + b_hh
                   for _ in range(n_layer)])
    wl = u((H, out_dim))                                         # Linear W^T
    bl = u((1, out_dim))                                         # Linear bias
    return wih0, wihs, whh, b, wl, bl


# ----------------------------------------------------------------------------
# Module wrapper reproducing LSTMNetwork.forward semantics.
# ----------------------------------------------------------------------------
class LSTMNetworkPallas:
    def __init__(self, in_dim, out_dim, latent_dim, n_layer, bsz, key,
                 weights_dtype=jnp.float32, tb_cap=8):
        self.in_dim = in_dim
        self.out_dim = out_dim
        self.latent_dim = latent_dim
        self.n_layer = n_layer
        self.weights_dtype = weights_dtype
        self.tb_cap = tb_cap
        self.params = init_params(key, in_dim, out_dim, latent_dim, n_layer)

    def __call__(self, x, X, state1, bsz, weights_dtype=None):
        wd = self.weights_dtype if weights_dtype is None else weights_dtype
        # x.transpose(1, 2); x.reshape(-1, bsz, out_dim, 1); torch.mul(x, X);
        # reshape(-1, bsz, in_dim).  Done compactly in plain JAX so the kernel
        # consumes a single (T*B, in_dim) array instead of two broadcasts.
        x = jnp.swapaxes(x, 1, 2).reshape(-1, bsz, self.out_dim, 1)
        xin = (x * X).reshape(-1, bsz, self.in_dim)
        h0, c0 = state1
        y, extra, hn, cn = lstm_stack_pallas(
            xin, h0, c0, *self.params, weights_dtype=wd, tb_cap=self.tb_cap)
        # x.transpose(1, 2) on the Linear output; .detach() is a no-op here.
        return jnp.swapaxes(y, 1, 2), (hn, cn), extra


# ----------------------------------------------------------------------------
# Pure-JAX reference (same math, lax.scan) for a correctness check.
# ----------------------------------------------------------------------------
def reference_forward(x, X, state1, params, in_dim, out_dim, bsz):
    wih0, wihs, whh, b, wl, bl = params
    h0, c0 = state1
    n_layer, _, H = h0.shape

    x = jnp.swapaxes(x, 1, 2)
    x = x.reshape(-1, bsz, out_dim, 1)
    x = x * X
    x = x.reshape(-1, bsz, in_dim)

    def step(carry, xt):
        h, c = carry
        layer_in = xt
        hs, cs = [], []
        for l in range(n_layer):
            wih = wih0 if l == 0 else wihs[l - 1]
            gates = layer_in @ wih + h[l] @ whh[l] + b[l]
            i_g = jax.nn.sigmoid(gates[:, :H])
            f_g = jax.nn.sigmoid(gates[:, H:2 * H])
            g_g = jnp.tanh(gates[:, 2 * H:3 * H])
            o_g = jax.nn.sigmoid(gates[:, 3 * H:])
            c_new = f_g * c[l] + i_g * g_g
            h_new = o_g * jnp.tanh(c_new)
            hs.append(h_new)
            cs.append(c_new)
            layer_in = h_new
        return (jnp.stack(hs), jnp.stack(cs)), layer_in

    (hn, cn), out = jax.lax.scan(step, (h0, c0), x)
    y = out @ wl + bl
    return jnp.swapaxes(y, 1, 2), (hn, cn), out


if __name__ == "__main__":
    in_dim, out_dim, latent_dim, n_layer, bsz = 8, 4, 32, 2, 2
    T = 16                      # with tb_cap=8 -> 2 time blocks (tests carry)
    k_rep = in_dim // out_dim

    key = jax.random.PRNGKey(0)
    kx, kX, kh, kc, kp = jax.random.split(key, 5)
    x = jax.random.normal(kx, (T, out_dim, bsz), jnp.float32)
    X = jax.random.normal(kX, (T, bsz, out_dim, k_rep), jnp.float32)
    h0 = jax.random.normal(kh, (n_layer, bsz, latent_dim), jnp.float32)
    c0 = jax.random.normal(kc, (n_layer, bsz, latent_dim), jnp.float32)

    model = LSTMNetworkPallas(in_dim, out_dim, latent_dim, n_layer, bsz, kp)

    y, (hn, cn), extra = model(x, X, (h0, c0), bsz)
    jax.block_until_ready((y, hn, cn, extra))

    y_r, (hn_r, cn_r), extra_r = reference_forward(
        x, X, (h0, c0), model.params, in_dim, out_dim, bsz)

    assert y.shape == (T, out_dim, bsz)
    assert extra.shape == (T, bsz, latent_dim)
    assert hn.shape == (n_layer, bsz, latent_dim)
    assert cn.shape == (n_layer, bsz, latent_dim)
    for got, ref in ((y, y_r), (extra, extra_r), (hn, hn_r), (cn, cn_r)):
        err = float(jnp.max(jnp.abs(got - ref)))
        assert err < 2e-4, err

    # bf16-weight fast path (MXU-native, f32 accumulation / f32 state);
    # loose tolerance against the f32 reference.
    y16, (hn16, cn16), extra16 = model(x, X, (h0, c0), bsz,
                                       weights_dtype=jnp.bfloat16)
    jax.block_until_ready((y16, hn16, cn16, extra16))
    assert float(jnp.max(jnp.abs(y16 - y_r))) < 0.25

    print("KERNEL_OK")
</pallas_src>

<mosaic_0001>
module attributes {stable_mosaic.version = 11 : i64} {
  func.func @kernel(%arg0: i32, %arg1: memref<16x8xf32, #tpu.memory_space<vmem>>, %arg2: memref<2x2x32xf32, #tpu.memory_space<vmem>>, %arg3: memref<2x2x32xf32, #tpu.memory_space<vmem>>, %arg4: memref<8x128xf32, #tpu.memory_space<vmem>>, %arg5: memref<1x32x128xf32, #tpu.memory_space<vmem>>, %arg6: memref<2x32x128xf32, #tpu.memory_space<vmem>>, %arg7: memref<2x1x128xf32, #tpu.memory_space<vmem>>, %arg8: memref<32x4xf32, #tpu.memory_space<vmem>>, %arg9: memref<1x4xf32, #tpu.memory_space<vmem>>, %arg10: memref<16x4xf32, #tpu.memory_space<vmem>>, %arg11: memref<16x32xf32, #tpu.memory_space<vmem>>, %arg12: memref<2x2x32xf32, #tpu.memory_space<vmem>>, %arg13: memref<2x2x32xf32, #tpu.memory_space<vmem>>) attributes {dimension_semantics = [#tpu.dimension_semantics<arbitrary>], iteration_bounds = array<i64: 2>, scalar_prefetch = 0 : i64, scratch_operands = 0 : i64, tpu.core_type = #tpu.core_type<tc>, window_params = [{transform_indices = @transform_0, window_bounds = array<i64: 16, 8>}, {pipeline_mode = #tpu.pipeline_mode<synchronous>, transform_indices = @transform_1, window_bounds = array<i64: 2, 2, 32>}, {pipeline_mode = #tpu.pipeline_mode<synchronous>, transform_indices = @transform_2, window_bounds = array<i64: 2, 2, 32>}, {pipeline_mode = #tpu.pipeline_mode<synchronous>, transform_indices = @transform_3, window_bounds = array<i64: 8, 128>}, {pipeline_mode = #tpu.pipeline_mode<synchronous>, transform_indices = @transform_4, window_bounds = array<i64: 1, 32, 128>}, {pipeline_mode = #tpu.pipeline_mode<synchronous>, transform_indices = @transform_5, window_bounds = array<i64: 2, 32, 128>}, {pipeline_mode = #tpu.pipeline_mode<synchronous>, transform_indices = @transform_6, window_bounds = array<i64: 2, 1, 128>}, {pipeline_mode = #tpu.pipeline_mode<synchronous>, transform_indices = @transform_7, window_bounds = array<i64: 32, 4>}, {pipeline_mode = #tpu.pipeline_mode<synchronous>, transform_indices = @transform_8, window_bounds = array<i64: 1, 4>}, {transform_indices = @transform_9, window_bounds = array<i64: 16, 4>}, {transform_indices = @transform_10, window_bounds = array<i64: 16, 32>}, {pipeline_mode = #tpu.pipeline_mode<synchronous>, transform_indices = @transform_11, window_bounds = array<i64: 2, 2, 32>}, {pipeline_mode = #tpu.pipeline_mode<synchronous>, transform_indices = @transform_12, window_bounds = array<i64: 2, 2, 32>}]} {
    %c0_i32 = arith.constant 0 : i32
    %0 = arith.cmpi eq, %arg0, %c0_i32 : i32
    %1 = arith.extui %0 : i1 to i32
    %c0_i32_0 = arith.constant 0 : i32
    %2 = arith.cmpi ne, %1, %c0_i32_0 : i32
    scf.if %2 {
      %c0_373 = arith.constant 0 : index
      %c0_374 = arith.constant 0 : index
      %c0_375 = arith.constant 0 : index
      %597 = vector.load %arg2[%c0_373, %c0_374, %c0_375] : memref<2x2x32xf32, #tpu.memory_space<vmem>>, vector<2x2x32xf32>
      %c0_376 = arith.constant 0 : index
      %c0_377 = arith.constant 0 : index
      %c0_378 = arith.constant 0 : index
      %598 = vector.load %arg12[%c0_376, %c0_377, %c0_378] : memref<2x2x32xf32, #tpu.memory_space<vmem>>, vector<2x2x32xf32>
      tpu.vector_store %arg12[%c0_376, %c0_377, %c0_378], %597 {strides = array<i32>} : memref<2x2x32xf32, #tpu.memory_space<vmem>>, vector<2x2x32xf32>,
      %c0_379 = arith.constant 0 : index
      %c0_380 = arith.constant 0 : index
      %c0_381 = arith.constant 0 : index
      %599 = vector.load %arg3[%c0_379, %c0_380, %c0_381] : memref<2x2x32xf32, #tpu.memory_space<vmem>>, vector<2x2x32xf32>
      %c0_382 = arith.constant 0 : index
      %c0_383 = arith.constant 0 : index
      %c0_384 = arith.constant 0 : index
      %600 = vector.load %arg13[%c0_382, %c0_383, %c0_384] : memref<2x2x32xf32, #tpu.memory_space<vmem>>, vector<2x2x32xf32>
      tpu.vector_store %arg13[%c0_382, %c0_383, %c0_384], %599 {strides = array<i32>} : memref<2x2x32xf32, #tpu.memory_space<vmem>>, vector<2x2x32xf32>,
    } else {
    }
    %c0 = arith.constant 0 : index
    %c0_1 = arith.constant 0 : index
    %3 = vector.load %arg1[%c0, %c0_1] : memref<16x8xf32, #tpu.memory_space<vmem>>, vector<16x8xf32>
    %c0_2 = arith.constant 0 : index
    %c0_3 = arith.constant 0 : index
    %4 = vector.load %arg4[%c0_2, %c0_3] : memref<8x128xf32, #tpu.memory_space<vmem>>, vector<8x128xf32>
    %cst = arith.constant dense<0.000000e+00> : vector<16x128xf32>
    %5 = tpu.matmul %3, %4, %cst {dimension_numbers = #tpu.dot_dimension_numbers<[1], [0], [0], [1], [0, 0, 1, 1], [], []>} : vector<16x8xf32>, vector<8x128xf32>, vector<16x128xf32> -> vector<16x128xf32>
    %c0_4 = arith.constant 0 : index
    %c0_5 = arith.constant 0 : index
    %c0_6 = arith.constant 0 : index
    %6 = vector.load %arg12[%c0_4, %c0_5, %c0_6] : memref<2x2x32xf32, #tpu.memory_space<vmem>>, vector<1x2x32xf32>
    %7 = vector.shape_cast %6 : vector<1x2x32xf32> to vector<2x32xf32>
    %c0_7 = arith.constant 0 : index
    %c0_8 = arith.constant 0 : index
    %c0_9 = arith.constant 0 : index
    %8 = vector.load %arg13[%c0_7, %c0_8, %c0_9] : memref<2x2x32xf32, #tpu.memory_space<vmem>>, vector<1x2x32xf32>
    %9 = vector.shape_cast %8 : vector<1x2x32xf32> to vector<2x32xf32>
    %10 = vector.extract_strided_slice %5 {offsets = [0, 0], sizes = [2, 128], strides = [1, 1]} : vector<16x128xf32> to vector<2x128xf32>
    %c0_10 = arith.constant 0 : index
    %c0_11 = arith.constant 0 : index
    %c0_12 = arith.constant 0 : index
    %11 = vector.load %arg6[%c0_10, %c0_11, %c0_12] : memref<2x32x128xf32, #tpu.memory_space<vmem>>, vector<1x32x128xf32>
    %12 = vector.shape_cast %11 : vector<1x32x128xf32> to vector<32x128xf32>
    %cst_13 = arith.constant dense<0.000000e+00> : vector<2x128xf32>
    %13 = tpu.matmul %7, %12, %cst_13 {dimension_numbers = #tpu.dot_dimension_numbers<[1], [0], [0], [1], [0, 0, 1, 1], [], []>} : vector<2x32xf32>, vector<32x128xf32>, vector<2x128xf32> -> vector<2x128xf32>
    %14 = arith.addf %10, %13 : vector<2x128xf32>
    %c0_14 = arith.constant 0 : index
    %c0_15 = arith.constant 0 : index
    %c0_16 = arith.constant 0 : index
    %15 = vector.load %arg7[%c0_14, %c0_15, %c0_16] : memref<2x1x128xf32, #tpu.memory_space<vmem>>, vector<1x1x128xf32>
    %16 = vector.shape_cast %15 : vector<1x1x128xf32> to vector<1x128xf32>
    %17 = vector.broadcast %16 : vector<1x128xf32> to vector<2x128xf32>
    %18 = arith.addf %14, %17 : vector<2x128xf32>
    %19 = vector.extract_strided_slice %18 {offsets = [0, 0], sizes = [2, 96], strides = [1, 1]} : vector<2x128xf32> to vector<2x96xf32>
    %20 = arith.negf %19 : vector<2x96xf32>
    %21 = math.exp %20 : vector<2x96xf32>
    %cst_17 = arith.constant 1.000000e+00 : f32
    %22 = vector.broadcast %cst_17 : f32 to vector<2x96xf32>
    %23 = arith.addf %22, %21 : vector<2x96xf32>
    %24 = arith.divf %22, %23 : vector<2x96xf32>
    %25 = vector.extract_strided_slice %24 {offsets = [0, 0], sizes = [2, 32], strides = [1, 1]} : vector<2x96xf32> to vector<2x32xf32>
    %26 = vector.extract_strided_slice %24 {offsets = [0, 32], sizes = [2, 32], strides = [1, 1]} : vector<2x96xf32> to vector<2x32xf32>
    %27 = vector.extract_strided_slice %24 {offsets = [0, 64], sizes = [2, 32], strides = [1, 1]} : vector<2x96xf32> to vector<2x32xf32>
    %28 = vector.extract_strided_slice %18 {offsets = [0, 96], sizes = [2, 32], strides = [1, 1]} : vector<2x128xf32> to vector<2x32xf32>
    %29 = math.tanh %28 : vector<2x32xf32>
    %30 = arith.mulf %26, %9 : vector<2x32xf32>
    %31 = arith.mulf %25, %29 : vector<2x32xf32>
    %32 = arith.addf %30, %31 : vector<2x32xf32>
    %33 = math.tanh %32 : vector<2x32xf32>
    %34 = arith.mulf %27, %33 : vector<2x32xf32>
    %c0_18 = arith.constant 0 : index
    %c0_19 = arith.constant 0 : index
    %c0_20 = arith.constant 0 : index
    %35 = vector.load %arg12[%c0_18, %c0_19, %c0_20] : memref<2x2x32xf32, #tpu.memory_space<vmem>>, vector<1x2x32xf32>
    %36 = vector.shape_cast %35 : vector<1x2x32xf32> to vector<2x32xf32>
    %37 = vector.shape_cast %34 : vector<2x32xf32> to vector<1x2x32xf32>
    tpu.vector_store %arg12[%c0_18, %c0_19, %c0_20], %37 {strides = array<i32>} : memref<2x2x32xf32, #tpu.memory_space<vmem>>, vector<1x2x32xf32>,
    %c0_21 = arith.constant 0 : index
    %c0_22 = arith.constant 0 : index
    %c0_23 = arith.constant 0 : index
    %38 = vector.load %arg13[%c0_21, %c0_22, %c0_23] : memref<2x2x32xf32, #tpu.memory_space<vmem>>, vector<1x2x32xf32>
    %39 = vector.shape_cast %38 : vector<1x2x32xf32> to vector<2x32xf32>
    %40 = vector.shape_cast %32 : vector<2x32xf32> to vector<1x2x32xf32>
    tpu.vector_store %arg13[%c0_21, %c0_22, %c0_23], %40 {strides = array<i32>} : memref<2x2x32xf32, #tpu.memory_space<vmem>>, vector<1x2x32xf32>,
    %c1 = arith.constant 1 : index
    %c0_24 = arith.constant 0 : index
    %c0_25 = arith.constant 0 : index
    %41 = vector.load %arg12[%c1, %c0_24, %c0_25] : memref<2x2x32xf32, #tpu.memory_space<vmem>>, vector<1x2x32xf32>
    %42 = vector.shape_cast %41 : vector<1x2x32xf32> to vector<2x32xf32>
    %c1_26 = arith.constant 1 : index
    %c0_27 = arith.constant 0 : index
    %c0_28 = arith.constant 0 : index
    %43 = vector.load %arg13[%c1_26, %c0_27, %c0_28] : memref<2x2x32xf32, #tpu.memory_space<vmem>>, vector<1x2x32xf32>
    %44 = vector.shape_cast %43 : vector<1x2x32xf32> to vector<2x32xf32>
    %c0_29 = arith.constant 0 : index
    %c0_30 = arith.constant 0 : index
    %c0_31 = arith.constant 0 : index
    %45 = vector.load %arg5[%c0_29, %c0_30, %c0_31] : memref<1x32x128xf32, #tpu.memory_space<vmem>>, vector<1x32x128xf32>
    %46 = vector.shape_cast %45 : vector<1x32x128xf32> to vector<32x128xf32>
    %cst_32 = arith.constant dense<0.000000e+00> : vector<2x128xf32>
    %47 = tpu.matmul %34, %46, %cst_32 {dimension_numbers = #tpu.dot_dimension_numbers<[1], [0], [0], [1], [0, 0, 1, 1], [], []>} : vector<2x32xf32>, vector<32x128xf32>, vector<2x128xf32> -> vector<2x128xf32>
    %c1_33 = arith.constant 1 : index
    %c0_34 = arith.constant 0 : index
    %c0_35 = arith.constant 0 : index
    %48 = vector.load %arg6[%c1_33, %c0_34, %c0_35] : memref<2x32x128xf32, #tpu.memory_space<vmem>>, vector<1x32x128xf32>
    %49 = vector.shape_cast %48 : vector<1x32x128xf32> to vector<32x128xf32>
    %cst_36 = arith.constant dense<0.000000e+00> : vector<2x128xf32>
    %50 = tpu.matmul %42, %49, %cst_36 {dimension_numbers = #tpu.dot_dimension_numbers<[1], [0], [0], [1], [0, 0, 1, 1], [], []>} : vector<2x32xf32>, vector<32x128xf32>, vector<2x128xf32> -> vector<2x128xf32>
    %51 = arith.addf %47, %50 : vector<2x128xf32>
    %c1_37 = arith.constant 1 : index
    %c0_38 = arith.constant 0 : index
    %c0_39 = arith.constant 0 : index
    %52 = vector.load %arg7[%c1_37, %c0_38, %c0_39] : memref<2x1x128xf32, #tpu.memory_space<vmem>>, vector<1x1x128xf32>
    %53 = vector.shape_cast %52 : vector<1x1x128xf32> to vector<1x128xf32>
    %54 = vector.broadcast %53 : vector<1x128xf32> to vector<2x128xf32>
    %55 = arith.addf %51, %54 : vector<2x128xf32>
    %56 = vector.extract_strided_slice %55 {offsets = [0, 0], sizes = [2, 96], strides = [1, 1]} : vector<2x128xf32> to vector<2x96xf32>
    %57 = arith.negf %56 : vector<2x96xf32>
    %58 = math.exp %57 : vector<2x96xf32>
    %cst_40 = arith.constant 1.000000e+00 : f32
    %59 = vector.broadcast %cst_40 : f32 to vector<2x96xf32>
    %60 = arith.addf %59, %58 : vector<2x96xf32>
    %61 = arith.divf %59, %60 : vector<2x96xf32>
    %62 = vector.extract_strided_slice %61 {offsets = [0, 0], sizes = [2, 32], strides = [1, 1]} : vector<2x96xf32> to vector<2x32xf32>
    %63 = vector.extract_strided_slice %61 {offsets = [0, 32], sizes = [2, 32], strides = [1, 1]} : vector<2x96xf32> to vector<2x32xf32>
    %64 = vector.extract_strided_slice %61 {offsets = [0, 64], sizes = [2, 32], strides = [1, 1]} : vector<2x96xf32> to vector<2x32xf32>
    %65 = vector.extract_strided_slice %55 {offsets = [0, 96], sizes = [2, 32], strides = [1, 1]} : vector<2x128xf32> to vector<2x32xf32>
    %66 = math.tanh %65 : vector<2x32xf32>
    %67 = arith.mulf %63, %44 : vector<2x32xf32>
    %68 = arith.mulf %62, %66 : vector<2x32xf32>
    %69 = arith.addf %67, %68 : vector<2x32xf32>
    %70 = math.tanh %69 : vector<2x32xf32>
    %71 = arith.mulf %64, %70 : vector<2x32xf32>
    %c1_41 = arith.constant 1 : index
    %c0_42 = arith.constant 0 : index
    %c0_43 = arith.constant 0 : index
    %72 = vector.load %arg12[%c1_41, %c0_42, %c0_43] : memref<2x2x32xf32, #tpu.memory_space<vmem>>, vector<1x2x32xf32>
    %73 = vector.shape_cast %72 : vector<1x2x32xf32> to vector<2x32xf32>
    %74 = vector.shape_cast %71 : vector<2x32xf32> to vector<1x2x32xf32>
    tpu.vector_store %arg12[%c1_41, %c0_42, %c0_43], %74 {strides = array<i32>} : memref<2x2x32xf32, #tpu.memory_space<vmem>>, vector<1x2x32xf32>,
    %c1_44 = arith.constant 1 : index
    %c0_45 = arith.constant 0 : index
    %c0_46 = arith.constant 0 : index
    %75 = vector.load %arg13[%c1_44, %c0_45, %c0_46] : memref<2x2x32xf32, #tpu.memory_space<vmem>>, vector<1x2x32xf32>
    %76 = vector.shape_cast %75 : vector<1x2x32xf32> to vector<2x32xf32>
    %77 = vector.shape_cast %69 : vector<2x32xf32> to vector<1x2x32xf32>
    tpu.vector_store %arg13[%c1_44, %c0_45, %c0_46], %77 {strides = array<i32>} : memref<2x2x32xf32, #tpu.memory_space<vmem>>, vector<1x2x32xf32>,
    %c0_47 = arith.constant 0 : index
    %c0_48 = arith.constant 0 : index
    %78 = vector.load %arg11[%c0_47, %c0_48] : memref<16x32xf32, #tpu.memory_space<vmem>>, vector<2x32xf32>
    tpu.vector_store %arg11[%c0_47, %c0_48], %71 {strides = array<i32>} : memref<16x32xf32, #tpu.memory_space<vmem>>, vector<2x32xf32>,
    %c0_49 = arith.constant 0 : index
    %c0_50 = arith.constant 0 : index
    %c0_51 = arith.constant 0 : index
    %79 = vector.load %arg12[%c0_49, %c0_50, %c0_51] : memref<2x2x32xf32, #tpu.memory_space<vmem>>, vector<1x2x32xf32>
    %80 = vector.shape_cast %79 : vector<1x2x32xf32> to vector<2x32xf32>
    %c0_52 = arith.constant 0 : index
    %c0_53 = arith.constant 0 : index
    %c0_54 = arith.constant 0 : index
    %81 = vector.load %arg13[%c0_52, %c0_53, %c0_54] : memref<2x2x32xf32, #tpu.memory_space<vmem>>, vector<1x2x32xf32>
    %82 = vector.shape_cast %81 : vector<1x2x32xf32> to vector<2x32xf32>
    %83 = vector.extract_strided_slice %5 {offsets = [2, 0], sizes = [2, 128], strides = [1, 1]} : vector<16x128xf32> to vector<2x128xf32>
    %c0_55 = arith.constant 0 : index
    %c0_56 = arith.constant 0 : index
    %c0_57 = arith.constant 0 : index
    %84 = vector.load %arg6[%c0_55, %c0_56, %c0_57] : memref<2x32x128xf32, #tpu.memory_space<vmem>>, vector<1x32x128xf32>
    %85 = vector.shape_cast %84 : vector<1x32x128xf32> to vector<32x128xf32>
    %cst_58 = arith.constant dense<0.000000e+00> : vector<2x128xf32>
    %86 = tpu.matmul %80, %85, %cst_58 {dimension_numbers = #tpu.dot_dimension_numbers<[1], [0], [0], [1], [0, 0, 1, 1], [], []>} : vector<2x32xf32>, vector<32x128xf32>, vector<2x128xf32> -> vector<2x128xf32>
    %87 = arith.addf %83, %86 : vector<2x128xf32>
    %c0_59 = arith.constant 0 : index
    %c0_60 = arith.constant 0 : index
    %c0_61 = arith.constant 0 : index
    %88 = vector.load %arg7[%c0_59, %c0_60, %c0_61] : memref<2x1x128xf32, #tpu.memory_space<vmem>>, vector<1x1x128xf32>
    %89 = vector.shape_cast %88 : vector<1x1x128xf32> to vector<1x128xf32>
    %90 = vector.broadcast %89 : vector<1x128xf32> to vector<2x128xf32>
    %91 = arith.addf %87, %90 : vector<2x128xf32>
    %92 = vector.extract_strided_slice %91 {offsets = [0, 0], sizes = [2, 96], strides = [1, 1]} : vector<2x128xf32> to vector<2x96xf32>
    %93 = arith.negf %92 : vector<2x96xf32>
    %94 = math.exp %93 : vector<2x96xf32>
    %cst_62 = arith.constant 1.000000e+00 : f32
    %95 = vector.broadcast %cst_62 : f32 to vector<2x96xf32>
    %96 = arith.addf %95, %94 : vector<2x96xf32>
    %97 = arith.divf %95, %96 : vector<2x96xf32>
    %98 = vector.extract_strided_slice %97 {offsets = [0, 0], sizes = [2, 32], strides = [1, 1]} : vector<2x96xf32> to vector<2x32xf32>
    %99 = vector.extract_strided_slice %97 {offsets = [0, 32], sizes = [2, 32], strides = [1, 1]} : vector<2x96xf32> to vector<2x32xf32>
    %100 = vector.extract_strided_slice %97 {offsets = [0, 64], sizes = [2, 32], strides = [1, 1]} : vector<2x96xf32> to vector<2x32xf32>
    %101 = vector.extract_strided_slice %91 {offsets = [0, 96], sizes = [2, 32], strides = [1, 1]} : vector<2x128xf32> to vector<2x32xf32>
    %102 = math.tanh %101 : vector<2x32xf32>
    %103 = arith.mulf %99, %82 : vector<2x32xf32>
    %104 = arith.mulf %98, %102 : vector<2x32xf32>
    %105 = arith.addf %103, %104 : vector<2x32xf32>
    %106 = math.tanh %105 : vector<2x32xf32>
    %107 = arith.mulf %100, %106 : vector<2x32xf32>
    %c0_63 = arith.constant 0 : index
    %c0_64 = arith.constant 0 : index
    %c0_65 = arith.constant 0 : index
    %108 = vector.load %arg12[%c0_63, %c0_64, %c0_65] : memref<2x2x32xf32, #tpu.memory_space<vmem>>, vector<1x2x32xf32>
    %109 = vector.shape_cast %108 : vector<1x2x32xf32> to vector<2x32xf32>
    %110 = vector.shape_cast %107 : vector<2x32xf32> to vector<1x2x32xf32>
    tpu.vector_store %arg12[%c0_63, %c0_64, %c0_65], %110 {strides = array<i32>} : memref<2x2x32xf32, #tpu.memory_space<vmem>>, vector<1x2x32xf32>,
    %c0_66 = arith.constant 0 : index
    %c0_67 = arith.constant 0 : index
    %c0_68 = arith.constant 0 : index
    %111 = vector.load %arg13[%c0_66, %c0_67, %c0_68] : memref<2x2x32xf32, #tpu.memory_space<vmem>>, vector<1x2x32xf32>
    %112 = vector.shape_cast %111 : vector<1x2x32xf32> to vector<2x32xf32>
    %113 = vector.shape_cast %105 : vector<2x32xf32> to vector<1x2x32xf32>
    tpu.vector_store %arg13[%c0_66, %c0_67, %c0_68], %113 {strides = array<i32>} : memref<2x2x32xf32, #tpu.memory_space<vmem>>, vector<1x2x32xf32>,
    %c1_69 = arith.constant 1 : index
    %c0_70 = arith.constant 0 : index
    %c0_71 = arith.constant 0 : index
    %114 = vector.load %arg12[%c1_69, %c0_70, %c0_71] : memref<2x2x32xf32, #tpu.memory_space<vmem>>, vector<1x2x32xf32>
    %115 = vector.shape_cast %114 : vector<1x2x32xf32> to vector<2x32xf32>
    %c1_72 = arith.constant 1 : index
    %c0_73 = arith.constant 0 : index
    %c0_74 = arith.constant 0 : index
    %116 = vector.load %arg13[%c1_72, %c0_73, %c0_74] : memref<2x2x32xf32, #tpu.memory_space<vmem>>, vector<1x2x32xf32>
    %117 = vector.shape_cast %116 : vector<1x2x32xf32> to vector<2x32xf32>
    %c0_75 = arith.constant 0 : index
    %c0_76 = arith.constant 0 : index
    %c0_77 = arith.constant 0 : index
    %118 = vector.load %arg5[%c0_75, %c0_76, %c0_77] : memref<1x32x128xf32, #tpu.memory_space<vmem>>, vector<1x32x128xf32>
    %119 = vector.shape_cast %118 : vector<1x32x128xf32> to vector<32x128xf32>
    %cst_78 = arith.constant dense<0.000000e+00> : vector<2x128xf32>
    %120 = tpu.matmul %107, %119, %cst_78 {dimension_numbers = #tpu.dot_dimension_numbers<[1], [0], [0], [1], [0, 0, 1, 1], [], []>} : vector<2x32xf32>, vector<32x128xf32>, vector<2x128xf32> -> vector<2x128xf32>
    %c1_79 = arith.constant 1 : index
    %c0_80 = arith.constant 0 : index
    %c0_81 = arith.constant 0 : index
    %121 = vector.load %arg6[%c1_79, %c0_80, %c0_81] : memref<2x32x128xf32, #tpu.memory_space<vmem>>, vector<1x32x128xf32>
    %122 = vector.shape_cast %121 : vector<1x32x128xf32> to vector<32x128xf32>
    %cst_82 = arith.constant dense<0.000000e+00> : vector<2x128xf32>
    %123 = tpu.matmul %115, %122, %cst_82 {dimension_numbers = #tpu.dot_dimension_numbers<[1], [0], [0], [1], [0, 0, 1, 1], [], []>} : vector<2x32xf32>, vector<32x128xf32>, vector<2x128xf32> -> vector<2x128xf32>
    %124 = arith.addf %120, %123 : vector<2x128xf32>
    %c1_83 = arith.constant 1 : index
    %c0_84 = arith.constant 0 : index
    %c0_85 = arith.constant 0 : index
    %125 = vector.load %arg7[%c1_83, %c0_84, %c0_85] : memref<2x1x128xf32, #tpu.memory_space<vmem>>, vector<1x1x128xf32>
    %126 = vector.shape_cast %125 : vector<1x1x128xf32> to vector<1x128xf32>
    %127 = vector.broadcast %126 : vector<1x128xf32> to vector<2x128xf32>
    %128 = arith.addf %124, %127 : vector<2x128xf32>
    %129 = vector.extract_strided_slice %128 {offsets = [0, 0], sizes = [2, 96], strides = [1, 1]} : vector<2x128xf32> to vector<2x96xf32>
    %130 = arith.negf %129 : vector<2x96xf32>
    %131 = math.exp %130 : vector<2x96xf32>
    %cst_86 = arith.constant 1.000000e+00 : f32
    %132 = vector.broadcast %cst_86 : f32 to vector<2x96xf32>
    %133 = arith.addf %132, %131 : vector<2x96xf32>
    %134 = arith.divf %132, %133 : vector<2x96xf32>
    %135 = vector.extract_strided_slice %134 {offsets = [0, 0], sizes = [2, 32], strides = [1, 1]} : vector<2x96xf32> to vector<2x32xf32>
    %136 = vector.extract_strided_slice %134 {offsets = [0, 32], sizes = [2, 32], strides = [1, 1]} : vector<2x96xf32> to vector<2x32xf32>
    %137 = vector.extract_strided_slice %134 {offsets = [0, 64], sizes = [2, 32], strides = [1, 1]} : vector<2x96xf32> to vector<2x32xf32>
    %138 = vector.extract_strided_slice %128 {offsets = [0, 96], sizes = [2, 32], strides = [1, 1]} : vector<2x128xf32> to vector<2x32xf32>
    %139 = math.tanh %138 : vector<2x32xf32>
    %140 = arith.mulf %136, %117 : vector<2x32xf32>
    %141 = arith.mulf %135, %139 : vector<2x32xf32>
    %142 = arith.addf %140, %141 : vector<2x32xf32>
    %143 = math.tanh %142 : vector<2x32xf32>
    %144 = arith.mulf %137, %143 : vector<2x32xf32>
    %c1_87 = arith.constant 1 : index
    %c0_88 = arith.constant 0 : index
    %c0_89 = arith.constant 0 : index
    %145 = vector.load %arg12[%c1_87, %c0_88, %c0_89] : memref<2x2x32xf32, #tpu.memory_space<vmem>>, vector<1x2x32xf32>
    %146 = vector.shape_cast %145 : vector<1x2x32xf32> to vector<2x32xf32>
    %147 = vector.shape_cast %144 : vector<2x32xf32> to vector<1x2x32xf32>
    tpu.vector_store %arg12[%c1_87, %c0_88, %c0_89], %147 {strides = array<i32>} : memref<2x2x32xf32, #tpu.memory_space<vmem>>, vector<1x2x32xf32>,
    %c1_90 = arith.constant 1 : index
    %c0_91 = arith.constant 0 : index
    %c0_92 = arith.constant 0 : index
    %148 = vector.load %arg13[%c1_90, %c0_91, %c0_92] : memref<2x2x32xf32, #tpu.memory_space<vmem>>, vector<1x2x32xf32>
    %149 = vector.shape_cast %148 : vector<1x2x32xf32> to vector<2x32xf32>
    %150 = vector.shape_cast %142 : vector<2x32xf32> to vector<1x2x32xf32>
    tpu.vector_store %arg13[%c1_90, %c0_91, %c0_92], %150 {strides = array<i32>} : memref<2x2x32xf32, #tpu.memory_space<vmem>>, vector<1x2x32xf32>,
    %c2 = arith.constant 2 : index
    %c0_93 = arith.constant 0 : index
    %151 = vector.load %arg11[%c2, %c0_93] : memref<16x32xf32, #tpu.memory_space<vmem>>, vector<2x32xf32>
    tpu.vector_store %arg11[%c2, %c0_93], %144 {strides = array<i32>} : memref<16x32xf32, #tpu.memory_space<vmem>>, vector<2x32xf32>,
    %c0_94 = arith.constant 0 : index
    %c0_95 = arith.constant 0 : index
    %c0_96 = arith.constant 0 : index
    %152 = vector.load %arg12[%c0_94, %c0_95, %c0_96] : memref<2x2x32xf32, #tpu.memory_space<vmem>>, vector<1x2x32xf32>
    %153 = vector.shape_cast %152 : vector<1x2x32xf32> to vector<2x32xf32>
    %c0_97 = arith.constant 0 : index
    %c0_98 = arith.constant 0 : index
    %c0_99 = arith.constant 0 : index
    %154 = vector.load %arg13[%c0_97, %c0_98, %c0_99] : memref<2x2x32xf32, #tpu.memory_space<vmem>>, vector<1x2x32xf32>
    %155 = vector.shape_cast %154 : vector<1x2x32xf32> to vector<2x32xf32>
    %156 = vector.extract_strided_slice %5 {offsets = [4, 0], sizes = [2, 128], strides = [1, 1]} : vector<16x128xf32> to vector<2x128xf32>
    %c0_100 = arith.constant 0 : index
    %c0_101 = arith.constant 0 : index
    %c0_102 = arith.constant 0 : index
    %157 = vector.load %arg6[%c0_100, %c0_101, %c0_102] : memref<2x32x128xf32, #tpu.memory_space<vmem>>, vector<1x32x128xf32>
    %158 = vector.shape_cast %157 : vector<1x32x128xf32> to vector<32x128xf32>
    %cst_103 = arith.constant dense<0.000000e+00> : vector<2x128xf32>
    %159 = tpu.matmul %153, %158, %cst_103 {dimension_numbers = #tpu.dot_dimension_numbers<[1], [0], [0], [1], [0, 0, 1, 1], [], []>} : vector<2x32xf32>, vector<32x128xf32>, vector<2x128xf32> -> vector<2x128xf32>
    %160 = arith.addf %156, %159 : vector<2x128xf32>
    %c0_104 = arith.constant 0 : index
    %c0_105 = arith.constant 0 : index
    %c0_106 = arith.constant 0 : index
    %161 = vector.load %arg7[%c0_104, %c0_105, %c0_106] : memref<2x1x128xf32, #tpu.memory_space<vmem>>, vector<1x1x128xf32>
    %162 = vector.shape_cast %161 : vector<1x1x128xf32> to vector<1x128xf32>
    %163 = vector.broadcast %162 : vector<1x128xf32> to vector<2x128xf32>
    %164 = arith.addf %160, %163 : vector<2x128xf32>
    %165 = vector.extract_strided_slice %164 {offsets = [0, 0], sizes = [2, 96], strides = [1, 1]} : vector<2x128xf32> to vector<2x96xf32>
    %166 = arith.negf %165 : vector<2x96xf32>
    %167 = math.exp %166 : vector<2x96xf32>
    %cst_107 = arith.constant 1.000000e+00 : f32
    %168 = vector.broadcast %cst_107 : f32 to vector<2x96xf32>
    %169 = arith.addf %168, %167 : vector<2x96xf32>
    %170 = arith.divf %168, %169 : vector<2x96xf32>
    %171 = vector.extract_strided_slice %170 {offsets = [0, 0], sizes = [2, 32], strides = [1, 1]} : vector<2x96xf32> to vector<2x32xf32>
    %172 = vector.extract_strided_slice %170 {offsets = [0, 32], sizes = [2, 32], strides = [1, 1]} : vector<2x96xf32> to vector<2x32xf32>
    %173 = vector.extract_strided_slice %170 {offsets = [0, 64], sizes = [2, 32], strides = [1, 1]} : vector<2x96xf32> to vector<2x32xf32>
    %174 = vector.extract_strided_slice %164 {offsets = [0, 96], sizes = [2, 32], strides = [1, 1]} : vector<2x128xf32> to vector<2x32xf32>
    %175 = math.tanh %174 : vector<2x32xf32>
    %176 = arith.mulf %172, %155 : vector<2x32xf32>
    %177 = arith.mulf %171, %175 : vector<2x32xf32>
    %178 = arith.addf %176, %177 : vector<2x32xf32>
    %179 = math.tanh %178 : vector<2x32xf32>
    %180 = arith.mulf %173, %179 : vector<2x32xf32>
    %c0_108 = arith.constant 0 : index
    %c0_109 = arith.constant 0 : index
    %c0_110 = arith.constant 0 : index
    %181 = vector.load %arg12[%c0_108, %c0_109, %c0_110] : memref<2x2x32xf32, #tpu.memory_space<vmem>>, vector<1x2x32xf32>
    %182 = vector.shape_cast %181 : vector<1x2x32xf32> to vector<2x32xf32>
    %183 = vector.shape_cast %180 : vector<2x32xf32> to vector<1x2x32xf32>
    tpu.vector_store %arg12[%c0_108, %c0_109, %c0_110], %183 {strides = array<i32>} : memref<2x2x32xf32, #tpu.memory_space<vmem>>, vector<1x2x32xf32>,
    %c0_111 = arith.constant 0 : index
    %c0_112 = arith.constant 0 : index
    %c0_113 = arith.constant 0 : index
    %184 = vector.load %arg13[%c0_111, %c0_112, %c0_113] : memref<2x2x32xf32, #tpu.memory_space<vmem>>, vector<1x2x32xf32>
    %185 = vector.shape_cast %184 : vector<1x2x32xf32> to vector<2x32xf32>
    %186 = vector.shape_cast %178 : vector<2x32xf32> to vector<1x2x32xf32>
    tpu.vector_store %arg13[%c0_111, %c0_112, %c0_113], %186 {strides = array<i32>} : memref<2x2x32xf32, #tpu.memory_space<vmem>>, vector<1x2x32xf32>,
    %c1_114 = arith.constant 1 : index
    %c0_115 = arith.constant 0 : index
    %c0_116 = arith.constant 0 : index
    %187 = vector.load %arg12[%c1_114, %c0_115, %c0_116] : memref<2x2x32xf32, #tpu.memory_space<vmem>>, vector<1x2x32xf32>
    %188 = vector.shape_cast %187 : vector<1x2x32xf32> to vector<2x32xf32>
    %c1_117 = arith.constant 1 : index
    %c0_118 = arith.constant 0 : index
    %c0_119 = arith.constant 0 : index
    %189 = vector.load %arg13[%c1_117, %c0_118, %c0_119] : memref<2x2x32xf32, #tpu.memory_space<vmem>>, vector<1x2x32xf32>
    %190 = vector.shape_cast %189 : vector<1x2x32xf32> to vector<2x32xf32>
    %c0_120 = arith.constant 0 : index
    %c0_121 = arith.constant 0 : index
    %c0_122 = arith.constant 0 : index
    %191 = vector.load %arg5[%c0_120, %c0_121, %c0_122] : memref<1x32x128xf32, #tpu.memory_space<vmem>>, vector<1x32x128xf32>
    %192 = vector.shape_cast %191 : vector<1x32x128xf32> to vector<32x128xf32>
    %cst_123 = arith.constant dense<0.000000e+00> : vector<2x128xf32>
    %193 = tpu.matmul %180, %192, %cst_123 {dimension_numbers = #tpu.dot_dimension_numbers<[1], [0], [0], [1], [0, 0, 1, 1], [], []>} : vector<2x32xf32>, vector<32x128xf32>, vector<2x128xf32> -> vector<2x128xf32>
    %c1_124 = arith.constant 1 : index
    %c0_125 = arith.constant 0 : index
    %c0_126 = arith.constant 0 : index
    %194 = vector.load %arg6[%c1_124, %c0_125, %c0_126] : memref<2x32x128xf32, #tpu.memory_space<vmem>>, vector<1x32x128xf32>
    %195 = vector.shape_cast %194 : vector<1x32x128xf32> to vector<32x128xf32>
    %cst_127 = arith.constant dense<0.000000e+00> : vector<2x128xf32>
    %196 = tpu.matmul %188, %195, %cst_127 {dimension_numbers = #tpu.dot_dimension_numbers<[1], [0], [0], [1], [0, 0, 1, 1], [], []>} : vector<2x32xf32>, vector<32x128xf32>, vector<2x128xf32> -> vector<2x128xf32>
    %197 = arith.addf %193, %196 : vector<2x128xf32>
    %c1_128 = arith.constant 1 : index
    %c0_129 = arith.constant 0 : index
    %c0_130 = arith.constant 0 : index
    %198 = vector.load %arg7[%c1_128, %c0_129, %c0_130] : memref<2x1x128xf32, #tpu.memory_space<vmem>>, vector<1x1x128xf32>
    %199 = vector.shape_cast %198 : vector<1x1x128xf32> to vector<1x128xf32>
    %200 = vector.broadcast %199 : vector<1x128xf32> to vector<2x128xf32>
    %201 = arith.addf %197, %200 : vector<2x128xf32>
    %202 = vector.extract_strided_slice %201 {offsets = [0, 0], sizes = [2, 96], strides = [1, 1]} : vector<2x128xf32> to vector<2x96xf32>
    %203 = arith.negf %202 : vector<2x96xf32>
    %204 = math.exp %203 : vector<2x96xf32>
    %cst_131 = arith.constant 1.000000e+00 : f32
    %205 = vector.broadcast %cst_131 : f32 to vector<2x96xf32>
    %206 = arith.addf %205, %204 : vector<2x96xf32>
    %207 = arith.divf %205, %206 : vector<2x96xf32>
    %208 = vector.extract_strided_slice %207 {offsets = [0, 0], sizes = [2, 32], strides = [1, 1]} : vector<2x96xf32> to vector<2x32xf32>
    %209 = vector.extract_strided_slice %207 {offsets = [0, 32], sizes = [2, 32], strides = [1, 1]} : vector<2x96xf32> to vector<2x32xf32>
    %210 = vector.extract_strided_slice %207 {offsets = [0, 64], sizes = [2, 32], strides = [1, 1]} : vector<2x96xf32> to vector<2x32xf32>
    %211 = vector.extract_strided_slice %201 {offsets = [0, 96], sizes = [2, 32], strides = [1, 1]} : vector<2x128xf32> to vector<2x32xf32>
    %212 = math.tanh %211 : vector<2x32xf32>
    %213 = arith.mulf %209, %190 : vector<2x32xf32>
    %214 = arith.mulf %208, %212 : vector<2x32xf32>
    %215 = arith.addf %213, %214 : vector<2x32xf32>
    %216 = math.tanh %215 : vector<2x32xf32>
    %217 = arith.mulf %210, %216 : vector<2x32xf32>
    %c1_132 = arith.constant 1 : index
    %c0_133 = arith.constant 0 : index
    %c0_134 = arith.constant 0 : index
    %218 = vector.load %arg12[%c1_132, %c0_133, %c0_134] : memref<2x2x32xf32, #tpu.memory_space<vmem>>, vector<1x2x32xf32>
    %219 = vector.shape_cast %218 : vector<1x2x32xf32> to vector<2x32xf32>
    %220 = vector.shape_cast %217 : vector<2x32xf32> to vector<1x2x32xf32>
    tpu.vector_store %arg12[%c1_132, %c0_133, %c0_134], %220 {strides = array<i32>} : memref<2x2x32xf32, #tpu.memory_space<vmem>>, vector<1x2x32xf32>,
    %c1_135 = arith.constant 1 : index
    %c0_136 = arith.constant 0 : index
    %c0_137 = arith.constant 0 : index
    %221 = vector.load %arg13[%c1_135, %c0_136, %c0_137] : memref<2x2x32xf32, #tpu.memory_space<vmem>>, vector<1x2x32xf32>
    %222 = vector.shape_cast %221 : vector<1x2x32xf32> to vector<2x32xf32>
    %223 = vector.shape_cast %215 : vector<2x32xf32> to vector<1x2x32xf32>
    tpu.vector_store %arg13[%c1_135, %c0_136, %c0_137], %223 {strides = array<i32>} : memref<2x2x32xf32, #tpu.memory_space<vmem>>, vector<1x2x32xf32>,
    %c4 = arith.constant 4 : index
    %c0_138 = arith.constant 0 : index
    %224 = vector.load %arg11[%c4, %c0_138] : memref<16x32xf32, #tpu.memory_space<vmem>>, vector<2x32xf32>
    tpu.vector_store %arg11[%c4, %c0_138], %217 {strides = array<i32>} : memref<16x32xf32, #tpu.memory_space<vmem>>, vector<2x32xf32>,
    %c0_139 = arith.constant 0 : index
    %c0_140 = arith.constant 0 : index
    %c0_141 = arith.constant 0 : index
    %225 = vector.load %arg12[%c0_139, %c0_140, %c0_141] : memref<2x2x32xf32, #tpu.memory_space<vmem>>, vector<1x2x32xf32>
    %226 = vector.shape_cast %225 : vector<1x2x32xf32> to vector<2x32xf32>
    %c0_142 = arith.constant 0 : index
    %c0_143 = arith.constant 0 : index
    %c0_144 = arith.constant 0 : index
    %227 = vector.load %arg13[%c0_142, %c0_143, %c0_144] : memref<2x2x32xf32, #tpu.memory_space<vmem>>, vector<1x2x32xf32>
    %228 = vector.shape_cast %227 : vector<1x2x32xf32> to vector<2x32xf32>
    %229 = vector.extract_strided_slice %5 {offsets = [6, 0], sizes = [2, 128], strides = [1, 1]} : vector<16x128xf32> to vector<2x128xf32>
    %c0_145 = arith.constant 0 : index
    %c0_146 = arith.constant 0 : index
    %c0_147 = arith.constant 0 : index
    %230 = vector.load %arg6[%c0_145, %c0_146, %c0_147] : memref<2x32x128xf32, #tpu.memory_space<vmem>>, vector<1x32x128xf32>
    %231 = vector.shape_cast %230 : vector<1x32x128xf32> to vector<32x128xf32>
    %cst_148 = arith.constant dense<0.000000e+00> : vector<2x128xf32>
    %232 = tpu.matmul %226, %231, %cst_148 {dimension_numbers = #tpu.dot_dimension_numbers<[1], [0], [0], [1], [0, 0, 1, 1], [], []>} : vector<2x32xf32>, vector<32x128xf32>, vector<2x128xf32> -> vector<2x128xf32>
    %233 = arith.addf %229, %232 : vector<2x128xf32>
    %c0_149 = arith.constant 0 : index
    %c0_150 = arith.constant 0 : index
    %c0_151 = arith.constant 0 : index
    %234 = vector.load %arg7[%c0_149, %c0_150, %c0_151] : memref<2x1x128xf32, #tpu.memory_space<vmem>>, vector<1x1x128xf32>
    %235 = vector.shape_cast %234 : vector<1x1x128xf32> to vector<1x128xf32>
    %236 = vector.broadcast %235 : vector<1x128xf32> to vector<2x128xf32>
    %237 = arith.addf %233, %236 : vector<2x128xf32>
    %238 = vector.extract_strided_slice %237 {offsets = [0, 0], sizes = [2, 96], strides = [1, 1]} : vector<2x128xf32> to vector<2x96xf32>
    %239 = arith.negf %238 : vector<2x96xf32>
    %240 = math.exp %239 : vector<2x96xf32>
    %cst_152 = arith.constant 1.000000e+00 : f32
    %241 = vector.broadcast %cst_152 : f32 to vector<2x96xf32>
    %242 = arith.addf %241, %240 : vector<2x96xf32>
    %243 = arith.divf %241, %242 : vector<2x96xf32>
    %244 = vector.extract_strided_slice %243 {offsets = [0, 0], sizes = [2, 32], strides = [1, 1]} : vector<2x96xf32> to vector<2x32xf32>
    %245 = vector.extract_strided_slice %243 {offsets = [0, 32], sizes = [2, 32], strides = [1, 1]} : vector<2x96xf32> to vector<2x32xf32>
    %246 = vector.extract_strided_slice %243 {offsets = [0, 64], sizes = [2, 32], strides = [1, 1]} : vector<2x96xf32> to vector<2x32xf32>
    %247 = vector.extract_strided_slice %237 {offsets = [0, 96], sizes = [2, 32], strides = [1, 1]} : vector<2x128xf32> to vector<2x32xf32>
    %248 = math.tanh %247 : vector<2x32xf32>
    %249 = arith.mulf %245, %228 : vector<2x32xf32>
    %250 = arith.mulf %244, %248 : vector<2x32xf32>
    %251 = arith.addf %249, %250 : vector<2x32xf32>
    %252 = math.tanh %251 : vector<2x32xf32>
    %253 = arith.mulf %246, %252 : vector<2x32xf32>
    %c0_153 = arith.constant 0 : index
    %c0_154 = arith.constant 0 : index
    %c0_155 = arith.constant 0 : index
    %254 = vector.load %arg12[%c0_153, %c0_154, %c0_155] : memref<2x2x32xf32, #tpu.memory_space<vmem>>, vector<1x2x32xf32>
    %255 = vector.shape_cast %254 : vector<1x2x32xf32> to vector<2x32xf32>
    %256 = vector.shape_cast %253 : vector<2x32xf32> to vector<1x2x32xf32>
    tpu.vector_store %arg12[%c0_153, %c0_154, %c0_155], %256 {strides = array<i32>} : memref<2x2x32xf32, #tpu.memory_space<vmem>>, vector<1x2x32xf32>,
    %c0_156 = arith.constant 0 : index
    %c0_157 = arith.constant 0 : index
    %c0_158 = arith.constant 0 : index
    %257 = vector.load %arg13[%c0_156, %c0_157, %c0_158] : memref<2x2x32xf32, #tpu.memory_space<vmem>>, vector<1x2x32xf32>
    %258 = vector.shape_cast %257 : vector<1x2x32xf32> to vector<2x32xf32>
    %259 = vector.shape_cast %251 : vector<2x32xf32> to vector<1x2x32xf32>
    tpu.vector_store %arg13[%c0_156, %c0_157, %c0_158], %259 {strides = array<i32>} : memref<2x2x32xf32, #tpu.memory_space<vmem>>, vector<1x2x32xf32>,
    %c1_159 = arith.constant 1 : index
    %c0_160 = arith.constant 0 : index
    %c0_161 = arith.constant 0 : index
    %260 = vector.load %arg12[%c1_159, %c0_160, %c0_161] : memref<2x2x32xf32, #tpu.memory_space<vmem>>, vector<1x2x32xf32>
    %261 = vector.shape_cast %260 : vector<1x2x32xf32> to vector<2x32xf32>
    %c1_162 = arith.constant 1 : index
    %c0_163 = arith.constant 0 : index
    %c0_164 = arith.constant 0 : index
    %262 = vector.load %arg13[%c1_162, %c0_163, %c0_164] : memref<2x2x32xf32, #tpu.memory_space<vmem>>, vector<1x2x32xf32>
    %263 = vector.shape_cast %262 : vector<1x2x32xf32> to vector<2x32xf32>
    %c0_165 = arith.constant 0 : index
    %c0_166 = arith.constant 0 : index
    %c0_167 = arith.constant 0 : index
    %264 = vector.load %arg5[%c0_165, %c0_166, %c0_167] : memref<1x32x128xf32, #tpu.memory_space<vmem>>, vector<1x32x128xf32>
    %265 = vector.shape_cast %264 : vector<1x32x128xf32> to vector<32x128xf32>
    %cst_168 = arith.constant dense<0.000000e+00> : vector<2x128xf32>
    %266 = tpu.matmul %253, %265, %cst_168 {dimension_numbers = #tpu.dot_dimension_numbers<[1], [0], [0], [1], [0, 0, 1, 1], [], []>} : vector<2x32xf32>, vector<32x128xf32>, vector<2x128xf32> -> vector<2x128xf32>
    %c1_169 = arith.constant 1 : index
    %c0_170 = arith.constant 0 : index
    %c0_171 = arith.constant 0 : index
    %267 = vector.load %arg6[%c1_169, %c0_170, %c0_171] : memref<2x32x128xf32, #tpu.memory_space<vmem>>, vector<1x32x128xf32>
    %268 = vector.shape_cast %267 : vector<1x32x128xf32> to vector<32x128xf32>
    %cst_172 = arith.constant dense<0.000000e+00> : vector<2x128xf32>
    %269 = tpu.matmul %261, %268, %cst_172 {dimension_numbers = #tpu.dot_dimension_numbers<[1], [0], [0], [1], [0, 0, 1, 1], [], []>} : vector<2x32xf32>, vector<32x128xf32>, vector<2x128xf32> -> vector<2x128xf32>
    %270 = arith.addf %266, %269 : vector<2x128xf32>
    %c1_173 = arith.constant 1 : index
    %c0_174 = arith.constant 0 : index
    %c0_175 = arith.constant 0 : index
    %271 = vector.load %arg7[%c1_173, %c0_174, %c0_175] : memref<2x1x128xf32, #tpu.memory_space<vmem>>, vector<1x1x128xf32>
    %272 = vector.shape_cast %271 : vector<1x1x128xf32> to vector<1x128xf32>
    %273 = vector.broadcast %272 : vector<1x128xf32> to vector<2x128xf32>
    %274 = arith.addf %270, %273 : vector<2x128xf32>
    %275 = vector.extract_strided_slice %274 {offsets = [0, 0], sizes = [2, 96], strides = [1, 1]} : vector<2x128xf32> to vector<2x96xf32>
    %276 = arith.negf %275 : vector<2x96xf32>
    %277 = math.exp %276 : vector<2x96xf32>
    %cst_176 = arith.constant 1.000000e+00 : f32
    %278 = vector.broadcast %cst_176 : f32 to vector<2x96xf32>
    %279 = arith.addf %278, %277 : vector<2x96xf32>
    %280 = arith.divf %278, %279 : vector<2x96xf32>
    %281 = vector.extract_strided_slice %280 {offsets = [0, 0], sizes = [2, 32], strides = [1, 1]} : vector<2x96xf32> to vector<2x32xf32>
    %282 = vector.extract_strided_slice %280 {offsets = [0, 32], sizes = [2, 32], strides = [1, 1]} : vector<2x96xf32> to vector<2x32xf32>
    %283 = vector.extract_strided_slice %280 {offsets = [0, 64], sizes = [2, 32], strides = [1, 1]} : vector<2x96xf32> to vector<2x32xf32>
    %284 = vector.extract_strided_slice %274 {offsets = [0, 96], sizes = [2, 32], strides = [1, 1]} : vector<2x128xf32> to vector<2x32xf32>
    %285 = math.tanh %284 : vector<2x32xf32>
    %286 = arith.mulf %282, %263 : vector<2x32xf32>
    %287 = arith.mulf %281, %285 : vector<2x32xf32>
    %288 = arith.addf %286, %287 : vector<2x32xf32>
    %289 = math.tanh %288 : vector<2x32xf32>
    %290 = arith.mulf %283, %289 : vector<2x32xf32>
    %c1_177 = arith.constant 1 : index
    %c0_178 = arith.constant 0 : index
    %c0_179 = arith.constant 0 : index
    %291 = vector.load %arg12[%c1_177, %c0_178, %c0_179] : memref<2x2x32xf32, #tpu.memory_space<vmem>>, vector<1x2x32xf32>
    %292 = vector.shape_cast %291 : vector<1x2x32xf32> to vector<2x32xf32>
    %293 = vector.shape_cast %290 : vector<2x32xf32> to vector<1x2x32xf32>
    tpu.vector_store %arg12[%c1_177, %c0_178, %c0_179], %293 {strides = array<i32>} : memref<2x2x32xf32, #tpu.memory_space<vmem>>, vector<1x2x32xf32>,
    %c1_180 = arith.constant 1 : index
    %c0_181 = arith.constant 0 : index
    %c0_182 = arith.constant 0 : index
    %294 = vector.load %arg13[%c1_180, %c0_181, %c0_182] : memref<2x2x32xf32, #tpu.memory_space<vmem>>, vector<1x2x32xf32>
    %295 = vector.shape_cast %294 : vector<1x2x32xf32> to vector<2x32xf32>
    %296 = vector.shape_cast %288 : vector<2x32xf32> to vector<1x2x32xf32>
    tpu.vector_store %arg13[%c1_180, %c0_181, %c0_182], %296 {strides = array<i32>} : memref<2x2x32xf32, #tpu.memory_space<vmem>>, vector<1x2x32xf32>,
    %c6 = arith.constant 6 : index
    %c0_183 = arith.constant 0 : index
    %297 = vector.load %arg11[%c6, %c0_183] : memref<16x32xf32, #tpu.memory_space<vmem>>, vector<2x32xf32>
    tpu.vector_store %arg11[%c6, %c0_183], %290 {strides = array<i32>} : memref<16x32xf32, #tpu.memory_space<vmem>>, vector<2x32xf32>,
    %c0_184 = arith.constant 0 : index
    %c0_185 = arith.constant 0 : index
    %c0_186 = arith.constant 0 : index
    %298 = vector.load %arg12[%c0_184, %c0_185, %c0_186] : memref<2x2x32xf32, #tpu.memory_space<vmem>>, vector<1x2x32xf32>
    %299 = vector.shape_cast %298 : vector<1x2x32xf32> to vector<2x32xf32>
    %c0_187 = arith.constant 0 : index
    %c0_188 = arith.constant 0 : index
    %c0_189 = arith.constant 0 : index
    %300 = vector.load %arg13[%c0_187, %c0_188, %c0_189] : memref<2x2x32xf32, #tpu.memory_space<vmem>>, vector<1x2x32xf32>
    %301 = vector.shape_cast %300 : vector<1x2x32xf32> to vector<2x32xf32>
    %302 = vector.extract_strided_slice %5 {offsets = [8, 0], sizes = [2, 128], strides = [1, 1]} : vector<16x128xf32> to vector<2x128xf32>
    %c0_190 = arith.constant 0 : index
    %c0_191 = arith.constant 0 : index
    %c0_192 = arith.constant 0 : index
    %303 = vector.load %arg6[%c0_190, %c0_191, %c0_192] : memref<2x32x128xf32, #tpu.memory_space<vmem>>, vector<1x32x128xf32>
    %304 = vector.shape_cast %303 : vector<1x32x128xf32> to vector<32x128xf32>
    %cst_193 = arith.constant dense<0.000000e+00> : vector<2x128xf32>
    %305 = tpu.matmul %299, %304, %cst_193 {dimension_numbers = #tpu.dot_dimension_numbers<[1], [0], [0], [1], [0, 0, 1, 1], [], []>} : vector<2x32xf32>, vector<32x128xf32>, vector<2x128xf32> -> vector<2x128xf32>
    %306 = arith.addf %302, %305 : vector<2x128xf32>
    %c0_194 = arith.constant 0 : index
    %c0_195 = arith.constant 0 : index
    %c0_196 = arith.constant 0 : index
    %307 = vector.load %arg7[%c0_194, %c0_195, %c0_196] : memref<2x1x128xf32, #tpu.memory_space<vmem>>, vector<1x1x128xf32>
    %308 = vector.shape_cast %307 : vector<1x1x128xf32> to vector<1x128xf32>
    %309 = vector.broadcast %308 : vector<1x128xf32> to vector<2x128xf32>
    %310 = arith.addf %306, %309 : vector<2x128xf32>
    %311 = vector.extract_strided_slice %310 {offsets = [0, 0], sizes = [2, 96], strides = [1, 1]} : vector<2x128xf32> to vector<2x96xf32>
    %312 = arith.negf %311 : vector<2x96xf32>
    %313 = math.exp %312 : vector<2x96xf32>
    %cst_197 = arith.constant 1.000000e+00 : f32
    %314 = vector.broadcast %cst_197 : f32 to vector<2x96xf32>
    %315 = arith.addf %314, %313 : vector<2x96xf32>
    %316 = arith.divf %314, %315 : vector<2x96xf32>
    %317 = vector.extract_strided_slice %316 {offsets = [0, 0], sizes = [2, 32], strides = [1, 1]} : vector<2x96xf32> to vector<2x32xf32>
    %318 = vector.extract_strided_slice %316 {offsets = [0, 32], sizes = [2, 32], strides = [1, 1]} : vector<2x96xf32> to vector<2x32xf32>
    %319 = vector.extract_strided_slice %316 {offsets = [0, 64], sizes = [2, 32], strides = [1, 1]} : vector<2x96xf32> to vector<2x32xf32>
    %320 = vector.extract_strided_slice %310 {offsets = [0, 96], sizes = [2, 32], strides = [1, 1]} : vector<2x128xf32> to vector<2x32xf32>
    %321 = math.tanh %320 : vector<2x32xf32>
    %322 = arith.mulf %318, %301 : vector<2x32xf32>
    %323 = arith.mulf %317, %321 : vector<2x32xf32>
    %324 = arith.addf %322, %323 : vector<2x32xf32>
    %325 = math.tanh %324 : vector<2x32xf32>
    %326 = arith.mulf %319, %325 : vector<2x32xf32>
    %c0_198 = arith.constant 0 : index
    %c0_199 = arith.constant 0 : index
    %c0_200 = arith.constant 0 : index
    %327 = vector.load %arg12[%c0_198, %c0_199, %c0_200] : memref<2x2x32xf32, #tpu.memory_space<vmem>>, vector<1x2x32xf32>
    %328 = vector.shape_cast %327 : vector<1x2x32xf32> to vector<2x32xf32>
    %329 = vector.shape_cast %326 : vector<2x32xf32> to vector<1x2x32xf32>
    tpu.vector_store %arg12[%c0_198, %c0_199, %c0_200], %329 {strides = array<i32>} : memref<2x2x32xf32, #tpu.memory_space<vmem>>, vector<1x2x32xf32>,
    %c0_201 = arith.constant 0 : index
    %c0_202 = arith.constant 0 : index
    %c0_203 = arith.constant 0 : index
    %330 = vector.load %arg13[%c0_201, %c0_202, %c0_203] : memref<2x2x32xf32, #tpu.memory_space<vmem>>, vector<1x2x32xf32>
    %331 = vector.shape_cast %330 : vector<1x2x32xf32> to vector<2x32xf32>
    %332 = vector.shape_cast %324 : vector<2x32xf32> to vector<1x2x32xf32>
    tpu.vector_store %arg13[%c0_201, %c0_202, %c0_203], %332 {strides = array<i32>} : memref<2x2x32xf32, #tpu.memory_space<vmem>>, vector<1x2x32xf32>,
    %c1_204 = arith.constant 1 : index
    %c0_205 = arith.constant 0 : index
    %c0_206 = arith.constant 0 : index
    %333 = vector.load %arg12[%c1_204, %c0_205, %c0_206] : memref<2x2x32xf32, #tpu.memory_space<vmem>>, vector<1x2x32xf32>
    %334 = vector.shape_cast %333 : vector<1x2x32xf32> to vector<2x32xf32>
    %c1_207 = arith.constant 1 : index
    %c0_208 = arith.constant 0 : index
    %c0_209 = arith.constant 0 : index
    %335 = vector.load %arg13[%c1_207, %c0_208, %c0_209] : memref<2x2x32xf32, #tpu.memory_space<vmem>>, vector<1x2x32xf32>
    %336 = vector.shape_cast %335 : vector<1x2x32xf32> to vector<2x32xf32>
    %c0_210 = arith.constant 0 : index
    %c0_211 = arith.constant 0 : index
    %c0_212 = arith.constant 0 : index
    %337 = vector.load %arg5[%c0_210, %c0_211, %c0_212] : memref<1x32x128xf32, #tpu.memory_space<vmem>>, vector<1x32x128xf32>
    %338 = vector.shape_cast %337 : vector<1x32x128xf32> to vector<32x128xf32>
    %cst_213 = arith.constant dense<0.000000e+00> : vector<2x128xf32>
    %339 = tpu.matmul %326, %338, %cst_213 {dimension_numbers = #tpu.dot_dimension_numbers<[1], [0], [0], [1], [0, 0, 1, 1], [], []>} : vector<2x32xf32>, vector<32x128xf32>, vector<2x128xf32> -> vector<2x128xf32>
    %c1_214 = arith.constant 1 : index
    %c0_215 = arith.constant 0 : index
    %c0_216 = arith.constant 0 : index
    %340 = vector.load %arg6[%c1_214, %c0_215, %c0_216] : memref<2x32x128xf32, #tpu.memory_space<vmem>>, vector<1x32x128xf32>
    %341 = vector.shape_cast %340 : vector<1x32x128xf32> to vector<32x128xf32>
    %cst_217 = arith.constant dense<0.000000e+00> : vector<2x128xf32>
    %342 = tpu.matmul %334, %341, %cst_217 {dimension_numbers = #tpu.dot_dimension_numbers<[1], [0], [0], [1], [0, 0, 1, 1], [], []>} : vector<2x32xf32>, vector<32x128xf32>, vector<2x128xf32> -> vector<2x128xf32>
    %343 = arith.addf %339, %342 : vector<2x128xf32>
    %c1_218 = arith.constant 1 : index
    %c0_219 = arith.constant 0 : index
    %c0_220 = arith.constant 0 : index
    %344 = vector.load %arg7[%c1_218, %c0_219, %c0_220] : memref<2x1x128xf32, #tpu.memory_space<vmem>>, vector<1x1x128xf32>
    %345 = vector.shape_cast %344 : vector<1x1x128xf32> to vector<1x128xf32>
    %346 = vector.broadcast %345 : vector<1x128xf32> to vector<2x128xf32>
    %347 = arith.addf %343, %346 : vector<2x128xf32>
    %348 = vector.extract_strided_slice %347 {offsets = [0, 0], sizes = [2, 96], strides = [1, 1]} : vector<2x128xf32> to vector<2x96xf32>
    %349 = arith.negf %348 : vector<2x96xf32>
    %350 = math.exp %349 : vector<2x96xf32>
    %cst_221 = arith.constant 1.000000e+00 : f32
    %351 = vector.broadcast %cst_221 : f32 to vector<2x96xf32>
    %352 = arith.addf %351, %350 : vector<2x96xf32>
    %353 = arith.divf %351, %352 : vector<2x96xf32>
    %354 = vector.extract_strided_slice %353 {offsets = [0, 0], sizes = [2, 32], strides = [1, 1]} : vector<2x96xf32> to vector<2x32xf32>
    %355 = vector.extract_strided_slice %353 {offsets = [0, 32], sizes = [2, 32], strides = [1, 1]} : vector<2x96xf32> to vector<2x32xf32>
    %356 = vector.extract_strided_slice %353 {offsets = [0, 64], sizes = [2, 32], strides = [1, 1]} : vector<2x96xf32> to vector<2x32xf32>
    %357 = vector.extract_strided_slice %347 {offsets = [0, 96], sizes = [2, 32], strides = [1, 1]} : vector<2x128xf32> to vector<2x32xf32>
    %358 = math.tanh %357 : vector<2x32xf32>
    %359 = arith.mulf %355, %336 : vector<2x32xf32>
    %360 = arith.mulf %354, %358 : vector<2x32xf32>
    %361 = arith.addf %359, %360 : vector<2x32xf32>
    %362 = math.tanh %361 : vector<2x32xf32>
    %363 = arith.mulf %356, %362 : vector<2x32xf32>
    %c1_222 = arith.constant 1 : index
    %c0_223 = arith.constant 0 : index
    %c0_224 = arith.constant 0 : index
    %364 = vector.load %arg12[%c1_222, %c0_223, %c0_224] : memref<2x2x32xf32, #tpu.memory_space<vmem>>, vector<1x2x32xf32>
    %365 = vector.shape_cast %364 : vector<1x2x32xf32> to vector<2x32xf32>
    %366 = vector.shape_cast %363 : vector<2x32xf32> to vector<1x2x32xf32>
    tpu.vector_store %arg12[%c1_222, %c0_223, %c0_224], %366 {strides = array<i32>} : memref<2x2x32xf32, #tpu.memory_space<vmem>>, vector<1x2x32xf32>,
    %c1_225 = arith.constant 1 : index
    %c0_226 = arith.constant 0 : index
    %c0_227 = arith.constant 0 : index
    %367 = vector.load %arg13[%c1_225, %c0_226, %c0_227] : memref<2x2x32xf32, #tpu.memory_space<vmem>>, vector<1x2x32xf32>
    %368 = vector.shape_cast %367 : vector<1x2x32xf32> to vector<2x32xf32>
    %369 = vector.shape_cast %361 : vector<2x32xf32> to vector<1x2x32xf32>
    tpu.vector_store %arg13[%c1_225, %c0_226, %c0_227], %369 {strides = array<i32>} : memref<2x2x32xf32, #tpu.memory_space<vmem>>, vector<1x2x32xf32>,
    %c8 = arith.constant 8 : index
    %c0_228 = arith.constant 0 : index
    %370 = vector.load %arg11[%c8, %c0_228] : memref<16x32xf32, #tpu.memory_space<vmem>>, vector<2x32xf32>
    tpu.vector_store %arg11[%c8, %c0_228], %363 {strides = array<i32>} : memref<16x32xf32, #tpu.memory_space<vmem>>, vector<2x32xf32>,
    %c0_229 = arith.constant 0 : index
    %c0_230 = arith.constant 0 : index
    %c0_231 = arith.constant 0 : index
    %371 = vector.load %arg12[%c0_229, %c0_230, %c0_231] : memref<2x2x32xf32, #tpu.memory_space<vmem>>, vector<1x2x32xf32>
    %372 = vector.shape_cast %371 : vector<1x2x32xf32> to vector<2x32xf32>
    %c0_232 = arith.constant 0 : index
    %c0_233 = arith.constant 0 : index
    %c0_234 = arith.constant 0 : index
    %373 = vector.load %arg13[%c0_232, %c0_233, %c0_234] : memref<2x2x32xf32, #tpu.memory_space<vmem>>, vector<1x2x32xf32>
    %374 = vector.shape_cast %373 : vector<1x2x32xf32> to vector<2x32xf32>
    %375 = vector.extract_strided_slice %5 {offsets = [10, 0], sizes = [2, 128], strides = [1, 1]} : vector<16x128xf32> to vector<2x128xf32>
    %c0_235 = arith.constant 0 : index
    %c0_236 = arith.constant 0 : index
    %c0_237 = arith.constant 0 : index
    %376 = vector.load %arg6[%c0_235, %c0_236, %c0_237] : memref<2x32x128xf32, #tpu.memory_space<vmem>>, vector<1x32x128xf32>
    %377 = vector.shape_cast %376 : vector<1x32x128xf32> to vector<32x128xf32>
    %cst_238 = arith.constant dense<0.000000e+00> : vector<2x128xf32>
    %378 = tpu.matmul %372, %377, %cst_238 {dimension_numbers = #tpu.dot_dimension_numbers<[1], [0], [0], [1], [0, 0, 1, 1], [], []>} : vector<2x32xf32>, vector<32x128xf32>, vector<2x128xf32> -> vector<2x128xf32>
    %379 = arith.addf %375, %378 : vector<2x128xf32>
    %c0_239 = arith.constant 0 : index
    %c0_240 = arith.constant 0 : index
    %c0_241 = arith.constant 0 : index
    %380 = vector.load %arg7[%c0_239, %c0_240, %c0_241] : memref<2x1x128xf32, #tpu.memory_space<vmem>>, vector<1x1x128xf32>
    %381 = vector.shape_cast %380 : vector<1x1x128xf32> to vector<1x128xf32>
    %382 = vector.broadcast %381 : vector<1x128xf32> to vector<2x128xf32>
    %383 = arith.addf %379, %382 : vector<2x128xf32>
    %384 = vector.extract_strided_slice %383 {offsets = [0, 0], sizes = [2, 96], strides = [1, 1]} : vector<2x128xf32> to vector<2x96xf32>
    %385 = arith.negf %384 : vector<2x96xf32>
    %386 = math.exp %385 : vector<2x96xf32>
    %cst_242 = arith.constant 1.000000e+00 : f32
    %387 = vector.broadcast %cst_242 : f32 to vector<2x96xf32>
    %388 = arith.addf %387, %386 : vector<2x96xf32>
    %389 = arith.divf %387, %388 : vector<2x96xf32>
    %390 = vector.extract_strided_slice %389 {offsets = [0, 0], sizes = [2, 32], strides = [1, 1]} : vector<2x96xf32> to vector<2x32xf32>
    %391 = vector.extract_strided_slice %389 {offsets = [0, 32], sizes = [2, 32], strides = [1, 1]} : vector<2x96xf32> to vector<2x32xf32>
    %392 = vector.extract_strided_slice %389 {offsets = [0, 64], sizes = [2, 32], strides = [1, 1]} : vector<2x96xf32> to vector<2x32xf32>
    %393 = vector.extract_strided_slice %383 {offsets = [0, 96], sizes = [2, 32], strides = [1, 1]} : vector<2x128xf32> to vector<2x32xf32>
    %394 = math.tanh %393 : vector<2x32xf32>
    %395 = arith.mulf %391, %374 : vector<2x32xf32>
    %396 = arith.mulf %390, %394 : vector<2x32xf32>
    %397 = arith.addf %395, %396 : vector<2x32xf32>
    %398 = math.tanh %397 : vector<2x32xf32>
    %399 = arith.mulf %392, %398 : vector<2x32xf32>
    %c0_243 = arith.constant 0 : index
    %c0_244 = arith.constant 0 : index
    %c0_245 = arith.constant 0 : index
    %400 = vector.load %arg12[%c0_243, %c0_244, %c0_245] : memref<2x2x32xf32, #tpu.memory_space<vmem>>, vector<1x2x32xf32>
    %401 = vector.shape_cast %400 : vector<1x2x32xf32> to vector<2x32xf32>
    %402 = vector.shape_cast %399 : vector<2x32xf32> to vector<1x2x32xf32>
    tpu.vector_store %arg12[%c0_243, %c0_244, %c0_245], %402 {strides = array<i32>} : memref<2x2x32xf32, #tpu.memory_space<vmem>>, vector<1x2x32xf32>,
    %c0_246 = arith.constant 0 : index
    %c0_247 = arith.constant 0 : index
    %c0_248 = arith.constant 0 : index
    %403 = vector.load %arg13[%c0_246, %c0_247, %c0_248] : memref<2x2x32xf32, #tpu.memory_space<vmem>>, vector<1x2x32xf32>
    %404 = vector.shape_cast %403 : vector<1x2x32xf32> to vector<2x32xf32>
    %405 = vector.shape_cast %397 : vector<2x32xf32> to vector<1x2x32xf32>
    tpu.vector_store %arg13[%c0_246, %c0_247, %c0_248], %405 {strides = array<i32>} : memref<2x2x32xf32, #tpu.memory_space<vmem>>, vector<1x2x32xf32>,
    %c1_249 = arith.constant 1 : index
    %c0_250 = arith.constant 0 : index
    %c0_251 = arith.constant 0 : index
    %406 = vector.load %arg12[%c1_249, %c0_250, %c0_251] : memref<2x2x32xf32, #tpu.memory_space<vmem>>, vector<1x2x32xf32>
    %407 = vector.shape_cast %406 : vector<1x2x32xf32> to vector<2x32xf32>
    %c1_252 = arith.constant 1 : index
    %c0_253 = arith.constant 0 : index
    %c0_254 = arith.constant 0 : index
    %408 = vector.load %arg13[%c1_252, %c0_253, %c0_254] : memref<2x2x32xf32, #tpu.memory_space<vmem>>, vector<1x2x32xf32>
    %409 = vector.shape_cast %408 : vector<1x2x32xf32> to vector<2x32xf32>
    %c0_255 = arith.constant 0 : index
    %c0_256 = arith.constant 0 : index
    %c0_257 = arith.constant 0 : index
    %410 = vector.load %arg5[%c0_255, %c0_256, %c0_257] : memref<1x32x128xf32, #tpu.memory_space<vmem>>, vector<1x32x128xf32>
    %411 = vector.shape_cast %410 : vector<1x32x128xf32> to vector<32x128xf32>
    %cst_258 = arith.constant dense<0.000000e+00> : vector<2x128xf32>
    %412 = tpu.matmul %399, %411, %cst_258 {dimension_numbers = #tpu.dot_dimension_numbers<[1], [0], [0], [1], [0, 0, 1, 1], [], []>} : vector<2x32xf32>, vector<32x128xf32>, vector<2x128xf32> -> vector<2x128xf32>
    %c1_259 = arith.constant 1 : index
    %c0_260 = arith.constant 0 : index
    %c0_261 = arith.constant 0 : index
    %413 = vector.load %arg6[%c1_259, %c0_260, %c0_261] : memref<2x32x128xf32, #tpu.memory_space<vmem>>, vector<1x32x128xf32>
    %414 = vector.shape_cast %413 : vector<1x32x128xf32> to vector<32x128xf32>
    %cst_262 = arith.constant dense<0.000000e+00> : vector<2x128xf32>
    %415 = tpu.matmul %407, %414, %cst_262 {dimension_numbers = #tpu.dot_dimension_numbers<[1], [0], [0], [1], [0, 0, 1, 1], [], []>} : vector<2x32xf32>, vector<32x128xf32>, vector<2x128xf32> -> vector<2x128xf32>
    %416 = arith.addf %412, %415 : vector<2x128xf32>
    %c1_263 = arith.constant 1 : index
    %c0_264 = arith.constant 0 : index
    %c0_265 = arith.constant 0 : index
    %417 = vector.load %arg7[%c1_263, %c0_264, %c0_265] : memref<2x1x128xf32, #tpu.memory_space<vmem>>, vector<1x1x128xf32>
    %418 = vector.shape_cast %417 : vector<1x1x128xf32> to vector<1x128xf32>
    %419 = vector.broadcast %418 : vector<1x128xf32> to vector<2x128xf32>
    %420 = arith.addf %416, %419 : vector<2x128xf32>
    %421 = vector.extract_strided_slice %420 {offsets = [0, 0], sizes = [2, 96], strides = [1, 1]} : vector<2x128xf32> to vector<2x96xf32>
    %422 = arith.negf %421 : vector<2x96xf32>
    %423 = math.exp %422 : vector<2x96xf32>
    %cst_266 = arith.constant 1.000000e+00 : f32
    %424 = vector.broadcast %cst_266 : f32 to vector<2x96xf32>
    %425 = arith.addf %424, %423 : vector<2x96xf32>
    %426 = arith.divf %424, %425 : vector<2x96xf32>
    %427 = vector.extract_strided_slice %426 {offsets = [0, 0], sizes = [2, 32], strides = [1, 1]} : vector<2x96xf32> to vector<2x32xf32>
    %428 = vector.extract_strided_slice %426 {offsets = [0, 32], sizes = [2, 32], strides = [1, 1]} : vector<2x96xf32> to vector<2x32xf32>
    %429 = vector.extract_strided_slice %426 {offsets = [0, 64], sizes = [2, 32], strides = [1, 1]} : vector<2x96xf32> to vector<2x32xf32>
    %430 = vector.extract_strided_slice %420 {offsets = [0, 96], sizes = [2, 32], strides = [1, 1]} : vector<2x128xf32> to vector<2x32xf32>
    %431 = math.tanh %430 : vector<2x32xf32>
    %432 = arith.mulf %428, %409 : vector<2x32xf32>
    %433 = arith.mulf %427, %431 : vector<2x32xf32>
    %434 = arith.addf %432, %433 : vector<2x32xf32>
    %435 = math.tanh %434 : vector<2x32xf32>
    %436 = arith.mulf %429, %435 : vector<2x32xf32>
    %c1_267 = arith.constant 1 : index
    %c0_268 = arith.constant 0 : index
    %c0_269 = arith.constant 0 : index
    %437 = vector.load %arg12[%c1_267, %c0_268, %c0_269] : memref<2x2x32xf32, #tpu.memory_space<vmem>>, vector<1x2x32xf32>
    %438 = vector.shape_cast %437 : vector<1x2x32xf32> to vector<2x32xf32>
    %439 = vector.shape_cast %436 : vector<2x32xf32> to vector<1x2x32xf32>
    tpu.vector_store %arg12[%c1_267, %c0_268, %c0_269], %439 {strides = array<i32>} : memref<2x2x32xf32, #tpu.memory_space<vmem>>, vector<1x2x32xf32>,
    %c1_270 = arith.constant 1 : index
    %c0_271 = arith.constant 0 : index
    %c0_272 = arith.constant 0 : index
    %440 = vector.load %arg13[%c1_270, %c0_271, %c0_272] : memref<2x2x32xf32, #tpu.memory_space<vmem>>, vector<1x2x32xf32>
    %441 = vector.shape_cast %440 : vector<1x2x32xf32> to vector<2x32xf32>
    %442 = vector.shape_cast %434 : vector<2x32xf32> to vector<1x2x32xf32>
    tpu.vector_store %arg13[%c1_270, %c0_271, %c0_272], %442 {strides = array<i32>} : memref<2x2x32xf32, #tpu.memory_space<vmem>>, vector<1x2x32xf32>,
    %c10 = arith.constant 10 : index
    %c0_273 = arith.constant 0 : index
    %443 = vector.load %arg11[%c10, %c0_273] : memref<16x32xf32, #tpu.memory_space<vmem>>, vector<2x32xf32>
    tpu.vector_store %arg11[%c10, %c0_273], %436 {strides = array<i32>} : memref<16x32xf32, #tpu.memory_space<vmem>>, vector<2x32xf32>,
    %c0_274 = arith.constant 0 : index
    %c0_275 = arith.constant 0 : index
    %c0_276 = arith.constant 0 : index
    %444 = vector.load %arg12[%c0_274, %c0_275, %c0_276] : memref<2x2x32xf32, #tpu.memory_space<vmem>>, vector<1x2x32xf32>
    %445 = vector.shape_cast %444 : vector<1x2x32xf32> to vector<2x32xf32>
    %c0_277 = arith.constant 0 : index
    %c0_278 = arith.constant 0 : index
    %c0_279 = arith.constant 0 : index
    %446 = vector.load %arg13[%c0_277, %c0_278, %c0_279] : memref<2x2x32xf32, #tpu.memory_space<vmem>>, vector<1x2x32xf32>
    %447 = vector.shape_cast %446 : vector<1x2x32xf32> to vector<2x32xf32>
    %448 = vector.extract_strided_slice %5 {offsets = [12, 0], sizes = [2, 128], strides = [1, 1]} : vector<16x128xf32> to vector<2x128xf32>
    %c0_280 = arith.constant 0 : index
    %c0_281 = arith.constant 0 : index
    %c0_282 = arith.constant 0 : index
    %449 = vector.load %arg6[%c0_280, %c0_281, %c0_282] : memref<2x32x128xf32, #tpu.memory_space<vmem>>, vector<1x32x128xf32>
    %450 = vector.shape_cast %449 : vector<1x32x128xf32> to vector<32x128xf32>
    %cst_283 = arith.constant dense<0.000000e+00> : vector<2x128xf32>
    %451 = tpu.matmul %445, %450, %cst_283 {dimension_numbers = #tpu.dot_dimension_numbers<[1], [0], [0], [1], [0, 0, 1, 1], [], []>} : vector<2x32xf32>, vector<32x128xf32>, vector<2x128xf32> -> vector<2x128xf32>
    %452 = arith.addf %448, %451 : vector<2x128xf32>
    %c0_284 = arith.constant 0 : index
    %c0_285 = arith.constant 0 : index
    %c0_286 = arith.constant 0 : index
    %453 = vector.load %arg7[%c0_284, %c0_285, %c0_286] : memref<2x1x128xf32, #tpu.memory_space<vmem>>, vector<1x1x128xf32>
    %454 = vector.shape_cast %453 : vector<1x1x128xf32> to vector<1x128xf32>
    %455 = vector.broadcast %454 : vector<1x128xf32> to vector<2x128xf32>
    %456 = arith.addf %452, %455 : vector<2x128xf32>
    %457 = vector.extract_strided_slice %456 {offsets = [0, 0], sizes = [2, 96], strides = [1, 1]} : vector<2x128xf32> to vector<2x96xf32>
    %458 = arith.negf %457 : vector<2x96xf32>
    %459 = math.exp %458 : vector<2x96xf32>
    %cst_287 = arith.constant 1.000000e+00 : f32
    %460 = vector.broadcast %cst_287 : f32 to vector<2x96xf32>
    %461 = arith.addf %460, %459 : vector<2x96xf32>
    %462 = arith.divf %460, %461 : vector<2x96xf32>
    %463 = vector.extract_strided_slice %462 {offsets = [0, 0], sizes = [2, 32], strides = [1, 1]} : vector<2x96xf32> to vector<2x32xf32>
    %464 = vector.extract_strided_slice %462 {offsets = [0, 32], sizes = [2, 32], strides = [1, 1]} : vector<2x96xf32> to vector<2x32xf32>
    %465 = vector.extract_strided_slice %462 {offsets = [0, 64], sizes = [2, 32], strides = [1, 1]} : vector<2x96xf32> to vector<2x32xf32>
    %466 = vector.extract_strided_slice %456 {offsets = [0, 96], sizes = [2, 32], strides = [1, 1]} : vector<2x128xf32> to vector<2x32xf32>
    %467 = math.tanh %466 : vector<2x32xf32>
    %468 = arith.mulf %464, %447 : vector<2x32xf32>
    %469 = arith.mulf %463, %467 : vector<2x32xf32>
    %470 = arith.addf %468, %469 : vector<2x32xf32>
    %471 = math.tanh %470 : vector<2x32xf32>
    %472 = arith.mulf %465, %471 : vector<2x32xf32>
    %c0_288 = arith.constant 0 : index
    %c0_289 = arith.constant 0 : index
    %c0_290 = arith.constant 0 : index
    %473 = vector.load %arg12[%c0_288, %c0_289, %c0_290] : memref<2x2x32xf32, #tpu.memory_space<vmem>>, vector<1x2x32xf32>
    %474 = vector.shape_cast %473 : vector<1x2x32xf32> to vector<2x32xf32>
    %475 = vector.shape_cast %472 : vector<2x32xf32> to vector<1x2x32xf32>
    tpu.vector_store %arg12[%c0_288, %c0_289, %c0_290], %475 {strides = array<i32>} : memref<2x2x32xf32, #tpu.memory_space<vmem>>, vector<1x2x32xf32>,
    %c0_291 = arith.constant 0 : index
    %c0_292 = arith.constant 0 : index
    %c0_293 = arith.constant 0 : index
    %476 = vector.load %arg13[%c0_291, %c0_292, %c0_293] : memref<2x2x32xf32, #tpu.memory_space<vmem>>, vector<1x2x32xf32>
    %477 = vector.shape_cast %476 : vector<1x2x32xf32> to vector<2x32xf32>
    %478 = vector.shape_cast %470 : vector<2x32xf32> to vector<1x2x32xf32>
    tpu.vector_store %arg13[%c0_291, %c0_292, %c0_293], %478 {strides = array<i32>} : memref<2x2x32xf32, #tpu.memory_space<vmem>>, vector<1x2x32xf32>,
    %c1_294 = arith.constant 1 : index
    %c0_295 = arith.constant 0 : index
    %c0_296 = arith.constant 0 : index
    %479 = vector.load %arg12[%c1_294, %c0_295, %c0_296] : memref<2x2x32xf32, #tpu.memory_space<vmem>>, vector<1x2x32xf32>
    %480 = vector.shape_cast %479 : vector<1x2x32xf32> to vector<2x32xf32>
    %c1_297 = arith.constant 1 : index
    %c0_298 = arith.constant 0 : index
    %c0_299 = arith.constant 0 : index
    %481 = vector.load %arg13[%c1_297, %c0_298, %c0_299] : memref<2x2x32xf32, #tpu.memory_space<vmem>>, vector<1x2x32xf32>
    %482 = vector.shape_cast %481 : vector<1x2x32xf32> to vector<2x32xf32>
    %c0_300 = arith.constant 0 : index
    %c0_301 = arith.constant 0 : index
    %c0_302 = arith.constant 0 : index
    %483 = vector.load %arg5[%c0_300, %c0_301, %c0_302] : memref<1x32x128xf32, #tpu.memory_space<vmem>>, vector<1x32x128xf32>
    %484 = vector.shape_cast %483 : vector<1x32x128xf32> to vector<32x128xf32>
    %cst_303 = arith.constant dense<0.000000e+00> : vector<2x128xf32>
    %485 = tpu.matmul %472, %484, %cst_303 {dimension_numbers = #tpu.dot_dimension_numbers<[1], [0], [0], [1], [0, 0, 1, 1], [], []>} : vector<2x32xf32>, vector<32x128xf32>, vector<2x128xf32> -> vector<2x128xf32>
    %c1_304 = arith.constant 1 : index
    %c0_305 = arith.constant 0 : index
    %c0_306 = arith.constant 0 : index
    %486 = vector.load %arg6[%c1_304, %c0_305, %c0_306] : memref<2x32x128xf32, #tpu.memory_space<vmem>>, vector<1x32x128xf32>
    %487 = vector.shape_cast %486 : vector<1x32x128xf32> to vector<32x128xf32>
    %cst_307 = arith.constant dense<0.000000e+00> : vector<2x128xf32>
    %488 = tpu.matmul %480, %487, %cst_307 {dimension_numbers = #tpu.dot_dimension_numbers<[1], [0], [0], [1], [0, 0, 1, 1], [], []>} : vector<2x32xf32>, vector<32x128xf32>, vector<2x128xf32> -> vector<2x128xf32>
    %489 = arith.addf %485, %488 : vector<2x128xf32>
    %c1_308 = arith.constant 1 : index
    %c0_309 = arith.constant 0 : index
    %c0_310 = arith.constant 0 : index
    %490 = vector.load %arg7[%c1_308, %c0_309, %c0_310] : memref<2x1x128xf32, #tpu.memory_space<vmem>>, vector<1x1x128xf32>
    %491 = vector.shape_cast %490 : vector<1x1x128xf32> to vector<1x128xf32>
    %492 = vector.broadcast %491 : vector<1x128xf32> to vector<2x128xf32>
    %493 = arith.addf %489, %492 : vector<2x128xf32>
    %494 = vector.extract_strided_slice %493 {offsets = [0, 0], sizes = [2, 96], strides = [1, 1]} : vector<2x128xf32> to vector<2x96xf32>
    %495 = arith.negf %494 : vector<2x96xf32>
    %496 = math.exp %495 : vector<2x96xf32>
    %cst_311 = arith.constant 1.000000e+00 : f32
    %497 = vector.broadcast %cst_311 : f32 to vector<2x96xf32>
    %498 = arith.addf %497, %496 : vector<2x96xf32>
    %499 = arith.divf %497, %498 : vector<2x96xf32>
    %500 = vector.extract_strided_slice %499 {offsets = [0, 0], sizes = [2, 32], strides = [1, 1]} : vector<2x96xf32> to vector<2x32xf32>
    %501 = vector.extract_strided_slice %499 {offsets = [0, 32], sizes = [2, 32], strides = [1, 1]} : vector<2x96xf32> to vector<2x32xf32>
    %502 = vector.extract_strided_slice %499 {offsets = [0, 64], sizes = [2, 32], strides = [1, 1]} : vector<2x96xf32> to vector<2x32xf32>
    %503 = vector.extract_strided_slice %493 {offsets = [0, 96], sizes = [2, 32], strides = [1, 1]} : vector<2x128xf32> to vector<2x32xf32>
    %504 = math.tanh %503 : vector<2x32xf32>
    %505 = arith.mulf %501, %482 : vector<2x32xf32>
    %506 = arith.mulf %500, %504 : vector<2x32xf32>
    %507 = arith.addf %505, %506 : vector<2x32xf32>
    %508 = math.tanh %507 : vector<2x32xf32>
    %509 = arith.mulf %502, %508 : vector<2x32xf32>
    %c1_312 = arith.constant 1 : index
    %c0_313 = arith.constant 0 : index
    %c0_314 = arith.constant 0 : index
    %510 = vector.load %arg12[%c1_312, %c0_313, %c0_314] : memref<2x2x32xf32, #tpu.memory_space<vmem>>, vector<1x2x32xf32>
    %511 = vector.shape_cast %510 : vector<1x2x32xf32> to vector<2x32xf32>
    %512 = vector.shape_cast %509 : vector<2x32xf32> to vector<1x2x32xf32>
    tpu.vector_store %arg12[%c1_312, %c0_313, %c0_314], %512 {strides = array<i32>} : memref<2x2x32xf32, #tpu.memory_space<vmem>>, vector<1x2x32xf32>,
    %c1_315 = arith.constant 1 : index
    %c0_316 = arith.constant 0 : index
    %c0_317 = arith.constant 0 : index
    %513 = vector.load %arg13[%c1_315, %c0_316, %c0_317] : memref<2x2x32xf32, #tpu.memory_space<vmem>>, vector<1x2x32xf32>
    %514 = vector.shape_cast %513 : vector<1x2x32xf32> to vector<2x32xf32>
    %515 = vector.shape_cast %507 : vector<2x32xf32> to vector<1x2x32xf32>
    tpu.vector_store %arg13[%c1_315, %c0_316, %c0_317], %515 {strides = array<i32>} : memref<2x2x32xf32, #tpu.memory_space<vmem>>, vector<1x2x32xf32>,
    %c12 = arith.constant 12 : index
    %c0_318 = arith.constant 0 : index
    %516 = vector.load %arg11[%c12, %c0_318] : memref<16x32xf32, #tpu.memory_space<vmem>>, vector<2x32xf32>
    tpu.vector_store %arg11[%c12, %c0_318], %509 {strides = array<i32>} : memref<16x32xf32, #tpu.memory_space<vmem>>, vector<2x32xf32>,
    %c0_319 = arith.constant 0 : index
    %c0_320 = arith.constant 0 : index
    %c0_321 = arith.constant 0 : index
    %517 = vector.load %arg12[%c0_319, %c0_320, %c0_321] : memref<2x2x32xf32, #tpu.memory_space<vmem>>, vector<1x2x32xf32>
    %518 = vector.shape_cast %517 : vector<1x2x32xf32> to vector<2x32xf32>
    %c0_322 = arith.constant 0 : index
    %c0_323 = arith.constant 0 : index
    %c0_324 = arith.constant 0 : index
    %519 = vector.load %arg13[%c0_322, %c0_323, %c0_324] : memref<2x2x32xf32, #tpu.memory_space<vmem>>, vector<1x2x32xf32>
    %520 = vector.shape_cast %519 : vector<1x2x32xf32> to vector<2x32xf32>
    %521 = vector.extract_strided_slice %5 {offsets = [14, 0], sizes = [2, 128], strides = [1, 1]} : vector<16x128xf32> to vector<2x128xf32>
    %c0_325 = arith.constant 0 : index
    %c0_326 = arith.constant 0 : index
    %c0_327 = arith.constant 0 : index
    %522 = vector.load %arg6[%c0_325, %c0_326, %c0_327] : memref<2x32x128xf32, #tpu.memory_space<vmem>>, vector<1x32x128xf32>
    %523 = vector.shape_cast %522 : vector<1x32x128xf32> to vector<32x128xf32>
    %cst_328 = arith.constant dense<0.000000e+00> : vector<2x128xf32>
    %524 = tpu.matmul %518, %523, %cst_328 {dimension_numbers = #tpu.dot_dimension_numbers<[1], [0], [0], [1], [0, 0, 1, 1], [], []>} : vector<2x32xf32>, vector<32x128xf32>, vector<2x128xf32> -> vector<2x128xf32>
    %525 = arith.addf %521, %524 : vector<2x128xf32>
    %c0_329 = arith.constant 0 : index
    %c0_330 = arith.constant 0 : index
    %c0_331 = arith.constant 0 : index
    %526 = vector.load %arg7[%c0_329, %c0_330, %c0_331] : memref<2x1x128xf32, #tpu.memory_space<vmem>>, vector<1x1x128xf32>
    %527 = vector.shape_cast %526 : vector<1x1x128xf32> to vector<1x128xf32>
    %528 = vector.broadcast %527 : vector<1x128xf32> to vector<2x128xf32>
    %529 = arith.addf %525, %528 : vector<2x128xf32>
    %530 = vector.extract_strided_slice %529 {offsets = [0, 0], sizes = [2, 96], strides = [1, 1]} : vector<2x128xf32> to vector<2x96xf32>
    %531 = arith.negf %530 : vector<2x96xf32>
    %532 = math.exp %531 : vector<2x96xf32>
    %cst_332 = arith.constant 1.000000e+00 : f32
    %533 = vector.broadcast %cst_332 : f32 to vector<2x96xf32>
    %534 = arith.addf %533, %532 : vector<2x96xf32>
    %535 = arith.divf %533, %534 : vector<2x96xf32>
    %536 = vector.extract_strided_slice %535 {offsets = [0, 0], sizes = [2, 32], strides = [1, 1]} : vector<2x96xf32> to vector<2x32xf32>
    %537 = vector.extract_strided_slice %535 {offsets = [0, 32], sizes = [2, 32], strides = [1, 1]} : vector<2x96xf32> to vector<2x32xf32>
    %538 = vector.extract_strided_slice %535 {offsets = [0, 64], sizes = [2, 32], strides = [1, 1]} : vector<2x96xf32> to vector<2x32xf32>
    %539 = vector.extract_strided_slice %529 {offsets = [0, 96], sizes = [2, 32], strides = [1, 1]} : vector<2x128xf32> to vector<2x32xf32>
    %540 = math.tanh %539 : vector<2x32xf32>
    %541 = arith.mulf %537, %520 : vector<2x32xf32>
    %542 = arith.mulf %536, %540 : vector<2x32xf32>
    %543 = arith.addf %541, %542 : vector<2x32xf32>
    %544 = math.tanh %543 : vector<2x32xf32>
    %545 = arith.mulf %538, %544 : vector<2x32xf32>
    %c0_333 = arith.constant 0 : index
    %c0_334 = arith.constant 0 : index
    %c0_335 = arith.constant 0 : index
    %546 = vector.load %arg12[%c0_333, %c0_334, %c0_335] : memref<2x2x32xf32, #tpu.memory_space<vmem>>, vector<1x2x32xf32>
    %547 = vector.shape_cast %546 : vector<1x2x32xf32> to vector<2x32xf32>
    %548 = vector.shape_cast %545 : vector<2x32xf32> to vector<1x2x32xf32>
    tpu.vector_store %arg12[%c0_333, %c0_334, %c0_335], %548 {strides = array<i32>} : memref<2x2x32xf32, #tpu.memory_space<vmem>>, vector<1x2x32xf32>,
    %c0_336 = arith.constant 0 : index
    %c0_337 = arith.constant 0 : index
    %c0_338 = arith.constant 0 : index
    %549 = vector.load %arg13[%c0_336, %c0_337, %c0_338] : memref<2x2x32xf32, #tpu.memory_space<vmem>>, vector<1x2x32xf32>
    %550 = vector.shape_cast %549 : vector<1x2x32xf32> to vector<2x32xf32>
    %551 = vector.shape_cast %543 : vector<2x32xf32> to vector<1x2x32xf32>
    tpu.vector_store %arg13[%c0_336, %c0_337, %c0_338], %551 {strides = array<i32>} : memref<2x2x32xf32, #tpu.memory_space<vmem>>, vector<1x2x32xf32>,
    %c1_339 = arith.constant 1 : index
    %c0_340 = arith.constant 0 : index
    %c0_341 = arith.constant 0 : index
    %552 = vector.load %arg12[%c1_339, %c0_340, %c0_341] : memref<2x2x32xf32, #tpu.memory_space<vmem>>, vector<1x2x32xf32>
    %553 = vector.shape_cast %552 : vector<1x2x32xf32> to vector<2x32xf32>
    %c1_342 = arith.constant 1 : index
    %c0_343 = arith.constant 0 : index
    %c0_344 = arith.constant 0 : index
    %554 = vector.load %arg13[%c1_342, %c0_343, %c0_344] : memref<2x2x32xf32, #tpu.memory_space<vmem>>, vector<1x2x32xf32>
    %555 = vector.shape_cast %554 : vector<1x2x32xf32> to vector<2x32xf32>
    %c0_345 = arith.constant 0 : index
    %c0_346 = arith.constant 0 : index
    %c0_347 = arith.constant 0 : index
    %556 = vector.load %arg5[%c0_345, %c0_346, %c0_347] : memref<1x32x128xf32, #tpu.memory_space<vmem>>, vector<1x32x128xf32>
    %557 = vector.shape_cast %556 : vector<1x32x128xf32> to vector<32x128xf32>
    %cst_348 = arith.constant dense<0.000000e+00> : vector<2x128xf32>
    %558 = tpu.matmul %545, %557, %cst_348 {dimension_numbers = #tpu.dot_dimension_numbers<[1], [0], [0], [1], [0, 0, 1, 1], [], []>} : vector<2x32xf32>, vector<32x128xf32>, vector<2x128xf32> -> vector<2x128xf32>
    %c1_349 = arith.constant 1 : index
    %c0_350 = arith.constant 0 : index
    %c0_351 = arith.constant 0 : index
    %559 = vector.load %arg6[%c1_349, %c0_350, %c0_351] : memref<2x32x128xf32, #tpu.memory_space<vmem>>, vector<1x32x128xf32>
    %560 = vector.shape_cast %559 : vector<1x32x128xf32> to vector<32x128xf32>
    %cst_352 = arith.constant dense<0.000000e+00> : vector<2x128xf32>
    %561 = tpu.matmul %553, %560, %cst_352 {dimension_numbers = #tpu.dot_dimension_numbers<[1], [0], [0], [1], [0, 0, 1, 1], [], []>} : vector<2x32xf32>, vector<32x128xf32>, vector<2x128xf32> -> vector<2x128xf32>
    %562 = arith.addf %558, %561 : vector<2x128xf32>
    %c1_353 = arith.constant 1 : index
    %c0_354 = arith.constant 0 : index
    %c0_355 = arith.constant 0 : index
    %563 = vector.load %arg7[%c1_353, %c0_354, %c0_355] : memref<2x1x128xf32, #tpu.memory_space<vmem>>, vector<1x1x128xf32>
    %564 = vector.shape_cast %563 : vector<1x1x128xf32> to vector<1x128xf32>
    %565 = vector.broadcast %564 : vector<1x128xf32> to vector<2x128xf32>
    %566 = arith.addf %562, %565 : vector<2x128xf32>
    %567 = vector.extract_strided_slice %566 {offsets = [0, 0], sizes = [2, 96], strides = [1, 1]} : vector<2x128xf32> to vector<2x96xf32>
    %568 = arith.negf %567 : vector<2x96xf32>
    %569 = math.exp %568 : vector<2x96xf32>
    %cst_356 = arith.constant 1.000000e+00 : f32
    %570 = vector.broadcast %cst_356 : f32 to vector<2x96xf32>
    %571 = arith.addf %570, %569 : vector<2x96xf32>
    %572 = arith.divf %570, %571 : vector<2x96xf32>
    %573 = vector.extract_strided_slice %572 {offsets = [0, 0], sizes = [2, 32], strides = [1, 1]} : vector<2x96xf32> to vector<2x32xf32>
    %574 = vector.extract_strided_slice %572 {offsets = [0, 32], sizes = [2, 32], strides = [1, 1]} : vector<2x96xf32> to vector<2x32xf32>
    %575 = vector.extract_strided_slice %572 {offsets = [0, 64], sizes = [2, 32], strides = [1, 1]} : vector<2x96xf32> to vector<2x32xf32>
    %576 = vector.extract_strided_slice %566 {offsets = [0, 96], sizes = [2, 32], strides = [1, 1]} : vector<2x128xf32> to vector<2x32xf32>
    %577 = math.tanh %576 : vector<2x32xf32>
    %578 = arith.mulf %574, %555 : vector<2x32xf32>
    %579 = arith.mulf %573, %577 : vector<2x32xf32>
    %580 = arith.addf %578, %579 : vector<2x32xf32>
    %581 = math.tanh %580 : vector<2x32xf32>
    %582 = arith.mulf %575, %581 : vector<2x32xf32>
    %c1_357 = arith.constant 1 : index
    %c0_358 = arith.constant 0 : index
    %c0_359 = arith.constant 0 : index
    %583 = vector.load %arg12[%c1_357, %c0_358, %c0_359] : memref<2x2x32xf32, #tpu.memory_space<vmem>>, vector<1x2x32xf32>
    %584 = vector.shape_cast %583 : vector<1x2x32xf32> to vector<2x32xf32>
    %585 = vector.shape_cast %582 : vector<2x32xf32> to vector<1x2x32xf32>
    tpu.vector_store %arg12[%c1_357, %c0_358, %c0_359], %585 {strides = array<i32>} : memref<2x2x32xf32, #tpu.memory_space<vmem>>, vector<1x2x32xf32>,
    %c1_360 = arith.constant 1 : index
    %c0_361 = arith.constant 0 : index
    %c0_362 = arith.constant 0 : index
    %586 = vector.load %arg13[%c1_360, %c0_361, %c0_362] : memref<2x2x32xf32, #tpu.memory_space<vmem>>, vector<1x2x32xf32>
    %587 = vector.shape_cast %586 : vector<1x2x32xf32> to vector<2x32xf32>
    %588 = vector.shape_cast %580 : vector<2x32xf32> to vector<1x2x32xf32>
    tpu.vector_store %arg13[%c1_360, %c0_361, %c0_362], %588 {strides = array<i32>} : memref<2x2x32xf32, #tpu.memory_space<vmem>>, vector<1x2x32xf32>,
    %c14 = arith.constant 14 : index
    %c0_363 = arith.constant 0 : index
    %589 = vector.load %arg11[%c14, %c0_363] : memref<16x32xf32, #tpu.memory_space<vmem>>, vector<2x32xf32>
    tpu.vector_store %arg11[%c14, %c0_363], %582 {strides = array<i32>} : memref<16x32xf32, #tpu.memory_space<vmem>>, vector<2x32xf32>,
    %c0_364 = arith.constant 0 : index
    %c0_365 = arith.constant 0 : index
    %590 = vector.load %arg11[%c0_364, %c0_365] : memref<16x32xf32, #tpu.memory_space<vmem>>, vector<16x32xf32>
    %c0_366 = arith.constant 0 : index
    %c0_367 = arith.constant 0 : index
    %591 = vector.load %arg8[%c0_366, %c0_367] : memref<32x4xf32, #tpu.memory_space<vmem>>, vector<32x4xf32>
    %cst_368 = arith.constant dense<0.000000e+00> : vector<16x4xf32>
    %592 = tpu.matmul %590, %591, %cst_368 {dimension_numbers = #tpu.dot_dimension_numbers<[1], [0], [0], [1], [0, 0, 1, 1], [], []>} : vector<16x32xf32>, vector<32x4xf32>, vector<16x4xf32> -> vector<16x4xf32>
    %c0_369 = arith.constant 0 : index
    %c0_370 = arith.constant 0 : index
    %593 = vector.load %arg9[%c0_369, %c0_370] : memref<1x4xf32, #tpu.memory_space<vmem>>, vector<1x4xf32>
    %594 = vector.broadcast %593 : vector<1x4xf32> to vector<16x4xf32>
    %595 = arith.addf %592, %594 : vector<16x4xf32>
    %c0_371 = arith.constant 0 : index
    %c0_372 = arith.constant 0 : index
    %596 = vector.load %arg10[%c0_371, %c0_372] : memref<16x4xf32, #tpu.memory_space<vmem>>, vector<16x4xf32>
    tpu.vector_store %arg10[%c0_371, %c0_372], %595 {strides = array<i32>} : memref<16x4xf32, #tpu.memory_space<vmem>>, vector<16x4xf32>,
    return
  }
  func.func @transform_0(%arg0: i32) -> (i32, i32) {
    %c0_i32 = arith.constant 0 : i32
    %c0_i32_0 = arith.constant 0 : i32
    return %arg0, %c0_i32 : i32, i32
  }
  func.func @transform_1(%arg0: i32) -> (i32, i32, i32) {
    %c0_i32 = arith.constant 0 : i32
    %c0_i32_0 = arith.constant 0 : i32
    %c0_i32_1 = arith.constant 0 : i32
    %c0_i32_2 = arith.constant 0 : i32
    return %c0_i32, %c0_i32_0, %c0_i32_1 : i32, i32, i32
  }
  func.func @transform_2(%arg0: i32) -> (i32, i32, i32) {
    %c0_i32 = arith.constant 0 : i32
    %c0_i32_0 = arith.constant 0 : i32
    %c0_i32_1 = arith.constant 0 : i32
    %c0_i32_2 = arith.constant 0 : i32
    return %c0_i32, %c0_i32_0, %c0_i32_1 : i32, i32, i32
  }
  func.func @transform_3(%arg0: i32) -> (i32, i32) {
    %c0_i32 = arith.constant 0 : i32
    %c0_i32_0 = arith.constant 0 : i32
    %c0_i32_1 = arith.constant 0 : i32
    return %c0_i32, %c0_i32_0 : i32, i32
  }
  func.func @transform_4(%arg0: i32) -> (i32, i32, i32) {
    %c0_i32 = arith.constant 0 : i32
    %c0_i32_0 = arith.constant 0 : i32
    %c0_i32_1 = arith.constant 0 : i32
    %c0_i32_2 = arith.constant 0 : i32
    return %c0_i32, %c0_i32_0, %c0_i32_1 : i32, i32, i32
  }
  func.func @transform_5(%arg0: i32) -> (i32, i32, i32) {
    %c0_i32 = arith.constant 0 : i32
    %c0_i32_0 = arith.constant 0 : i32
    %c0_i32_1 = arith.constant 0 : i32
    %c0_i32_2 = arith.constant 0 : i32
    return %c0_i32, %c0_i32_0, %c0_i32_1 : i32, i32, i32
  }
  func.func @transform_6(%arg0: i32) -> (i32, i32, i32) {
    %c0_i32 = arith.constant 0 : i32
    %c0_i32_0 = arith.constant 0 : i32
    %c0_i32_1 = arith.constant 0 : i32
    %c0_i32_2 = arith.constant 0 : i32
    return %c0_i32, %c0_i32_0, %c0_i32_1 : i32, i32, i32
  }
  func.func @transform_7(%arg0: i32) -> (i32, i32) {
    %c0_i32 = arith.constant 0 : i32
    %c0_i32_0 = arith.constant 0 : i32
    %c0_i32_1 = arith.constant 0 : i32
    return %c0_i32, %c0_i32_0 : i32, i32
  }
  func.func @transform_8(%arg0: i32) -> (i32, i32) {
    %c0_i32 = arith.constant 0 : i32
    %c0_i32_0 = arith.constant 0 : i32
    %c0_i32_1 = arith.constant 0 : i32
    return %c0_i32, %c0_i32_0 : i32, i32
  }
  func.func @transform_9(%arg0: i32) -> (i32, i32) {
    %c0_i32 = arith.constant 0 : i32
    %c0_i32_0 = arith.constant 0 : i32
    return %arg0, %c0_i32 : i32, i32
  }
  func.func @transform_10(%arg0: i32) -> (i32, i32) {
    %c0_i32 = arith.constant 0 : i32
    %c0_i32_0 = arith.constant 0 : i32
    return %arg0, %c0_i32 : i32, i32
  }
  func.func @transform_11(%arg0: i32) -> (i32, i32, i32) {
    %c0_i32 = arith.constant 0 : i32
    %c0_i32_0 = arith.constant 0 : i32
    %c0_i32_1 = arith.constant 0 : i32
    %c0_i32_2 = arith.constant 0 : i32
    return %c0_i32, %c0_i32_0, %c0_i32_1 : i32, i32, i32
  }
  func.func @transform_12(%arg0: i32) -> (i32, i32, i32) {
    %c0_i32 = arith.constant 0 : i32
    %c0_i32_0 = arith.constant 0 : i32
    %c0_i32_1 = arith.constant 0 : i32
    %c0_i32_2 = arith.constant 0 : i32
    return %c0_i32, %c0_i32_0, %c0_i32_1 : i32, i32, i32
  }
}

</mosaic_0001>

<bundles_post_ra>
// kernel: tpu_custom_call.1
= control target key start
LH: loop header
LB: loop body
LE: loop exit
PB: predicated region body
PF: predicated region fallthrough
CT: control target
= control target key end

     0   :  { %s5278_s0 = inlined_call_operand.vmem [shape: f32[32,8], index: 0, kind: input, shape index: {}]   ;;  %s5279_s1 = inlined_call_operand.vmem [shape: f32[2,2,32], index: 1, kind: input, shape index: {}]   ;;  %s5280_s2 = inlined_call_operand.vmem [shape: f32[2,2,32], index: 2, kind: input, shape index: {}]   ;;  %s5281_s3 = inlined_call_operand.vmem [shape: f32[8,128], index: 3, kind: input, shape index: {}]   ;;  %s5282_s4 = inlined_call_operand.hbm [shape: f32[1,32,128], index: 4, kind: input, shape index: {}]   ;;  %s5283_s5 = inlined_call_operand.vmem [shape: f32[2,32,128], index: 5, kind: input, shape index: {}]   ;;  %s5284_s6 = inlined_call_operand.vmem [shape: f32[2,1,128], index: 6, kind: input, shape index: {}]   ;;  %s5285_s7 = inlined_call_operand.vmem [shape: f32[32,4], index: 7, kind: input, shape index: {}]   ;;  %s5286_s8 = inlined_call_operand.vmem [shape: f32[1,4], index: 8, kind: input, shape index: {}]   ;;  %s5287_s9 = inlined_call_operand.vmem [shape: f32[32,4], index: 9, kind: output, shape index: {0}]   ;;  %s5288_s10 = inlined_call_operand.hbm [shape: f32[32,32], index: 10, kind: output, shape index: {1}]   ;;  %s5289_s11 = inlined_call_operand.hbm [shape: f32[2,2,32], index: 11, kind: output, shape index: {2}]   ;;  %s5290_s12 = inlined_call_operand.hbm [shape: f32[2,2,32], index: 12, kind: output, shape index: {3}]  }
   0x1   :  { %5299 = sst [smem:[#allocation15_spill]] %s5278_s0 }
   0x2   :  { %5300 = sst [smem:[#allocation16_spill]] %s5279_s1 }
   0x3   :  { %5301 = sst [smem:[#allocation17_spill]] %s5282_s4 }
   0x4   :  { %18 = vsyncpa [#allocation3], 0 }
   0x5   :  { %19 = vsyncpa [#allocation4], 0 }
   0x6   :  { %21 = vsyncpa [#allocation4 + $0x1], 0 }
   0x7   :  { %22 = vsyncpa [#allocation7], 0  ;;  %s4597_s21 = smov 0   ;;  %s4599_s22 = smov 0  }
   0x8   :  { %s4601_s23 = smov 0   ;;  %s4603_s24 = smov 0  }
   0x9 LB: > { %5302 = sst [smem:[#allocation12_spill]] %s4511_s23  ;;  %s4618_s25 = sadd.s32 4294967295, %s4515_s24   ;;  %s4515_s24 = sphi %s4603_s24, %s5327_s24   ;;  %s4511_s23 = sphi %s4601_s23, %s5329_s23   ;;  %s4507_s22 = sphi %s4599_s22, %s5331_s22   ;;  %s4503_s21 = sphi %s4597_s21, %s5330_s21  }
   0xa   : > { %s3478_s26 = sadd.s32 4294967294, %s4515_s24   ;;  %s4622_s27 = sadd.s32 1, %s4515_s24  }
   0xb   : > { %5303 = sst [smem:[#allocation13_spill]] %s4622_s27  ;;  %s255_s28 = sadd.s32 1, %s4511_s23 }
   0xc   : > { %s252_s29 = ssub.s32 %s4515_s24, %s4622_s27  ;;  %p265_p0 = scmp.ne.s32.totalorder %s4511_s23, %s4507_s22 }
   0xd   : > { %p253_p1 = scmp.eq.s32.totalorder %s252_s29, 0  ;;  %p5292_p2 = scmp.eq.s32.totalorder %s4618_s25, 1 }
   0xe   : > { %p271_p3 = scmp.ne.s32.totalorder %s4507_s22, %s4503_s21  ;;  %p272_p4 = scmp.eq.s32.totalorder %s3478_s26, 1 }
   0xf   : > { %s4633_s30 = scalar_select %p253_p1, %s4511_s23, %s255_s28  }
  0x10   : > { %p4637_p5 = por %p5292_p2, %p265_p0  ;;  %p4641_p6 = por %p272_p4, %p271_p3 }
  0x11   : > { %5304 = sst [smem:[#allocation14_spill]] %s4633_s30  ;;  %p3479_p7 = scmp.ge.s32.totalorder %s4515_s24, 1 }
  0x12   : > { %s5305_s13 = scalar_select %p4637_p5, 1, 0 }
  0x13   : > { %s5306_s14 = scalar_select %p4641_p6, 1, 0 }
  0x14   : > { %p321_p8 = scmp.lt.s32.totalorder %s4515_s24, 3  ;;  %p5293_p10 = scmp.eq.s32.totalorder %s4618_s25, 0 }
  0x15   : > { %s4517_s16 = smov [#allocation2]   ;;  %s5309_s4 = sld [smem:[#allocation17_spill]] }
  0x16   : > { %p4649_p11 = pnand %p3479_p7, %p321_p8  ;;  %s342_s17 = sshll.u32 %s4517_s16, 4  ;;  %s343_s17 = int_to_ptr.vmem [resolvable:$true] %s342_s17 }
  0x18   : > { %s5307_s15 = scalar_select %p4649_p11, 1, 0 }
  0x19   : > { %p4176_p12 = pneg %p4649_p11 }
  0x1b   : > { %p4657_p13 = pnand %p5293_p10, %p4176_p12  ;;  %s4365_s26 = scalar_lea.hbm %s5309_s4, 512 }
  0x1c   : > { %p4366_p0 = scmp.ne.s32.totalorder %s5309_s4, %s4365_s26  ;;  %p4372_p7 = scmp.lt.u32.totalorder %s4365_s26, %s5309_s4 }
  0x1d   : > { %p4367_p1 = pneg %p4657_p13 }
  0x1f   : > { %p4368_p3 = pnand %p4367_p1, %p4366_p0 }
  0x21   : > { %p4369_p4 = pneg %p4368_p3 }
  0x23   : > { %p4374_p8 = pnand %p4372_p7, %p4369_p4 }
  0x25   : > { %4377 = shalt.err (!%p4374_p8)
}
  0x26   : > { %s4378_s23 = scalar_lea.vmem %s343_s17, 512  ;;  %p4386_p10 = scmp.lt.s32.totalorder %s343_s17, %s343_s17 }
  0x27   : > { %p4379_p12 = scmp.ne.s32.totalorder %s343_s17, %s4378_s23  ;;  %p4387_p6 = scmp.lt.s32.totalorder %s4378_s23, %s4378_s23 }
  0x29   : > { %p4381_p2 = pnand %p4379_p12, %p4367_p1  ;;  %p4388_p5 = por %p4387_p6, %p4386_p10 }
  0x2b   : > { %p4382_p9 = pneg %p4381_p2 }
  0x2d   : > { %p4389_p11 = pnand %p4388_p5, %p4382_p9 }
  0x2f   : > { %4392 = shalt.err (!%p4389_p11)
}
  0x30   : > { %s4518_s19 = smov 128   ;;  %s4519_s20 = smov 8  }
  0x31   : > { %4179 = dma.hbm_to_vmem [thread:$0]  (!%p4657_p13), %s5309_s4, 512, %s343_s17, [#allocation3], %s4518_s19, %s4518_s19, %s4519_s20  }
  0x32   : > { %p5310_p0 = scmp.ne.s32.totalorder %s5307_s15, 0 }
  0x33   : > { %p5311_p3 = scmp.eq.s32.totalorder (!%p5310_p0), %s4618_s25, 0 }
  0x34   : > { %379 = sbr.rel (%p5310_p0) target bundleno = 6718 (0x1a3e), region = 56 }
  0x3b   : > { %4490 = dma.done.wait (%p5311_p3), [#allocation3], 512   ;;  %p5312_p2 = pmov %p5311_p3 }
  0x3c   : > { %s5298_s23 = sand.u32 1, %s4507_s22   ;;  %s3485_s30 = sshll.u32 %s4618_s25, 1 }
  0x3d   : > { %4492 = vsyncadd (%p5312_p2), [#allocation3], 4294966784  ;;  %s3484_s18 = sshll.u32 %s5298_s23, 4  ;;  %p427_p5 = scmp.lt.s32.totalorder %s3485_s30, 3 }
  0x3e   : > { %s5313_s0 = sld [smem:[#allocation15_spill]]  ;;  %s4695_s29 = scalar_lea.vmem [#allocation5], %s3484_s18 }
  0x3f   : > { %s5333_s30 = smov (!%p427_p5, %s3485_s30), 3  ;;  %p5314_p6 = scmp.ne.s32.totalorder %s4618_s25, 0 }
  0x40   : > { %s3486_s26 = sshll.u32 %s5333_s30, 3  ;;  %s5315_s1 = sld [smem:[#allocation16_spill]] (!%p5314_p6)  ;;  %vm445_vm0 = vcmask (!%p5314_p6), 254976   ;;  %v448_v2 = vld [vmem:[%s5280_s2] sm:$0x3] (!%p5314_p6) }
  0x41   : > { %s4693_s28 = scalar_lea.vmem %s5287_s9, %s3486_s26  ;;  %442 = sbr.rel (%p5314_p6) target bundleno = 72 (0x48), region = 64  ;;  %v449_v3 = vld [vmem:[%s5280_s2 + $0x2] sm:$0x3] (!%p5314_p6)  ;;  %450 = vst.msk [vmem:[#allocation8] sm:$0x3] (!%p5314_p6), %vm445_vm0, %v448_v2 }
  0x42   : > { %451 = vst.msk [vmem:[#allocation8 + $0x2] sm:$0x3] (!%p5314_p6), %vm445_vm0, %v449_v3 }
  0x44   : > { %s430_s15 = scalar_lea.vmem %s5313_s0, %s3486_s26 }
  0x46   : > { %v443_v0 = vld [vmem:[%s5315_s1] sm:$0x3] (!%p5314_p6)  ;;  %v444_v1 = vld [vmem:[%s5315_s1 + $0x2] sm:$0x3] (!%p5314_p6) }
  0x47   : > { %446 = vst.msk [vmem:[#allocation6] sm:$0x3] (!%p5314_p6), %vm445_vm0, %v443_v0  ;;  %447 = vst.msk [vmem:[#allocation6 + $0x2] sm:$0x3] (!%p5314_p6), %vm445_vm0, %v444_v1 }
  0x48 PF: > { %v539_v4 = vld [vmem:[%s5283_s5] sm:$0xff]  ;;  %v540_v5 = vld [vmem:[%s5283_s5 + $0x8] sm:$0xff]  ;;  %vm455_vm1 = vcmask 64512   ;;  %v4520_v7 = vmov 0.0|0.0   ;;  %v541_v10 = vld [vmem:[%s5283_s5 + $0x10] sm:$0xff]  ;;  %vm4521_vm2 = vmmov 0  }
  0x49   : > { %v454_v6 = vld [vmem:[%s5281_s3] sm:$0xff]  ;;  %4010 = vmatprep.subr.bf16.mxu1 %v4520_v7  ;;  %v4721_v8 = vpack.c.bf16 %v540_v5, %v539_v4  ;;  %v542_v11 = vld [vmem:[%s5283_s5 + $0x18] sm:$0xff]  ;;  %v453_v12 = vld [vmem:[%s430_s15 + $0x8] sm:$0xff]  ;;  %v4522_v14 = vmov 0.0   ;;  %vm543_vm3 = vcmask 261120   ;;  %s4523_s27 = smov 32  }
  0x4a   : > { %3730 = vmatprep.subr.mxu0 %v454_v6  ;;  %v452_v9 = vld [vmem:[%s430_s15] sm:$0xff]  ;;  %v4730_v13 = vpack.c.bf16 %v542_v11, %v541_v10  ;;  %3743 = vmatprep.mubr.msk.f32.mxu1 %vm4521_vm2, %v4522_v14  ;;  %v3496_v36 = vld [vmem:[%s5283_s5 + $0x28] sm:$0xff]  ;;  %v3497_v40 = vld [vmem:[%s5283_s5 + $0x30] sm:$0xff]  ;;  %s4524_s15 = smov 96   ;;  %vm658_vm4 = vcmask 254976   ;;  %s4525_s4 = smov 64  }
  0x4b   : > { %3731 = vmatpush3.msra.mxu0 %v454_v6  ;;  %3732 = vmatprep.mubr.msk.f32.mxu0 %vm455_vm1, %v452_v9  ;;  %v4750_v19 = vld [vmem:[%s5284_s6] ss:$0 sm:$0xff]  ;;  %v538_v24 = vld [vmem:[#allocation8] sm:$0x3]  ;;  %v670_v39 = vld [vmem:[#allocation2 + $0x8] sm:$0xff]  ;;  %vm995_vm5 = vcmask 257026  }
  0x4c   : > { %4012 = vmatpush3.bf16.msra.mxu1 %v4721_v8  ;;  %3733 = vmatmul.mubr.msk.f32.vlgmr.msra.gmra.mrb[0].mxu0 %vm455_vm1, %v453_v12  ;;  %v3495_v35 = vld [vmem:[%s5283_s5 + $0x20] sm:$0xff]  ;;  %v3498_v41 = vld [vmem:[%s5283_s5 + $0x38] sm:$0xff]  ;;  %v671_v43 = vld [vmem:[#allocation2 + $0x10] sm:$0xff]  ;;  %vm1331_vm6 = vcmask 259076   ;;  %vm1667_vm7 = vcmask 261126   ;;  %p5316_p10 = scmp.eq.s32.totalorder %s4618_s25, 1 }
  0x4d   : > { %4013 = vmatprep.subr.bf16.mxu1 %v4520_v7  ;;  %4016 = vmatprep.subr.bf16.mxu0 %v4520_v7  ;;  %v669_v37 = vld [vmem:[#allocation2] sm:$0xff]  ;;  %v4763_v38 = vpack.c.bf16 %v3496_v36, %v3495_v35  ;;  %v672_v44 = vld [vmem:[#allocation2 + $0x18] sm:$0xff]  ;;  %v4774_v45 = vpack.c.bf16 %v3498_v41, %v3497_v40 }
  0x4e   : > { %3754 = vmatprep.mubr.msk.f32.mxu0 %vm4521_vm2, %v4522_v14  ;;  %v537_v15 = vld [vmem:[#allocation6] sm:$0x3]  ;;  %v4771_v42 = vpack.c.bf16 %v670_v39, %v669_v37  ;;  %v4778_v46 = vpack.c.bf16 %v672_v44, %v671_v43  ;;  %v666_v48 = vld [vmem:[#allocation6 + $0x2] sm:$0x3]  ;;  %v668_v3 = vld [vmem:[#allocation8 + $0x2] sm:$0x3] }
  0x4f   : > { %4018 = vmatpush3.bf16.msra.mxu0 %v4763_v38  ;;  %v4814_v57 = vld [vmem:[%s5284_s6 + $0x1] ss:$0 sm:$0xff] }
  0x50   : > { %4015 = vmatpush3.bf16.msra.mxu1 %v4730_v13  ;;  %4019 = vmatprep.subr.bf16.mxu0 %v4520_v7 }
  0x51   : > { %4022 = vmatprep.subr.bf16.mxu1 %v4520_v7 }
  0x53   : > { %3744 = vmatmul.mubr.msk.f32.vlgmr.msra.gmra.mrb[0].mxu1 %vm543_vm3, %v537_v15  ;;  %4021 = vmatpush3.bf16.msra.mxu0 %v4774_v45 }
  0x54   : > { %3765 = vmatprep.mubr.msk.f32.mxu1 %vm4521_vm2, %v4522_v14  ;;  %4024 = vmatpush3.bf16.msra.mxu1 %v4771_v42 }
  0x55   : > { %4025 = vmatprep.subr.bf16.mxu1 %v4520_v7  ;;  %4028 = vmatprep.subr.bf16.mxu0 %v4520_v7 }
  0x56   : > { %3755 = vmatmul.mubr.msk.f32.vlgmr.msra.gmra.mrb[2].mxu0 %vm543_vm3, %v666_v48 }
  0x57   : > { %4030 = vmatpush3.bf16.msra.mxu0 %v4721_v8  ;;  %3776 = vmatprep.mubr.msk.f32.mxu0 %vm4521_vm2, %v4522_v14 }
  0x58   : > { %4027 = vmatpush3.bf16.msra.mxu1 %v4778_v46  ;;  %4031 = vmatprep.subr.bf16.mxu0 %v4520_v7 }
  0x59   : > { %4034 = vmatprep.subr.bf16.mxu1 %v4520_v7 }
  0x5b   : > { %4033 = vmatpush3.bf16.msra.mxu0 %v4730_v13 }
  0x5c   : > { %4040 = vmatprep.subr.bf16.mxu0 %v4520_v7 }
 0x11f   : > { %v4743_v16 = vpop.f32.mrb[0].mxu0 }
 0x120   : > { %v4745_v17 = vpop.f32.mrb[1].mxu0 }
 0x126   : > { %v613_v18 = vpop.f32.mrb[0].mxu1 }
 0x127   : > { %v617_v20 = vadd.f32 %v613_v18, %v4745_v17  ;;  %v3745_v21 = vpop.f32.mrb[1].mxu1 }
 0x129   : > { %v625_v22 = vadd.f32 %v4750_v19, %v617_v20  ;;  %v747_v54 = vpop.f32.mrb[2].mxu0 }
 0x12a   : > { %v3756_v55 = vpop.f32.mrb[3].mxu0 }
 0x12b   : > { %4237 = vtanh.f32 %v625_v22  ;;  %v3494_v25 = vmul.f32 -1.442695, %v625_v22 }
 0x12d   : > { %4239 = vpow2.f32 %v3494_v25 }
 0x135   : > { %v4238_v23 = vpop.eup %4237 }
 0x136   : > { %639 = vrot.lane.b32.xlu0 %v4238_v23, %s4523_s27 }
 0x137   : > { %v4240_v26 = vpop.eup %4239 }
 0x138   : > { %v629_v27 = vadd.f32 1.0, %v4240_v26 }
 0x13a   : > { %634 = vrot.lane.b32.xlu0 %v538_v24, %s4523_s27  ;;  %4241 = vrcp.f32 %v629_v27 }
 0x144   : > { %v4242_v28 = vpop.eup %4241 }
 0x1a8   : > { %v640_v29 = vpop.permute.xlu0 %639 }
 0x1a9   : > { %v642_v30 = vmul.f32 %v4242_v28, %v640_v29 }
 0x1ab   : > { %644 = vrot.lane.b32.xlu1 %v642_v30, %s4523_s27 }
 0x1ac   : > { %v635_v31 = vpop.permute.xlu0 %634 }
 0x1ad   : > { %v637_v32 = vmul.f32 %v4242_v28, %v635_v31 }
 0x21d   : > { %v645_v33 = vpop.permute.xlu1 %644 }
 0x21e   : > { %v647_v34 = vadd.f32 %v645_v33, %v637_v32 }
 0x220   : > { %4243 = vtanh.f32 %v647_v34 }
 0x22a   : > { %v4244_v47 = vpop.eup %4243 }
 0x22b   : > { %650 = vrot.lane.b32.xlu1 %v4244_v47, %s4523_s27 }
 0x22f   : > { %661 = vrot.lane.b32.xlu1 %v647_v34, %s4524_s15 }
 0x29d   : > { %v651_v49 = vpop.permute.xlu1 %650 }
 0x29e   : > { %v653_v50 = vmul.f32 %v4242_v28, %v651_v49 }
 0x2a0   : > { %655 = vrot.lane.b32.xlu0 %v653_v50, %s4525_s4 }
 0x2a1   : > { %v662_v51 = vpop.permute.xlu1 %661 }
 0x2a2   : > { %664 = vst.msk [vmem:[#allocation8] sm:$0x3] %vm658_vm4, %v662_v51 }
 0x2a9   : > { %v872_v4 = vld [vmem:[#allocation8] sm:$0x3] }
 0x2aa   : > { %v970_v5 = vrot.slane %v872_v4, 6 }
 0x312   : > { %v656_v52 = vpop.permute.xlu0 %655 }
 0x313   : > { %659 = vst.msk [vmem:[#allocation6] sm:$0x3] %vm658_vm4, %v656_v52  ;;  %3766 = vmatmul.mubr.msk.f32.vlgmr.msra.gmra.mrb[2].mxu1 %vm543_vm3, %v656_v52 }
 0x314   : > { %4036 = vmatpush3.bf16.msra.mxu1 %v4763_v38  ;;  %3787 = vmatprep.mubr.msk.f32.mxu1 %vm4521_vm2, %v4522_v14 }
 0x315   : > { %4037 = vmatprep.subr.bf16.mxu1 %v4520_v7 }
 0x318   : > { %4039 = vmatpush3.bf16.msra.mxu1 %v4774_v45 }
 0x319   : > { %4046 = vmatprep.subr.bf16.mxu1 %v4520_v7 }
 0x31a   : > { %v871_v53 = vld [vmem:[#allocation6] sm:$0x3] }
 0x31b   : > { %3777 = vmatmul.mubr.msk.f32.vlgmr.msra.gmra.mrb[4].mxu0 %vm543_vm3, %v871_v53 }
 0x31c   : > { %4042 = vmatpush3.bf16.msra.mxu0 %v4771_v42  ;;  %3798 = vmatprep.mubr.msk.f32.mxu0 %vm4521_vm2, %v4522_v14 }
 0x31d   : > { %4043 = vmatprep.subr.bf16.mxu0 %v4520_v7 }
 0x320   : > { %4045 = vmatpush3.bf16.msra.mxu0 %v4778_v46 }
 0x321   : > { %4052 = vmatprep.subr.bf16.mxu0 %v4520_v7 }
 0x3e6   : > { %v819_v56 = vpop.f32.mrb[2].mxu1 }
 0x3e7   : > { %v820_v58 = vadd.f32 %v819_v56, %v747_v54  ;;  %v3767_v59 = vpop.f32.mrb[3].mxu1 }
 0x3e9   : > { %v831_v60 = vadd.f32 %v4814_v57, %v820_v58 }
 0x3eb   : > { %4245 = vtanh.f32 %v831_v60  ;;  %v3503_v9 = vmul.f32 -1.442695, %v831_v60 }
 0x3ee   : > { %v946_v61 = vpop.f32.mrb[4].mxu0 }
 0x3ef   : > { %v951_v62 = vrot.slane %v946_v61, 6  ;;  %v3778_v63 = vpop.f32.mrb[5].mxu0 }
 0x3f1   : > { %v953_v0 = vadd.f32 %v951_v62, %v4745_v17 }
 0x3f3   : > { %v961_v1 = vadd.f32 %v4750_v19, %v953_v0 }
 0x3f5   : > { %v4246_v2 = vpop.eup %4245  ;;  %4247 = vtanh.f32 %v961_v1  ;;  %v3506_v10 = vmul.f32 -1.442695, %v961_v1 }
 0x3f6   : > { %845 = vrot.lane.b32.xlu0 %v4246_v2, %s4523_s27  ;;  %4249 = vpow2.f32 %v3503_v9 }
 0x3f7   : > { %4251 = vpow2.f32 %v3506_v10 }
 0x3fa   : > { %840 = vrot.lane.b32.xlu0 %v668_v3, %s4523_s27 }
 0x3fe   : > { %971 = vrot.lane.b32.xlu0 %v970_v5, %s4523_s27 }
 0x3ff   : > { %v4248_v6 = vpop.eup %4247 }
 0x400   : > { %976 = vrot.lane.b32.xlu1 %v4248_v6, %s4523_s27  ;;  %v4250_v11 = vpop.eup %4249 }
 0x401   : > { %v835_v12 = vadd.f32 1.0, %v4250_v11  ;;  %v4252_v15 = vpop.eup %4251 }
 0x402   : > { %v965_v18 = vadd.f32 1.0, %v4252_v15 }
 0x403   : > { %4253 = vrcp.f32 %v835_v12 }
 0x404   : > { %4255 = vrcp.f32 %v965_v18 }
 0x40d   : > { %v4254_v20 = vpop.eup %4253 }
 0x40e   : > { %v4256_v23 = vpop.eup %4255 }
 0x468   : > { %v846_v21 = vpop.permute.xlu0 %845 }
 0x469   : > { %v848_v22 = vmul.f32 %v4254_v20, %v846_v21 }
 0x46b   : > { %850 = vrot.lane.b32.xlu1 %v848_v22, %s4523_s27 }
 0x46c   : > { %v841_v26 = vpop.permute.xlu0 %840 }
 0x46d   : > { %v843_v27 = vmul.f32 %v4254_v20, %v841_v26 }
 0x470   : > { %v972_v30 = vpop.permute.xlu0 %971 }
 0x471   : > { %v974_v31 = vmul.f32 %v4256_v23, %v972_v30 }
 0x472   : > { %v977_v24 = vpop.permute.xlu1 %976 }
 0x473   : > { %v979_v25 = vmul.f32 %v4256_v23, %v977_v24 }
 0x475   : > { %981 = vrot.lane.b32.xlu1 %v979_v25, %s4523_s27 }
 0x4dd   : > { %v851_v28 = vpop.permute.xlu1 %850 }
 0x4de   : > { %v853_v29 = vadd.f32 %v851_v28, %v843_v27 }
 0x4e0   : > { %4257 = vtanh.f32 %v853_v29 }
 0x4e7   : > { %v982_v32 = vpop.permute.xlu1 %981 }
 0x4e8   : > { %v984_v33 = vadd.f32 %v982_v32, %v974_v31 }
 0x4ea   : > { %v4258_v34 = vpop.eup %4257  ;;  %4259 = vtanh.f32 %v984_v33 }
 0x4eb   : > { %856 = vrot.lane.b32.xlu0 %v4258_v34, %s4523_s27 }
 0x4f4   : > { %v4260_v35 = vpop.eup %4259 }
 0x4f5   : > { %987 = vrot.lane.b32.xlu1 %v4260_v35, %s4523_s27 }
 0x55d   : > { %v857_v36 = vpop.permute.xlu0 %856 }
 0x55e   : > { %v859_v37 = vmul.f32 %v4254_v20, %v857_v36 }
 0x560   : > { %861 = vrot.lane.b32.xlu0 %v859_v37, %s4525_s4 }
 0x567   : > { %v988_v39 = vpop.permute.xlu1 %987 }
 0x568   : > { %v990_v40 = vmul.f32 %v4256_v23, %v988_v39 }
 0x56a   : > { %v1085_v41 = vrot.slane %v990_v40, 2  ;;  %992 = vrot.lane.b32.xlu1 %v990_v40, %s4525_s4 }
 0x56c   : > { %1086 = vrot.lane.b32.xlu0 %v1085_v41, %s4525_s4 }
 0x56e   : > { %866 = vrot.lane.b32.xlu1 %v853_v29, %s4524_s15 }
 0x570   : > { %998 = vrot.lane.b32.xlu0 %v984_v33, %s4524_s15 }
 0x5d2   : > { %v862_v43 = vpop.permute.xlu0 %861 }
 0x5d3   : > { %864 = vst.msk [vmem:[#allocation6 + $0x2] sm:$0x3] %vm658_vm4, %v862_v43  ;;  %870 = vst.msk [vmem:[%s4695_s29] sm:$0x3] %vm658_vm4, %v862_v43 }
 0x5da   : > { %v1002_v44 = vld [vmem:[#allocation6 + $0x2] sm:$0x3] }
 0x5db   : > { %3788 = vmatmul.mubr.msk.f32.vlgmr.msra.gmra.mrb[4].mxu1 %vm543_vm3, %v1002_v44 }
 0x5dc   : > { %v993_v47 = vpop.permute.xlu1 %992  ;;  %4048 = vmatpush3.bf16.msra.mxu1 %v4721_v8  ;;  %3809 = vmatprep.mubr.msk.f32.mxu1 %vm4521_vm2, %v4522_v14 }
 0x5dd   : > { %996 = vst.msk [vmem:[#allocation6 - $0x2] sm:$0xc] %vm995_vm5, %v993_v47  ;;  %4049 = vmatprep.subr.bf16.mxu1 %v4520_v7 }
 0x5de   : > { %v1087_v48 = vpop.permute.xlu0 %1086 }
 0x5df   : > { %3799 = vmatmul.mubr.msk.f32.vlgmr.msra.gmra.mrb[6].mxu0 %vm543_vm3, %v1087_v48 }
 0x5e0   : > { %v867_v49 = vpop.permute.xlu1 %866  ;;  %4051 = vmatpush3.bf16.msra.mxu1 %v4730_v13  ;;  %4054 = vmatpush3.bf16.msra.mxu0 %v4763_v38 }
 0x5e1   : > { %869 = vst.msk [vmem:[#allocation8 + $0x2] sm:$0x3] %vm658_vm4, %v867_v49  ;;  %4058 = vmatprep.subr.bf16.mxu1 %v4520_v7  ;;  %4055 = vmatprep.subr.bf16.mxu0 %v4520_v7 }
 0x5e2   : > { %v999_v50 = vpop.permute.xlu0 %998  ;;  %3820 = vmatprep.mubr.msk.f32.mxu0 %vm4521_vm2, %v4522_v14 }
 0x5e3   : > { %1001 = vst.msk [vmem:[#allocation8 - $0x2] sm:$0xc] %vm995_vm5, %v999_v50 }
 0x5e4   : > { %v1207_v51 = vld [vmem:[#allocation6] sm:$0x3]  ;;  %4057 = vmatpush3.bf16.msra.mxu0 %v4774_v45 }
 0x5e5   : > { %3810 = vmatmul.mubr.msk.f32.vlgmr.msra.gmra.mrb[6].mxu1 %vm543_vm3, %v1207_v51  ;;  %4064 = vmatprep.subr.bf16.mxu0 %v4520_v7 }
 0x5e6   : > { %4060 = vmatpush3.bf16.msra.mxu1 %v4771_v42  ;;  %3831 = vmatprep.mubr.msk.f32.mxu1 %vm4521_vm2, %v4522_v14 }
 0x5e7   : > { %4061 = vmatprep.subr.bf16.mxu1 %v4520_v7 }
 0x5e8   : > { %v1003_v1 = vld [vmem:[#allocation8 + $0x2] sm:$0x3] }
 0x5ea   : > { %4063 = vmatpush3.bf16.msra.mxu1 %v4778_v46  ;;  %v1208_v2 = vld [vmem:[#allocation8] sm:$0x3] }
 0x5eb   : > { %4070 = vmatprep.subr.bf16.mxu1 %v4520_v7  ;;  %v1306_v3 = vrot.slane %v1208_v2, 4 }
 0x6ae   : > { %v1081_v52 = vpop.f32.mrb[4].mxu1 }
 0x6af   : > { %v3789_v53 = vpop.f32.mrb[5].mxu1 }
 0x6b2   : > { %v1156_v54 = vpop.f32.mrb[6].mxu0 }
 0x6b3   : > { %v1157_v55 = vadd.f32 %v1156_v54, %v1081_v52  ;;  %v3800_v56 = vpop.f32.mrb[7].mxu0 }
 0x6b5   : > { %v1167_v58 = vadd.f32 %v4814_v57, %v1157_v55 }
 0x6b7   : > { %4261 = vtanh.f32 %v1167_v58  ;;  %v3515_v5 = vmul.f32 -1.442695, %v1167_v58 }
 0x6b8   : > { %v1282_v59 = vpop.f32.mrb[6].mxu1 }
 0x6b9   : > { %v1287_v60 = vrot.slane %v1282_v59, 4  ;;  %v3811_v61 = vpop.f32.mrb[7].mxu1 }
 0x6bb   : > { %v1289_v62 = vadd.f32 %v1287_v60, %v4745_v17 }
 0x6bd   : > { %v1297_v63 = vadd.f32 %v4750_v19, %v1289_v62 }
 0x6bf   : > { %4263 = vtanh.f32 %v1297_v63  ;;  %v3518_v6 = vmul.f32 -1.442695, %v1297_v63 }
 0x6c0   : > { %4265 = vpow2.f32 %v3515_v5 }
 0x6c1   : > { %v4262_v0 = vpop.eup %4261  ;;  %4267 = vpow2.f32 %v3518_v6 }
 0x6c2   : > { %1181 = vrot.lane.b32.xlu1 %v4262_v0, %s4523_s27 }
 0x6c6   : > { %1176 = vrot.lane.b32.xlu1 %v1003_v1, %s4523_s27 }
 0x6c9   : > { %v4264_v4 = vpop.eup %4263 }
 0x6ca   : > { %1312 = vrot.lane.b32.xlu0 %v4264_v4, %s4523_s27  ;;  %1307 = vrot.lane.b32.xlu1 %v1306_v3, %s4523_s27  ;;  %v4266_v9 = vpop.eup %4265 }
 0x6cb   : > { %v1171_v10 = vadd.f32 1.0, %v4266_v9  ;;  %v4268_v11 = vpop.eup %4267 }
 0x6cc   : > { %v1301_v12 = vadd.f32 1.0, %v4268_v11 }
 0x6cd   : > { %4269 = vrcp.f32 %v1171_v10 }
 0x6ce   : > { %4271 = vrcp.f32 %v1301_v12 }
 0x6d7   : > { %v4270_v15 = vpop.eup %4269 }
 0x6d8   : > { %v4272_v21 = vpop.eup %4271 }
 0x734   : > { %v1182_v18 = vpop.permute.xlu1 %1181 }
 0x735   : > { %v1184_v20 = vmul.f32 %v4270_v15, %v1182_v18 }
 0x737   : > { %1186 = vrot.lane.b32.xlu0 %v1184_v20, %s4523_s27 }
 0x738   : > { %v1177_v24 = vpop.permute.xlu1 %1176 }
 0x739   : > { %v1179_v25 = vmul.f32 %v4270_v15, %v1177_v24 }
 0x73c   : > { %v1313_v22 = vpop.permute.xlu0 %1312  ;;  %v1308_v28 = vpop.permute.xlu1 %1307 }
 0x73d   : > { %v1315_v23 = vmul.f32 %v4272_v21, %v1313_v22  ;;  %v1310_v29 = vmul.f32 %v4272_v21, %v1308_v28 }
 0x73f   : > { %1317 = vrot.lane.b32.xlu0 %v1315_v23, %s4523_s27 }
 0x7a9   : > { %v1187_v26 = vpop.permute.xlu0 %1186 }
 0x7aa   : > { %v1189_v27 = vadd.f32 %v1187_v26, %v1179_v25 }
 0x7ac   : > { %4273 = vtanh.f32 %v1189_v27 }
 0x7b1   : > { %v1318_v30 = vpop.permute.xlu0 %1317 }
 0x7b2   : > { %v1320_v31 = vadd.f32 %v1318_v30, %v1310_v29 }
 0x7b4   : > { %4275 = vtanh.f32 %v1320_v31 }
 0x7b6   : > { %v4274_v32 = vpop.eup %4273 }
 0x7b7   : > { %1192 = vrot.lane.b32.xlu1 %v4274_v32, %s4523_s27 }
 0x7be   : > { %v4276_v33 = vpop.eup %4275 }
 0x7bf   : > { %1323 = vrot.lane.b32.xlu0 %v4276_v33, %s4523_s27 }
 0x829   : > { %v1193_v34 = vpop.permute.xlu1 %1192 }
 0x82a   : > { %v1195_v35 = vmul.f32 %v4270_v15, %v1193_v34 }
 0x82c   : > { %1197 = vrot.lane.b32.xlu1 %v1195_v35, %s4525_s4 }
 0x831   : > { %v1324_v36 = vpop.permute.xlu0 %1323 }
 0x832   : > { %v1326_v37 = vmul.f32 %v4272_v21, %v1324_v36 }
 0x834   : > { %v1421_v39 = vrot.slane %v1326_v37, 4  ;;  %1328 = vrot.lane.b32.xlu0 %v1326_v37, %s4525_s4 }
 0x836   : > { %1422 = vrot.lane.b32.xlu1 %v1421_v39, %s4525_s4 }
 0x838   : > { %1202 = vrot.lane.b32.xlu0 %v1189_v27, %s4524_s15 }
 0x83a   : > { %1334 = vrot.lane.b32.xlu1 %v1320_v31, %s4524_s15 }
 0x89e   : > { %v1198_v40 = vpop.permute.xlu1 %1197 }
 0x89f   : > { %1200 = vst.msk [vmem:[#allocation6 + $0x2] sm:$0x3] %vm658_vm4, %v1198_v40  ;;  %1206 = vst.msk [vmem:[%s4695_s29 + $0x2] sm:$0x3] %vm658_vm4, %v1198_v40 }
 0x8a6   : > { %v1329_v41 = vpop.permute.xlu0 %1328  ;;  %v1338_v43 = vld [vmem:[#allocation6 + $0x2] sm:$0x3] }
 0x8a7   : > { %1332 = vst.msk [vmem:[#allocation6 - $0x4] sm:$0x30] %vm1331_vm6, %v1329_v41  ;;  %3821 = vmatmul.mubr.msk.f32.vlgmr.msra.gmra.mrb[8].mxu0 %vm543_vm3, %v1338_v43 }
 0x8a8   : > { %4066 = vmatpush3.bf16.msra.mxu0 %v4721_v8  ;;  %v1423_v44 = vpop.permute.xlu1 %1422  ;;  %3842 = vmatprep.mubr.msk.f32.mxu0 %vm4521_vm2, %v4522_v14 }
 0x8a9   : > { %3832 = vmatmul.mubr.msk.f32.vlgmr.msra.gmra.mrb[8].mxu1 %vm543_vm3, %v1423_v44  ;;  %4067 = vmatprep.subr.bf16.mxu0 %v4520_v7 }
 0x8aa   : > { %v1203_v47 = vpop.permute.xlu0 %1202  ;;  %4072 = vmatpush3.bf16.msra.mxu1 %v4763_v38  ;;  %3853 = vmatprep.mubr.msk.f32.mxu1 %vm4521_vm2, %v4522_v14 }
 0x8ab   : > { %1205 = vst.msk [vmem:[#allocation8 + $0x2] sm:$0x3] %vm658_vm4, %v1203_v47  ;;  %4073 = vmatprep.subr.bf16.mxu1 %v4520_v7 }
 0x8ac   : > { %4069 = vmatpush3.bf16.msra.mxu0 %v4730_v13  ;;  %v1335_v48 = vpop.permute.xlu1 %1334 }
 0x8ad   : > { %1337 = vst.msk [vmem:[#allocation8 - $0x4] sm:$0x30] %vm1331_vm6, %v1335_v48  ;;  %4076 = vmatprep.subr.bf16.mxu0 %v4520_v7 }
 0x8ae   : > { %v1543_v49 = vld [vmem:[#allocation6] sm:$0x3]  ;;  %4075 = vmatpush3.bf16.msra.mxu1 %v4774_v45 }
 0x8af   : > { %3843 = vmatmul.mubr.msk.f32.vlgmr.msra.gmra.mrb[10].mxu0 %vm543_vm3, %v1543_v49  ;;  %4082 = vmatprep.subr.bf16.mxu1 %v4520_v7 }
 0x8b0   : > { %4078 = vmatpush3.bf16.msra.mxu0 %v4771_v42  ;;  %3864 = vmatprep.mubr.msk.f32.mxu0 %vm4521_vm2, %v4522_v14 }
 0x8b1   : > { %4079 = vmatprep.subr.bf16.mxu0 %v4520_v7 }
 0x8b2   : > { %v1339_v63 = vld [vmem:[#allocation8 + $0x2] sm:$0x3] }
 0x8b4   : > { %4081 = vmatpush3.bf16.msra.mxu0 %v4778_v46  ;;  %v1544_v0 = vld [vmem:[#allocation8] sm:$0x3] }
 0x8b5   : > { %4088 = vmatprep.subr.bf16.mxu0 %v4520_v7  ;;  %v1642_v1 = vrot.slane %v1544_v0, 2 }
 0x97a   : > { %v1417_v50 = vpop.f32.mrb[8].mxu0 }
 0x97b   : > { %v3822_v51 = vpop.f32.mrb[9].mxu0 }
 0x97c   : > { %v1492_v52 = vpop.f32.mrb[8].mxu1 }
 0x97d   : > { %v1493_v53 = vadd.f32 %v1492_v52, %v1417_v50  ;;  %v3833_v54 = vpop.f32.mrb[9].mxu1 }
 0x97f   : > { %v1503_v55 = vadd.f32 %v4814_v57, %v1493_v53 }
 0x981   : > { %4277 = vtanh.f32 %v1503_v55  ;;  %v3527_v3 = vmul.f32 -1.442695, %v1503_v55 }
 0x982   : > { %v1618_v56 = vpop.f32.mrb[10].mxu0 }
 0x983   : > { %v1623_v58 = vrot.slane %v1618_v56, 2  ;;  %v3844_v59 = vpop.f32.mrb[11].mxu0 }
 0x985   : > { %v1625_v60 = vadd.f32 %v1623_v58, %v4745_v17 }
 0x987   : > { %v1633_v61 = vadd.f32 %v4750_v19, %v1625_v60 }
 0x989   : > { %4279 = vtanh.f32 %v1633_v61  ;;  %v3530_v4 = vmul.f32 -1.442695, %v1633_v61 }
 0x98a   : > { %4281 = vpow2.f32 %v3527_v3 }
 0x98b   : > { %v4278_v62 = vpop.eup %4277  ;;  %4283 = vpow2.f32 %v3530_v4 }
 0x98c   : > { %1517 = vrot.lane.b32.xlu0 %v4278_v62, %s4523_s27 }
 0x990   : > { %1512 = vrot.lane.b32.xlu0 %v1339_v63, %s4523_s27 }
 0x993   : > { %v4280_v2 = vpop.eup %4279 }
 0x994   : > { %1648 = vrot.lane.b32.xlu1 %v4280_v2, %s4523_s27  ;;  %1643 = vrot.lane.b32.xlu0 %v1642_v1, %s4523_s27  ;;  %v4282_v17 = vpop.eup %4281 }
 0x995   : > { %v1507_v5 = vadd.f32 1.0, %v4282_v17  ;;  %v4284_v6 = vpop.eup %4283 }
 0x996   : > { %v1637_v9 = vadd.f32 1.0, %v4284_v6 }
 0x997   : > { %4285 = vrcp.f32 %v1507_v5 }
 0x998   : > { %4287 = vrcp.f32 %v1637_v9 }
 0x9a1   : > { %v4286_v10 = vpop.eup %4285 }
 0x9a2   : > { %v4288_v15 = vpop.eup %4287 }
 0x9fe   : > { %v1518_v11 = vpop.permute.xlu0 %1517 }
 0x9ff   : > { %v1520_v12 = vmul.f32 %v4286_v10, %v1518_v11 }
 0xa01   : > { %1522 = vrot.lane.b32.xlu1 %v1520_v12, %s4523_s27 }
 0xa02   : > { %v1513_v21 = vpop.permute.xlu0 %1512 }
 0xa03   : > { %v1515_v22 = vmul.f32 %v4286_v10, %v1513_v21 }
 0xa06   : > { %v1649_v18 = vpop.permute.xlu1 %1648  ;;  %v1644_v25 = vpop.permute.xlu0 %1643 }
 0xa07   : > { %v1651_v20 = vmul.f32 %v4288_v15, %v1649_v18  ;;  %v1646_v26 = vmul.f32 %v4288_v15, %v1644_v25 }
 0xa09   : > { %1653 = vrot.lane.b32.xlu1 %v1651_v20, %s4523_s27 }
 0xa73   : > { %v1523_v23 = vpop.permute.xlu1 %1522 }
 0xa74   : > { %v1525_v24 = vadd.f32 %v1523_v23, %v1515_v22 }
 0xa76   : > { %4289 = vtanh.f32 %v1525_v24 }
 0xa7b   : > { %v1654_v27 = vpop.permute.xlu1 %1653 }
 0xa7c   : > { %v1656_v28 = vadd.f32 %v1654_v27, %v1646_v26 }
 0xa7e   : > { %4291 = vtanh.f32 %v1656_v28 }
 0xa80   : > { %v4290_v29 = vpop.eup %4289 }
 0xa81   : > { %1528 = vrot.lane.b32.xlu0 %v4290_v29, %s4523_s27 }
 0xa88   : > { %v4292_v30 = vpop.eup %4291 }
 0xa89   : > { %1659 = vrot.lane.b32.xlu1 %v4292_v30, %s4523_s27 }
 0xaf3   : > { %v1529_v31 = vpop.permute.xlu0 %1528 }
 0xaf4   : > { %v1531_v32 = vmul.f32 %v4286_v10, %v1529_v31 }
 0xaf6   : > { %1533 = vrot.lane.b32.xlu0 %v1531_v32, %s4525_s4 }
 0xafb   : > { %v1660_v33 = vpop.permute.xlu1 %1659 }
 0xafc   : > { %v1662_v34 = vmul.f32 %v4288_v15, %v1660_v33 }
 0xafe   : > { %v1757_v35 = vrot.slane %v1662_v34, 6  ;;  %1664 = vrot.lane.b32.xlu1 %v1662_v34, %s4525_s4 }
 0xb00   : > { %1758 = vrot.lane.b32.xlu0 %v1757_v35, %s4525_s4 }
 0xb02   : > { %1538 = vrot.lane.b32.xlu1 %v1525_v24, %s4524_s15 }
 0xb04   : > { %1670 = vrot.lane.b32.xlu0 %v1656_v28, %s4524_s15 }
 0xb68   : > { %v1534_v36 = vpop.permute.xlu0 %1533 }
 0xb69   : > { %1536 = vst.msk [vmem:[#allocation6 + $0x2] sm:$0x3] %vm658_vm4, %v1534_v36  ;;  %1542 = vst.msk [vmem:[%s4695_s29 + $0x4] sm:$0x3] %vm658_vm4, %v1534_v36 }
 0xb70   : > { %v1665_v37 = vpop.permute.xlu1 %1664  ;;  %v1674_v39 = vld [vmem:[#allocation6 + $0x2] sm:$0x3] }
 0xb71   : > { %1668 = vst.msk [vmem:[#allocation6 - $0x6] sm:$0xc0] %vm1667_vm7, %v1665_v37  ;;  %3854 = vmatmul.mubr.msk.f32.vlgmr.msra.gmra.mrb[10].mxu1 %vm543_vm3, %v1674_v39 }
 0xb72   : > { %4084 = vmatpush3.bf16.msra.mxu1 %v4721_v8  ;;  %v1759_v40 = vpop.permute.xlu0 %1758  ;;  %3875 = vmatprep.mubr.msk.f32.mxu1 %vm4521_vm2, %v4522_v14 }
 0xb73   : > { %3865 = vmatmul.mubr.msk.f32.vlgmr.msra.gmra.mrb[12].mxu0 %vm543_vm3, %v1759_v40  ;;  %4085 = vmatprep.subr.bf16.mxu1 %v4520_v7 }
 0xb74   : > { %v1539_v41 = vpop.permute.xlu1 %1538  ;;  %4090 = vmatpush3.bf16.msra.mxu0 %v4763_v38  ;;  %3886 = vmatprep.mubr.msk.f32.mxu0 %vm4521_vm2, %v4522_v14 }
 0xb75   : > { %1541 = vst.msk [vmem:[#allocation8 + $0x2] sm:$0x3] %vm658_vm4, %v1539_v41  ;;  %4091 = vmatprep.subr.bf16.mxu0 %v4520_v7 }
 0xb76   : > { %4087 = vmatpush3.bf16.msra.mxu1 %v4730_v13  ;;  %v1671_v43 = vpop.permute.xlu0 %1670 }
 0xb77   : > { %1673 = vst.msk [vmem:[#allocation8 - $0x6] sm:$0xc0] %vm1667_vm7, %v1671_v43  ;;  %4094 = vmatprep.subr.bf16.mxu1 %v4520_v7 }
 0xb78   : > { %v1879_v44 = vld [vmem:[#allocation6] sm:$0x3]  ;;  %4093 = vmatpush3.bf16.msra.mxu0 %v4774_v45 }
 0xb79   : > { %3876 = vmatmul.mubr.msk.f32.vlgmr.msra.gmra.mrb[12].mxu1 %vm543_vm3, %v1879_v44  ;;  %4100 = vmatprep.subr.bf16.mxu0 %v4520_v7 }
 0xb7a   : > { %4096 = vmatpush3.bf16.msra.mxu1 %v4771_v42  ;;  %3897 = vmatprep.mubr.msk.f32.mxu1 %vm4521_vm2, %v4522_v14 }
 0xb7b   : > { %4097 = vmatprep.subr.bf16.mxu1 %v4520_v7 }
 0xb7e   : > { %4099 = vmatpush3.bf16.msra.mxu1 %v4778_v46  ;;  %v1675_v46 = vld [vmem:[#allocation8 + $0x2] sm:$0x3]  ;;  %v1880_v56 = vld [vmem:[#allocation8] sm:$0x3] }
 0xb7f   : > { %4106 = vmatprep.subr.bf16.mxu1 %v4520_v7 }
 0xc44   : > { %v1753_v38 = vpop.f32.mrb[10].mxu1 }
 0xc45   : > { %v3855_v47 = vpop.f32.mrb[11].mxu1 }
 0xc46   : > { %v1828_v48 = vpop.f32.mrb[12].mxu0 }
 0xc47   : > { %v1829_v49 = vadd.f32 %v1828_v48, %v1753_v38  ;;  %v3866_v45 = vpop.f32.mrb[13].mxu0 }
 0xc49   : > { %v1839_v50 = vadd.f32 %v4814_v57, %v1829_v49 }
 0xc4b   : > { %4293 = vtanh.f32 %v1839_v50  ;;  %v3539_v58 = vmul.f32 -1.442695, %v1839_v50 }
 0xc4c   : > { %v1954_v51 = vpop.f32.mrb[12].mxu1 }
 0xc4d   : > { %v1958_v42 = vadd.f32 %v4743_v16, %v1954_v51  ;;  %v3877_v52 = vpop.f32.mrb[13].mxu1 }
 0xc4f   : > { %v1966_v53 = vadd.f32 %v4750_v19, %v1958_v42 }
 0xc51   : > { %4295 = vtanh.f32 %v1966_v53  ;;  %v3542_v59 = vmul.f32 -1.442695, %v1966_v53 }
 0xc52   : > { %4297 = vpow2.f32 %v3539_v58 }
 0xc53   : > { %4299 = vpow2.f32 %v3542_v59 }
 0xc55   : > { %v4294_v54 = vpop.eup %4293 }
 0xc56   : > { %1853 = vrot.lane.b32.xlu1 %v4294_v54, %s4523_s27 }
 0xc5a   : > { %1848 = vrot.lane.b32.xlu1 %v1675_v46, %s4523_s27 }
 0xc5b   : > { %v4296_v55 = vpop.eup %4295 }
 0xc5c   : > { %1980 = vrot.lane.b32.xlu0 %v4296_v55, %s4523_s27  ;;  %v4298_v60 = vpop.eup %4297 }
 0xc5d   : > { %v1843_v61 = vadd.f32 1.0, %v4298_v60  ;;  %v4300_v62 = vpop.eup %4299 }
 0xc5e   : > { %1975 = vrot.lane.b32.xlu1 %v1880_v56, %s4523_s27  ;;  %v1970_v63 = vadd.f32 1.0, %v4300_v62 }
 0xc5f   : > { %4301 = vrcp.f32 %v1843_v61 }
 0xc60   : > { %4303 = vrcp.f32 %v1970_v63 }
 0xc69   : > { %v4302_v0 = vpop.eup %4301 }
 0xc6a   : > { %v4304_v3 = vpop.eup %4303 }
 0xcc8   : > { %v1854_v1 = vpop.permute.xlu1 %1853 }
 0xcc9   : > { %v1856_v2 = vmul.f32 %v4302_v0, %v1854_v1 }
 0xccb   : > { %1858 = vrot.lane.b32.xlu0 %v1856_v2, %s4523_s27 }
 0xccc   : > { %v1849_v5 = vpop.permute.xlu1 %1848 }
 0xccd   : > { %v1851_v6 = vmul.f32 %v4302_v0, %v1849_v5  ;;  %v2339_v5 = vld [vmem:[#allocation2] sm:$0xff] }
 0xcce   : > { %v1981_v4 = vpop.permute.xlu0 %1980 }
 0xccf   : > { %v1983_v17 = vmul.f32 %v4304_v3, %v1981_v4  ;;  %v3556_v4 = vld [vmem:[%s5283_s5 + $0x28] sm:$0xff] }
 0xcd0   : > { %v1976_v11 = vpop.permute.xlu1 %1975 }
 0xcd1   : > { %1985 = vrot.lane.b32.xlu0 %v1983_v17, %s4523_s27  ;;  %v1978_v12 = vmul.f32 %v4304_v3, %v1976_v11  ;;  %v3558_v11 = vld [vmem:[%s5283_s5 + $0x38] sm:$0xff] }
 0xd3d   : > { %v1859_v9 = vpop.permute.xlu0 %1858 }
 0xd3e   : > { %v1861_v10 = vadd.f32 %v1859_v9, %v1851_v6  ;;  %v2340_v6 = vld [vmem:[#allocation2 + $0x8] sm:$0xff]  ;;  %v3557_v9 = vld [vmem:[%s5283_s5 + $0x30] sm:$0xff] }
 0xd40   : > { %4305 = vtanh.f32 %v1861_v10 }
 0xd43   : > { %v1986_v15 = vpop.permute.xlu0 %1985 }
 0xd44   : > { %v1988_v18 = vadd.f32 %v1986_v15, %v1978_v12  ;;  %v5007_v12 = vpack.c.bf16 %v3558_v11, %v3557_v9  ;;  %v2341_v15 = vld [vmem:[#allocation2 + $0x10] sm:$0xff] }
 0xd46   : > { %4307 = vtanh.f32 %v1988_v18 }
 0xd4a   : > { %v4306_v20 = vpop.eup %4305 }
 0xd4b   : > { %1864 = vrot.lane.b32.xlu1 %v4306_v20, %s4523_s27 }
 0xd50   : > { %v4308_v21 = vpop.eup %4307 }
 0xd51   : > { %1991 = vrot.lane.b32.xlu0 %v4308_v21, %s4523_s27 }
 0xdbd   : > { %v1865_v22 = vpop.permute.xlu1 %1864 }
 0xdbe   : > { %v1867_v23 = vmul.f32 %v4302_v0, %v1865_v22 }
 0xdc0   : > { %1869 = vrot.lane.b32.xlu1 %v1867_v23, %s4525_s4 }
 0xdc3   : > { %v1992_v24 = vpop.permute.xlu0 %1991 }
 0xdc4   : > { %v1994_v25 = vmul.f32 %v4304_v3, %v1992_v24  ;;  %1874 = vrot.lane.b32.xlu1 %v1861_v10, %s4524_s15  ;;  %v3555_v3 = vld [vmem:[%s5283_s5 + $0x20] sm:$0xff]  ;;  %v5001_v10 = vpack.c.bf16 %v2340_v6, %v2339_v5 }
 0xdc5   : > { %v4996_v17 = vpack.c.bf16 %v3556_v4, %v3555_v3 }
 0xdc6   : > { %1996 = vrot.lane.b32.xlu0 %v1994_v25, %s4525_s4 }
 0xdca   : > { %2001 = vrot.lane.b32.xlu0 %v1988_v18, %s4524_s15  ;;  %v2342_v18 = vld [vmem:[#allocation2 + $0x18] sm:$0xff] }
 0xdcb   : > { %v5013_v20 = vpack.c.bf16 %v2342_v18, %v2341_v15 }
 0xe32   : > { %v1870_v26 = vpop.permute.xlu1 %1869 }
 0xe33   : > { %1872 = vst.msk [vmem:[#allocation6 + $0x2] sm:$0x3] %vm658_vm4, %v1870_v26  ;;  %1878 = vst.msk [vmem:[%s4695_s29 + $0x6] sm:$0x3] %vm658_vm4, %v1870_v26 }
 0xe36   : > { %v1875_v27 = vpop.permute.xlu1 %1874 }
 0xe37   : > { %1877 = vst.msk [vmem:[#allocation8 + $0x2] sm:$0x3] %vm658_vm4, %v1875_v27  ;;  %v2544_v27 = vld [vmem:[%s5283_s5] sm:$0xff] }
 0xe38   : > { %v1997_v28 = vpop.permute.xlu0 %1996 }
 0xe39   : > { %1999 = vst.msk [vmem:[#allocation6] sm:$0x3] %vm658_vm4, %v1997_v28  ;;  %3898 = vmatmul.mubr.msk.f32.vlgmr.msra.gmra.mrb[14].mxu1 %vm543_vm3, %v1997_v28  ;;  %v2545_v28 = vld [vmem:[%s5283_s5 + $0x8] sm:$0xff] }
 0xe3a   : > { %v2005_v29 = vld [vmem:[#allocation6 + $0x2] sm:$0x3]  ;;  %3919 = vmatprep.mubr.msk.f32.mxu1 %vm4521_vm2, %v4522_v14  ;;  %4108 = vmatpush3.bf16.msra.mxu1 %v4996_v17 }
 0xe3b   : > { %3887 = vmatmul.mubr.msk.f32.vlgmr.msra.gmra.mrb[14].mxu0 %vm543_vm3, %v2005_v29  ;;  %4109 = vmatprep.subr.bf16.mxu1 %v4520_v7  ;;  %v5032_v29 = vpack.c.bf16 %v2545_v28, %v2544_v27 }
 0xe3c   : > { %4102 = vmatpush3.bf16.msra.mxu0 %v4721_v8  ;;  %v2002_v30 = vpop.permute.xlu0 %2001  ;;  %3908 = vmatprep.mubr.msk.f32.mxu0 %vm4521_vm2, %v4522_v14 }
 0xe3d   : > { %2004 = vst.msk [vmem:[#allocation8] sm:$0x3] %vm658_vm4, %v2002_v30  ;;  %4103 = vmatprep.subr.bf16.mxu0 %v4520_v7  ;;  %v2546_v30 = vld [vmem:[%s5283_s5 + $0x10] sm:$0xff] }
 0xe3e   : > { %v2006_v44 = vld [vmem:[#allocation8 + $0x2] sm:$0x3]  ;;  %4111 = vmatpush3.bf16.msra.mxu1 %v5007_v12 }
 0xe3f   : > { %4118 = vmatprep.subr.bf16.mxu1 %v4520_v7 }
 0xe40   : > { %4105 = vmatpush3.bf16.msra.mxu0 %v4730_v13  ;;  %v2207_v31 = vld [vmem:[#allocation6] sm:$0x3] }
 0xe41   : > { %4112 = vmatprep.subr.bf16.mxu0 %v4520_v7 }
 0xe43   : > { %3909 = vmatmul.mubr.msk.f32.vlgmr.msra.gmra.mrb[16].mxu0 %vm543_vm3, %v2207_v31  ;;  %v2547_v31 = vld [vmem:[%s5283_s5 + $0x18] sm:$0xff] }
 0xe44   : > { %3930 = vmatprep.mubr.msk.f32.mxu0 %vm4521_vm2, %v4522_v14  ;;  %v2208_v38 = vld [vmem:[#allocation8] sm:$0x3]  ;;  %4114 = vmatpush3.bf16.msra.mxu0 %v5001_v10 }
 0xe45   : > { %v2306_v47 = vrot.slane %v2208_v38, 6  ;;  %4115 = vmatprep.subr.bf16.mxu0 %v4520_v7 }
 0xe48   : > { %4117 = vmatpush3.bf16.msra.mxu0 %v5013_v20 }
 0xe49   : > { %4124 = vmatprep.subr.bf16.mxu0 %v4520_v7 }
 0xf0c   : > { %v2156_v32 = vpop.f32.mrb[14].mxu1 }
 0xf0d   : > { %v3899_v8 = vpop.f32.mrb[15].mxu1 }
 0xf0e   : > { %v2084_v33 = vpop.f32.mrb[14].mxu0 }
 0xf0f   : > { %v2157_v34 = vadd.f32 %v2156_v32, %v2084_v33  ;;  %v3888_v35 = vpop.f32.mrb[15].mxu0  ;;  %v5042_v33 = vpack.c.bf16 %v2547_v31, %v2546_v30 }
 0xf11   : > { %v2167_v36 = vadd.f32 %v4814_v57, %v2157_v34 }
 0xf13   : > { %4309 = vtanh.f32 %v2167_v36  ;;  %v3551_v48 = vmul.f32 -1.442695, %v2167_v36 }
 0xf16   : > { %v2282_v37 = vpop.f32.mrb[16].mxu0 }
 0xf17   : > { %v2287_v39 = vrot.slane %v2282_v37, 6  ;;  %v3910_v40 = vpop.f32.mrb[17].mxu0 }
 0xf19   : > { %v2289_v13 = vadd.f32 %v4743_v16, %v2287_v39 }
 0xf1b   : > { %v2297_v41 = vadd.f32 %v4750_v19, %v2289_v13 }
 0xf1d   : > { %v4310_v43 = vpop.eup %4309  ;;  %4311 = vtanh.f32 %v2297_v41  ;;  %v3554_v49 = vmul.f32 -1.442695, %v2297_v41  ;;  %v5069_v41 = vld [vmem:[%s5284_s6 + $0x1] ss:$0 sm:$0xff] }
 0xf1e   : > { %2181 = vrot.lane.b32.xlu1 %v4310_v43, %s4523_s27  ;;  %4313 = vpow2.f32 %v3551_v48 }
 0xf1f   : > { %4315 = vpow2.f32 %v3554_v49  ;;  %v5075_v49 = vld [vmem:[%s5284_s6] ss:$0 sm:$0xff] }
 0xf22   : > { %2176 = vrot.lane.b32.xlu1 %v2006_v44, %s4523_s27 }
 0xf26   : > { %2307 = vrot.lane.b32.xlu1 %v2306_v47, %s4523_s27 }
 0xf27   : > { %v4312_v57 = vpop.eup %4311 }
 0xf28   : > { %2312 = vrot.lane.b32.xlu0 %v4312_v57, %s4523_s27  ;;  %v4314_v45 = vpop.eup %4313 }
 0xf29   : > { %v2171_v19 = vadd.f32 1.0, %v4314_v45  ;;  %v4316_v50 = vpop.eup %4315 }
 0xf2a   : > { %v2301_v51 = vadd.f32 1.0, %v4316_v50 }
 0xf2b   : > { %4317 = vrcp.f32 %v2171_v19 }
 0xf2c   : > { %4319 = vrcp.f32 %v2301_v51 }
 0xf35   : > { %v4318_v42 = vpop.eup %4317 }
 0xf36   : > { %v4320_v54 = vpop.eup %4319 }
 0xf90   : > { %v2182_v52 = vpop.permute.xlu1 %2181 }
 0xf91   : > { %v2184_v53 = vmul.f32 %v4318_v42, %v2182_v52 }
 0xf93   : > { %2186 = vrot.lane.b32.xlu0 %v2184_v53, %s4523_s27 }
 0xf94   : > { %v2177_v56 = vpop.permute.xlu1 %2176 }
 0xf95   : > { %v2179_v58 = vmul.f32 %v4318_v42, %v2177_v56 }
 0xf98   : > { %v2308_v61 = vpop.permute.xlu1 %2307 }
 0xf99   : > { %v2310_v62 = vmul.f32 %v4320_v54, %v2308_v61 }
 0xf9a   : > { %v2313_v46 = vpop.permute.xlu0 %2312 }
 0xf9b   : > { %v2315_v55 = vmul.f32 %v4320_v54, %v2313_v46 }
 0xf9d   : > { %2317 = vrot.lane.b32.xlu0 %v2315_v55, %s4523_s27 }
0x1005   : > { %v2187_v59 = vpop.permute.xlu0 %2186 }
0x1006   : > { %v2189_v60 = vadd.f32 %v2187_v59, %v2179_v58 }
0x1008   : > { %4321 = vtanh.f32 %v2189_v60 }
0x100f   : > { %v2318_v63 = vpop.permute.xlu0 %2317 }
0x1010   : > { %v2320_v0 = vadd.f32 %v2318_v63, %v2310_v62 }
0x1012   : > { %v4322_v1 = vpop.eup %4321  ;;  %4323 = vtanh.f32 %v2320_v0 }
0x1013   : > { %2192 = vrot.lane.b32.xlu1 %v4322_v1, %s4523_s27 }
0x101c   : > { %v4324_v2 = vpop.eup %4323 }
0x101d   : > { %2323 = vrot.lane.b32.xlu0 %v4324_v2, %s4523_s27 }
0x1085   : > { %v2193_v21 = vpop.permute.xlu1 %2192 }
0x1086   : > { %v2195_v22 = vmul.f32 %v4318_v42, %v2193_v21 }
0x1088   : > { %2197 = vrot.lane.b32.xlu1 %v2195_v22, %s4525_s4 }
0x108f   : > { %v2324_v23 = vpop.permute.xlu0 %2323 }
0x1090   : > { %v2326_v24 = vmul.f32 %v4320_v54, %v2324_v23 }
0x1092   : > { %v2420_v25 = vrot.slane %v2326_v24, 2  ;;  %2328 = vrot.lane.b32.xlu0 %v2326_v24, %s4525_s4 }
0x1094   : > { %2421 = vrot.lane.b32.xlu1 %v2420_v25, %s4525_s4 }
0x1096   : > { %2202 = vrot.lane.b32.xlu0 %v2189_v60, %s4524_s15 }
0x1098   : > { %2333 = vrot.lane.b32.xlu1 %v2320_v0, %s4524_s15 }
0x10fa   : > { %v2198_v26 = vpop.permute.xlu1 %2197 }
0x10fb   : > { %2200 = vst.msk [vmem:[#allocation6 + $0x2] sm:$0x3] %vm658_vm4, %v2198_v26  ;;  %2206 = vst.msk [vmem:[%s4695_s29 + $0x8] sm:$0x3] %vm658_vm4, %v2198_v26 }
0x1102   : > { %v2337_v32 = vld [vmem:[#allocation6 + $0x2] sm:$0x3] }
0x1103   : > { %3920 = vmatmul.mubr.msk.f32.vlgmr.msra.gmra.mrb[16].mxu1 %vm543_vm3, %v2337_v32 }
0x1104   : > { %v2329_v8 = vpop.permute.xlu0 %2328  ;;  %4120 = vmatpush3.bf16.msra.mxu1 %v5032_v29  ;;  %3941 = vmatprep.mubr.msk.f32.mxu1 %vm4521_vm2, %v4522_v14 }
0x1105   : > { %2331 = vst.msk [vmem:[#allocation6 - $0x2] sm:$0xc] %vm995_vm5, %v2329_v8  ;;  %4121 = vmatprep.subr.bf16.mxu1 %v4520_v7 }
0x1106   : > { %v2422_v34 = vpop.permute.xlu1 %2421 }
0x1107   : > { %3931 = vmatmul.mubr.msk.f32.vlgmr.msra.gmra.mrb[18].mxu0 %vm543_vm3, %v2422_v34 }
0x1108   : > { %v2203_v35 = vpop.permute.xlu0 %2202  ;;  %4123 = vmatpush3.bf16.msra.mxu1 %v5042_v33  ;;  %4126 = vmatpush3.bf16.msra.mxu0 %v4996_v17 }
0x1109   : > { %2205 = vst.msk [vmem:[#allocation8 + $0x2] sm:$0x3] %vm658_vm4, %v2203_v35  ;;  %4130 = vmatprep.subr.bf16.mxu1 %v4520_v7  ;;  %4127 = vmatprep.subr.bf16.mxu0 %v4520_v7 }
0x110a   : > { %v2334_v36 = vpop.permute.xlu1 %2333  ;;  %3952 = vmatprep.mubr.msk.f32.mxu0 %vm4521_vm2, %v4522_v14 }
0x110b   : > { %2336 = vst.msk [vmem:[#allocation8 - $0x2] sm:$0xc] %vm995_vm5, %v2334_v36 }
0x110c   : > { %v2542_v37 = vld [vmem:[#allocation6] sm:$0x3]  ;;  %4129 = vmatpush3.bf16.msra.mxu0 %v5007_v12 }
0x110d   : > { %3942 = vmatmul.mubr.msk.f32.vlgmr.msra.gmra.mrb[18].mxu1 %vm543_vm3, %v2542_v37  ;;  %4136 = vmatprep.subr.bf16.mxu0 %v4520_v7 }
0x110e   : > { %4132 = vmatpush3.bf16.msra.mxu1 %v5001_v10  ;;  %3963 = vmatprep.mubr.msk.f32.mxu1 %vm4521_vm2, %v4522_v14 }
0x110f   : > { %4133 = vmatprep.subr.bf16.mxu1 %v4520_v7 }
0x1110   : > { %v2338_v51 = vld [vmem:[#allocation8 + $0x2] sm:$0x3] }
0x1112   : > { %4135 = vmatpush3.bf16.msra.mxu1 %v5013_v20  ;;  %v2543_v42 = vld [vmem:[#allocation8] sm:$0x3] }
0x1113   : > { %4142 = vmatprep.subr.bf16.mxu1 %v4520_v7  ;;  %v2641_v52 = vrot.slane %v2543_v42, 4 }
0x11d6   : > { %v2416_v39 = vpop.f32.mrb[16].mxu1 }
0x11d7   : > { %v3921_v40 = vpop.f32.mrb[17].mxu1 }
0x11da   : > { %v2491_v13 = vpop.f32.mrb[18].mxu0 }
0x11db   : > { %v2492_v43 = vadd.f32 %v2491_v13, %v2416_v39  ;;  %v3932_v44 = vpop.f32.mrb[19].mxu0 }
0x11dd   : > { %v2502_v38 = vadd.f32 %v5069_v41, %v2492_v43 }
0x11df   : > { %4325 = vtanh.f32 %v2502_v38  ;;  %v3563_v54 = vmul.f32 -1.442695, %v2502_v38 }
0x11e0   : > { %v2617_v47 = vpop.f32.mrb[18].mxu1 }
0x11e1   : > { %v2622_v57 = vrot.slane %v2617_v47, 4  ;;  %v3943_v48 = vpop.f32.mrb[19].mxu1 }
0x11e3   : > { %v2624_v45 = vadd.f32 %v4743_v16, %v2622_v57 }
0x11e5   : > { %v2632_v19 = vadd.f32 %v5075_v49, %v2624_v45 }
0x11e7   : > { %4327 = vtanh.f32 %v2632_v19  ;;  %v3566_v46 = vmul.f32 -1.442695, %v2632_v19 }
0x11e8   : > { %4329 = vpow2.f32 %v3563_v54 }
0x11e9   : > { %v4326_v50 = vpop.eup %4325  ;;  %4331 = vpow2.f32 %v3566_v46 }
0x11ea   : > { %2516 = vrot.lane.b32.xlu0 %v4326_v50, %s4523_s27 }
0x11ee   : > { %2511 = vrot.lane.b32.xlu0 %v2338_v51, %s4523_s27 }
0x11f1   : > { %v4328_v53 = vpop.eup %4327 }
0x11f2   : > { %2647 = vrot.lane.b32.xlu1 %v4328_v53, %s4523_s27  ;;  %2642 = vrot.lane.b32.xlu0 %v2641_v52, %s4523_s27  ;;  %v4330_v55 = vpop.eup %4329 }
0x11f3   : > { %v2506_v56 = vadd.f32 1.0, %v4330_v55  ;;  %v4332_v58 = vpop.eup %4331 }
0x11f4   : > { %v2636_v59 = vadd.f32 1.0, %v4332_v58 }
0x11f5   : > { %4333 = vrcp.f32 %v2506_v56 }
0x11f6   : > { %4335 = vrcp.f32 %v2636_v59 }
0x11ff   : > { %v4334_v60 = vpop.eup %4333 }
0x1200   : > { %v4336_v63 = vpop.eup %4335 }
0x125c   : > { %v2517_v61 = vpop.permute.xlu0 %2516 }
0x125d   : > { %v2519_v62 = vmul.f32 %v4334_v60, %v2517_v61 }
0x125f   : > { %2521 = vrot.lane.b32.xlu1 %v2519_v62, %s4523_s27 }
0x1260   : > { %v2512_v2 = vpop.permute.xlu0 %2511 }
0x1261   : > { %v2514_v3 = vmul.f32 %v4334_v60, %v2512_v2 }
0x1264   : > { %v2648_v0 = vpop.permute.xlu1 %2647  ;;  %v2643_v6 = vpop.permute.xlu0 %2642 }
0x1265   : > { %v2650_v1 = vmul.f32 %v4336_v63, %v2648_v0  ;;  %v2645_v9 = vmul.f32 %v4336_v63, %v2643_v6 }
0x1267   : > { %2652 = vrot.lane.b32.xlu1 %v2650_v1, %s4523_s27 }
0x12d1   : > { %v2522_v4 = vpop.permute.xlu1 %2521 }
0x12d2   : > { %v2524_v5 = vadd.f32 %v2522_v4, %v2514_v3 }
0x12d4   : > { %4337 = vtanh.f32 %v2524_v5 }
0x12d9   : > { %v2653_v11 = vpop.permute.xlu1 %2652 }
0x12da   : > { %v2655_v15 = vadd.f32 %v2653_v11, %v2645_v9  ;;  %v3212_v9 = vld [vmem:[%s4695_s29] sm:$0xff] }
0x12dc   : > { %4339 = vtanh.f32 %v2655_v15 }
0x12de   : > { %v4338_v18 = vpop.eup %4337 }
0x12df   : > { %2527 = vrot.lane.b32.xlu0 %v4338_v18, %s4523_s27 }
0x12e6   : > { %v4340_v21 = vpop.eup %4339 }
0x12e7   : > { %2658 = vrot.lane.b32.xlu1 %v4340_v21, %s4523_s27 }
0x1351   : > { %v2528_v22 = vpop.permute.xlu0 %2527 }
0x1352   : > { %v2530_v23 = vmul.f32 %v4334_v60, %v2528_v22 }
0x1354   : > { %2532 = vrot.lane.b32.xlu0 %v2530_v23, %s4525_s4 }
0x1359   : > { %v2659_v24 = vpop.permute.xlu1 %2658 }
0x135a   : > { %v2661_v25 = vmul.f32 %v4336_v63, %v2659_v24 }
0x135c   : > { %v2755_v26 = vrot.slane %v2661_v25, 4  ;;  %2663 = vrot.lane.b32.xlu1 %v2661_v25, %s4525_s4 }
0x135e   : > { %2756 = vrot.lane.b32.xlu0 %v2755_v26, %s4525_s4 }
0x1360   : > { %2537 = vrot.lane.b32.xlu1 %v2524_v5, %s4524_s15 }
0x1362   : > { %2668 = vrot.lane.b32.xlu0 %v2655_v15, %s4524_s15 }
0x13c6   : > { %v2533_v27 = vpop.permute.xlu0 %2532 }
0x13c7   : > { %2535 = vst.msk [vmem:[#allocation6 + $0x2] sm:$0x3] %vm658_vm4, %v2533_v27  ;;  %2541 = vst.msk [vmem:[%s4695_s29 + $0xa] sm:$0x3] %vm658_vm4, %v2533_v27 }
0x13ce   : > { %v2664_v28 = vpop.permute.xlu1 %2663  ;;  %v2672_v30 = vld [vmem:[#allocation6 + $0x2] sm:$0x3] }
0x13cf   : > { %2666 = vst.msk [vmem:[#allocation6 - $0x4] sm:$0x30] %vm1331_vm6, %v2664_v28  ;;  %3953 = vmatmul.mubr.msk.f32.vlgmr.msra.gmra.mrb[20].mxu0 %vm543_vm3, %v2672_v30 }
0x13d0   : > { %4138 = vmatpush3.bf16.msra.mxu0 %v5032_v29  ;;  %v2757_v31 = vpop.permute.xlu0 %2756  ;;  %3974 = vmatprep.mubr.msk.f32.mxu0 %vm4521_vm2, %v4522_v14 }
0x13d1   : > { %3964 = vmatmul.mubr.msk.f32.vlgmr.msra.gmra.mrb[20].mxu1 %vm543_vm3, %v2757_v31  ;;  %4139 = vmatprep.subr.bf16.mxu0 %v4520_v7 }
0x13d2   : > { %v2538_v32 = vpop.permute.xlu1 %2537  ;;  %4144 = vmatpush3.bf16.msra.mxu1 %v4996_v17  ;;  %3985 = vmatprep.mubr.msk.f32.mxu1 %vm4521_vm2, %v4522_v14 }
0x13d3   : > { %2540 = vst.msk [vmem:[#allocation8 + $0x2] sm:$0x3] %vm658_vm4, %v2538_v32  ;;  %4145 = vmatprep.subr.bf16.mxu1 %v4520_v7 }
0x13d4   : > { %4141 = vmatpush3.bf16.msra.mxu0 %v5042_v33  ;;  %v2669_v29 = vpop.permute.xlu0 %2668 }
0x13d5   : > { %2671 = vst.msk [vmem:[#allocation8 - $0x4] sm:$0x30] %vm1331_vm6, %v2669_v29  ;;  %4148 = vmatprep.subr.bf16.mxu0 %v4520_v7 }
0x13d6   : > { %v2877_v8 = vld [vmem:[#allocation6] sm:$0x3]  ;;  %4147 = vmatpush3.bf16.msra.mxu1 %v5007_v12 }
0x13d7   : > { %3975 = vmatmul.mubr.msk.f32.vlgmr.msra.gmra.mrb[22].mxu0 %vm543_vm3, %v2877_v8 }
0x13d8   : > { %4150 = vmatpush3.bf16.msra.mxu0 %v5001_v10  ;;  %3996 = vmatprep.mubr.msk.f32.mxu0 %vm4521_vm2, %v4522_v14 }
0x13d9   : > { %4151 = vmatprep.subr.bf16.mxu0 %v4520_v7 }
0x13da   : > { %v2673_v7 = vld [vmem:[#allocation8 + $0x2] sm:$0x3] }
0x13dc   : > { %4153 = vmatpush3.bf16.msra.mxu0 %v5013_v20  ;;  %v2878_v20 = vld [vmem:[#allocation8] sm:$0x3] }
0x13dd   : > { %v2976_v43 = vrot.slane %v2878_v20, 2 }
0x14a2   : > { %v2751_v17 = vpop.f32.mrb[20].mxu0 }
0x14a3   : > { %v3954_v33 = vpop.f32.mrb[21].mxu0 }
0x14a4   : > { %v2826_v34 = vpop.f32.mrb[20].mxu1 }
0x14a5   : > { %v2827_v35 = vadd.f32 %v2826_v34, %v2751_v17  ;;  %v3965_v36 = vpop.f32.mrb[21].mxu1 }
0x14a6   : > { %v3215_v36 = vld [vmem:[%s5285_s7 + $0x8] sm:$0xff] }
0x14a7   : > { %v2837_v37 = vadd.f32 %v5069_v41, %v2827_v35  ;;  %v3214_v35 = vld [vmem:[%s5285_s7] sm:$0xff] }
0x14a9   : > { %4341 = vtanh.f32 %v2837_v37  ;;  %v3575_v38 = vmul.f32 -1.442695, %v2837_v37  ;;  %v4154_v37 = vpack.c.bf16 %v3215_v36, %v3214_v35 }
0x14aa   : > { %v2952_v12 = vpop.f32.mrb[22].mxu0 }
0x14ab   : > { %v2957_v39 = vrot.slane %v2952_v12, 2  ;;  %v3976_v40 = vpop.f32.mrb[23].mxu0  ;;  %4155 = vmatprep.subr.bf16.mxu1 %v4154_v37  ;;  %v3216_v12 = vld [vmem:[%s5285_s7 + $0x10] sm:$0xff] }
0x14ad   : > { %v2959_v10 = vadd.f32 %v4743_v16, %v2957_v39  ;;  %v3217_v39 = vld [vmem:[%s5285_s7 + $0x18] sm:$0xff] }
0x14ae   : > { %v4158_v40 = vpack.c.bf16 %v3217_v39, %v3216_v12 }
0x14af   : > { %v2967_v13 = vadd.f32 %v5075_v49, %v2959_v10 }
0x14b1   : > { %4343 = vtanh.f32 %v2967_v13  ;;  %v3578_v47 = vmul.f32 -1.442695, %v2967_v13 }
0x14b2   : > { %4345 = vpow2.f32 %v3575_v38 }
0x14b3   : > { %v4342_v14 = vpop.eup %4341  ;;  %4347 = vpow2.f32 %v3578_v47 }
0x14b4   : > { %2851 = vrot.lane.b32.xlu1 %v4342_v14, %s4523_s27 }
0x14b8   : > { %2846 = vrot.lane.b32.xlu1 %v2673_v7, %s4523_s27 }
0x14bb   : > { %v4344_v44 = vpop.eup %4343 }
0x14bc   : > { %2982 = vrot.lane.b32.xlu0 %v4344_v44, %s4523_s27  ;;  %2977 = vrot.lane.b32.xlu1 %v2976_v43, %s4523_s27  ;;  %v4346_v16 = vpop.eup %4345 }
0x14bd   : > { %v2841_v57 = vadd.f32 1.0, %v4346_v16  ;;  %v4348_v48 = vpop.eup %4347 }
0x14be   : > { %v2971_v49 = vadd.f32 1.0, %v4348_v48 }
0x14bf   : > { %4349 = vrcp.f32 %v2841_v57 }
0x14c0   : > { %4351 = vrcp.f32 %v2971_v49 }
0x14c9   : > { %v4350_v45 = vpop.eup %4349 }
0x14ca   : > { %v4352_v51 = vpop.eup %4351 }
0x1526   : > { %v2852_v19 = vpop.permute.xlu1 %2851 }
0x1527   : > { %v2854_v50 = vmul.f32 %v4350_v45, %v2852_v19 }
0x1529   : > { %2856 = vrot.lane.b32.xlu0 %v2854_v50, %s4523_s27 }
0x152a   : > { %v2847_v53 = vpop.permute.xlu1 %2846 }
0x152b   : > { %v2849_v54 = vmul.f32 %v4350_v45, %v2847_v53 }
0x152e   : > { %v2983_v42 = vpop.permute.xlu0 %2982  ;;  %v2978_v56 = vpop.permute.xlu1 %2977 }
0x152f   : > { %v2985_v52 = vmul.f32 %v4352_v51, %v2983_v42  ;;  %v2980_v58 = vmul.f32 %v4352_v51, %v2978_v56 }
0x1531   : > { %2987 = vrot.lane.b32.xlu0 %v2985_v52, %s4523_s27 }
0x159b   : > { %v2857_v46 = vpop.permute.xlu0 %2856 }
0x159c   : > { %v2859_v55 = vadd.f32 %v2857_v46, %v2849_v54 }
0x159e   : > { %4353 = vtanh.f32 %v2859_v55 }
0x15a3   : > { %v2988_v59 = vpop.permute.xlu0 %2987 }
0x15a4   : > { %v5126_v60 = vadd.f32 %v2988_v59, %v2980_v58 }
0x15a6   : > { %4355 = vtanh.f32 %v5126_v60 }
0x15a8   : > { %v4354_v61 = vpop.eup %4353 }
0x15a9   : > { %2862 = vrot.lane.b32.xlu1 %v4354_v61, %s4523_s27 }
0x15b0   : > { %v4356_v62 = vpop.eup %4355 }
0x15b1   : > { %2993 = vrot.lane.b32.xlu0 %v4356_v62, %s4523_s27 }
0x161b   : > { %v2863_v63 = vpop.permute.xlu1 %2862 }
0x161c   : > { %v2865_v0 = vmul.f32 %v4350_v45, %v2863_v63 }
0x161e   : > { %2867 = vrot.lane.b32.xlu1 %v2865_v0, %s4525_s4 }
0x1622   : > { %2872 = vrot.lane.b32.xlu1 %v2859_v55, %s4524_s15 }
0x1623   : > { %v2994_v1 = vpop.permute.xlu0 %2993 }
0x1624   : > { %v2996_v2 = vmul.f32 %v4352_v51, %v2994_v1 }
0x1626   : > { %v3090_v3 = vrot.slane %v2996_v2, 6 }
0x1628   : > { %3091 = vrot.lane.b32.xlu0 %v3090_v3, %s4525_s4 }
0x1690   : > { %v2868_v4 = vpop.permute.xlu1 %2867 }
0x1691   : > { %2870 = vst.msk [vmem:[#allocation6 + $0x2] sm:$0x3] %vm658_vm4, %v2868_v4  ;;  %2876 = vst.msk [vmem:[%s4695_s29 + $0xc] sm:$0x3] %vm658_vm4, %v2868_v4 }
0x1694   : > { %v2873_v5 = vpop.permute.xlu1 %2872 }
0x1695   : > { %2875 = vst.msk [vmem:[#allocation8 + $0x2] sm:$0x3] %vm658_vm4, %v2873_v5 }
0x1698   : > { %v3007_v6 = vld [vmem:[#allocation6 + $0x2] sm:$0x3] }
0x1699   : > { %3986 = vmatmul.mubr.msk.f32.vlgmr.msra.gmra.mrb[22].mxu1 %vm543_vm3, %v3007_v6 }
0x169a   : > { %4007 = vmatprep.mubr.msk.f32.mxu1 %vm543_vm3, %v3212_v9  ;;  %v3092_v11 = vpop.permute.xlu0 %3091  ;;  %4157 = vmatpush3.bf16.msra.mxu1 %v4154_v37 }
0x169b   : > { %3997 = vmatmul.mubr.msk.f32.vlgmr.msra.gmra.mrb[24].mxu0 %vm543_vm3, %v3092_v11  ;;  %4159 = vmatprep.subr.bf16.mxu1 %v4158_v40 }
0x169c   : > { %v3008_v15 = vld [vmem:[#allocation8 + $0x2] sm:$0x3] }
0x169d   : > { %3181 = vrot.lane.b32.xlu1 %v3008_v15, %s4523_s27 }
0x169e   : > { %4161 = vmatpush3.bf16.msra.mxu1 %v4158_v40 }
0x170f   : > { %v3182_v8 = vpop.permute.xlu1 %3181 }
0x176c   : > { %v3086_v18 = vpop.f32.mrb[22].mxu1 }
0x176d   : > { %v3987_v21 = vpop.f32.mrb[23].mxu1 }
0x176e   : > { %v3161_v22 = vpop.f32.mrb[24].mxu0 }
0x176f   : > { %v3162_v23 = vadd.f32 %v3161_v22, %v3086_v18  ;;  %v3998_v24 = vpop.f32.mrb[25].mxu0 }
0x1771   : > { %v3172_v25 = vadd.f32 %v5069_v41, %v3162_v23 }
0x1773   : > { %4357 = vtanh.f32 %v3172_v25  ;;  %v3587_v27 = vmul.f32 -1.442695, %v3172_v25 }
0x1775   : > { %4359 = vpow2.f32 %v3587_v27 }
0x177d   : > { %v4358_v26 = vpop.eup %4357 }
0x177e   : > { %3186 = vrot.lane.b32.xlu0 %v4358_v26, %s4523_s27 }
0x177f   : > { %v4360_v28 = vpop.eup %4359 }
0x1780   : > { %v3176_v30 = vadd.f32 1.0, %v4360_v28 }
0x1782   : > { %4361 = vrcp.f32 %v3176_v30 }
0x178c   : > { %v4362_v31 = vpop.eup %4361 }
0x178d   : > { %v3184_v17 = vmul.f32 %v4362_v31, %v3182_v8 }
0x17f0   : > { %v3187_v32 = vpop.permute.xlu0 %3186 }
0x17f1   : > { %v3189_v29 = vmul.f32 %v4362_v31, %v3187_v32 }
0x17f3   : > { %3191 = vrot.lane.b32.xlu0 %v3189_v29, %s4523_s27 }
0x1865   : > { %v3192_v33 = vpop.permute.xlu0 %3191 }
0x1866   : > { %v3194_v34 = vadd.f32 %v3192_v33, %v3184_v17 }
0x1868   : > { %4363 = vtanh.f32 %v3194_v34 }
0x1872   : > { %v4364_v41 = vpop.eup %4363 }
0x1873   : > { %3197 = vrot.lane.b32.xlu1 %v4364_v41, %s4523_s27 }
0x1877   : > { %2998 = vrot.lane.b32.xlu1 %v2996_v2, %s4525_s4 }
0x187b   : > { %3207 = vrot.lane.b32.xlu1 %v3194_v34, %s4524_s15 }
0x18e5   : > { %v3198_v10 = vpop.permute.xlu1 %3197 }
0x18e6   : > { %v3200_v13 = vmul.f32 %v4362_v31, %v3198_v10 }
0x18e8   : > { %3202 = vrot.lane.b32.xlu0 %v3200_v13, %s4525_s4  ;;  %s4526_s4 = smov [#allocation6]  }
0x18e9   : > { %v2999_v14 = vpop.permute.xlu1 %2998  ;;  %s3345_s18 = sshll.u32 %s4526_s4, 4  ;;  %s3346_s18 = int_to_ptr.vmem [resolvable:$true] %s3345_s18 }
0x18ea   : > { %3001 = vst.msk [vmem:[#allocation6 - $0x6] sm:$0xc0] %vm1667_vm7, %v2999_v14  ;;  %s4393_s26 = scalar_lea.vmem %s3346_s18, 64  ;;  %p4400_p1 = scmp.lt.s32.totalorder %s3346_s18, %s3346_s18 }
0x18eb   : > { %p4394_p9 = scmp.ne.s32.totalorder %s3346_s18, %s4393_s26  ;;  %p4401_p4 = scmp.lt.s32.totalorder %s4393_s26, %s4393_s26 }
0x18ec   : > { %3003 = vrot.lane.b32.xlu0 %v5126_v60, %s4524_s15 }
0x18ed   : > { %v3208_v7 = vpop.permute.xlu1 %3207  ;;  %p4395_p11 = pnand %p4394_p9, %p5316_p10  ;;  %p4402_p7 = por %p4401_p4, %p4400_p1 }
0x18ee   : > { %3210 = vst.msk [vmem:[#allocation8 + $0x2] sm:$0x3] %vm658_vm4, %v3208_v7 }
0x18ef   : > { %p4396_p13 = pneg %p4395_p11 }
0x18f1   : > { %p4403_p8 = pnand %p4402_p7, %p4396_p13 }
0x195a   : > { %v3203_v20 = vpop.permute.xlu0 %3202 }
0x195b   : > { %3211 = vst.msk [vmem:[%s4695_s29 + $0xe] sm:$0x3] %vm658_vm4, %v3203_v20  ;;  %3205 = vst.msk [vmem:[#allocation6 + $0x2] sm:$0x3] %vm658_vm4, %v3203_v20 }
0x195e   : > { %v3004_v43 = vpop.permute.xlu0 %3003 }
0x195f   : > { %3006 = vst.msk [vmem:[#allocation8 - $0x6] sm:$0xc0] %vm1667_vm7, %v3004_v43 }
0x1962   : > { %v3213_v44 = vld [vmem:[%s4695_s29 + $0x8] sm:$0xff] }
0x1963   : > { %4008 = vmatmul.mubr.msk.f32.vlgmr.msra.gmra.mrb[24].mxu1 %vm543_vm3, %v3213_v44 }
0x1964   : > { %4406 = shalt.err (!%p4403_p8)
}
0x1965   : > { %s4407_s23 = scalar_lea.hbm %s5289_s11, 64  ;;  %p5317_p0 = pmov %p5316_p10 }
0x1966   : > { %p4408_p12 = scmp.ne.s32.totalorder %s5289_s11, %s4407_s23  ;;  %p4413_p5 = scmp.lt.u32.totalorder %s4407_s23, %s5289_s11 }
0x1968   : > { %p4409_p3 = pnand %p4408_p12, %p5317_p0 }
0x196a   : > { %p4410_p2 = pneg %p4409_p3 }
0x196c   : > { %p4415_p6 = pnand %p4413_p5, %p4410_p2 }
0x196e   : > { %4418 = shalt.err (!%p4415_p6)
}
0x196f   : > { %s4527_s4 = smov 2   ;;  %p5318_p9 = pmov %p5317_p0 }
0x1970   : > { %s3600_s19 = sshll.u32 %s4618_s25, 8  ;;  %s3332_s17 = sshll.u32 %s4695_s29, 4  ;;  %s5200_s17 = int_to_ptr.vmem [resolvable:$true] %s3332_s17 }
0x1971   : > { %4168 = dma.vmem_to_hbm [thread:$0]  (%p5318_p9), %s3346_s18, 64, %s5289_s11, [#allocation7], %s4523_s27, %s4523_s27, %s4527_s4  }
0x1972   : > { %s5197_s23 = scalar_lea.hbm %s5288_s10, %s3600_s19  ;;  %s4528_s16 = smov [#allocation8]  }
0x1973   : > { %s5202_s0 = sshll.u32 %s4528_s16, 4  ;;  %s5319_s26 = sand.u32 1, %s4507_s22   ;;  %s3359_s0 = int_to_ptr.vmem [resolvable:$true] %s5202_s0 }
0x1974   : > { %s5206_s15 = scalar_lea.sflag [#allocation4], %s5319_s26  ;;  %s4419_s1 = scalar_lea.vmem %s5200_s17, 256 }
0x1975   : > { %p4420_p10 = scmp.ne.s32.totalorder %s5200_s17, %s4419_s1  ;;  %p5320_p11 = scmp.ne.s32.totalorder %s5305_s13, 0 }
0x1976   : > { %s4529_s18 = smov [#allocation5]  }
0x1977   : > { %p4421_p13 = pnand %p4420_p10, %p5320_p11  ;;  %s4423_s19 = sshll.u32 %s4529_s18, 4  ;;  %s4424_s19 = int_to_ptr.vmem [resolvable:$false] %s4423_s19 }
0x1978   : > { %s4425_s29 = scalar_lea.vmem %s4424_s19, 512  ;;  %p4426_p4 = scmp.lt.s32.totalorder %s5200_s17, %s4424_s19 }
0x1979   : > { %p4422_p1 = pneg %p4421_p13  ;;  %p4427_p7 = scmp.lt.s32.totalorder %s4425_s29, %s4419_s1 }
0x197b   : > { %p4428_p8 = por %p4427_p7, %p4426_p4 }
0x197d   : > { %p4429_p12 = pnand %p4428_p8, %p4422_p1 }
0x197f   : > { %4432 = shalt.err (!%p4429_p12)
}
0x1980   : > { %s4433_s20 = scalar_lea.hbm %s5197_s23, 256  ;;  %s4437_s26 = scalar_lea.hbm %s5288_s10, 512 }
0x1981   : > { %p4434_p0 = scmp.ne.s32.totalorder %s5197_s23, %s4433_s20  ;;  %p4438_p5 = scmp.lt.u32.totalorder %s5197_s23, %s5288_s10 }
0x1982   : > { %p4439_p6 = scmp.lt.u32.totalorder %s4437_s26, %s4433_s20  ;;  %p4441_p10 = scmp.lt.u32.totalorder %s4433_s20, %s5197_s23 }
0x1983   : > { %p4435_p3 = pnand %p4434_p0, %p5320_p11 }
0x1984   : > { %p4440_p9 = por %p4439_p6, %p4438_p5 }
0x1985   : > { %p4436_p2 = pneg %p4435_p3 }
0x1986   : > { %p4442_p13 = por %p4441_p10, %p4440_p9 }
0x1988   : > { %p4443_p1 = pnand %p4442_p13, %p4436_p2 }
0x198a   : > { %4446 = shalt.err (!%p4443_p1)
}
0x198b   : > { %s4530_s1 = smov 128   ;;  %s4531_s29 = smov 8  }
0x198c   : > { %4166 = dma.vmem_to_hbm [thread:$0]  (%p5320_p11), %s5200_s17, 256, %s5197_s23, %s5206_s15, %s4530_s1, %s4530_s1, %s4531_s29  }
0x198d   : > { %s4447_s30 = scalar_lea.vmem %s3359_s0, 64  ;;  %p5321_p7 = scmp.eq.s32.totalorder %s4618_s25, 1 }
0x198e   : > { %p4448_p4 = scmp.ne.s32.totalorder %s3359_s0, %s4447_s30  ;;  %p4454_p0 = scmp.lt.s32.totalorder %s3359_s0, %s3359_s0 }
0x198f   : > { %p4455_p3 = scmp.lt.s32.totalorder %s4447_s30, %s4447_s30 }
0x1990   : > { %p4449_p8 = pnand %p4448_p4, %p5321_p7 }
0x1991   : > { %p4456_p2 = por %p4455_p3, %p4454_p0 }
0x1992   : > { %p4450_p12 = pneg %p4449_p8 }
0x1994   : > { %p4457_p5 = pnand %p4456_p2, %p4450_p12 }
0x1996   : > { %4460 = shalt.err (!%p4457_p5)
}
0x1997   : > { %s4461_s26 = scalar_lea.hbm %s5290_s12, 64  ;;  %p5322_p6 = pmov %p5321_p7 }
0x1998   : > { %p4462_p11 = scmp.ne.s32.totalorder %s5290_s12, %s4461_s26  ;;  %p4467_p13 = scmp.lt.u32.totalorder %s4461_s26, %s5290_s12 }
0x199a   : > { %p4463_p9 = pnand %p4462_p11, %p5322_p6 }
0x199c   : > { %p4464_p10 = pneg %p4463_p9 }
0x199e   : > { %p4469_p1 = pnand %p4467_p13, %p4464_p10 }
0x19a0   : > { %4472 = shalt.err (!%p4469_p1)
}
0x19a1   : > { %p5323_p4 = pmov %p5322_p6  ;;  %v3588_v38 = vld [vmem:[%s5286_s8] ss:$0 sm:$0xff]  ;;  %vm3306_vm8 = vcmask 31744  }
0x19a3   : > { %4170 = dma.vmem_to_hbm [thread:$0]  (%p5323_p4), %s3359_s0, 64, %s5290_s12, [#allocation7], %s4523_s27, %s4523_s27, %s4527_s4  }
0x19a4   : > { %p5324_p7 = pmov %p5323_p4 }
0x1a36   : > { %v4009_v47 = vpop.f32.mrb[24].mxu1 }
0x1a37   : > { %v3297_v16 = vpop.f32.mrb[25].mxu1  ;;  %v3303_v48 = vadd.f32 %v4009_v47, %v3588_v38 }
0x1a38   : > { %v3298_v57 = vadd.f32 %v3588_v38, %v3297_v16 }
0x1a39   : > { %3308 = vst.msk [vmem:[%s4693_s28 + $0x8] sm:$0xff] %vm3306_vm8, %v3303_v48 }
0x1a3a   : > { %3307 = vst.msk [vmem:[%s4693_s28] sm:$0xff] %vm3306_vm8, %v3298_v57 }
0x1a3b   : > { %4494 = dma.done.wait (%p5324_p7), [#allocation7], 128   ;;  %p5325_p8 = pmov %p5323_p4 }
0x1a3d   : > { %4496 = vsyncadd (%p5325_p8), [#allocation7], 4294967168 }
0x1a3e PF: > { %p4190_p12 = scmp.ge.s32.totalorder %s4515_s24, 2  ;;  %s3389_s0 = sand.u32 1, %s4503_s21  }
0x1a3f   : > { %p5326_p0 = scmp.ne.s32.totalorder %s5306_s14, 0  ;;  %s3390_s27 = scalar_lea.sflag [#allocation4], %s3389_s0 }
0x1a41   : > { %p4181_p3 = pnand %p4190_p12, %p5326_p0 }
0x1a43   : > { %4498 = dma.done.wait (!%p4181_p3), %s3390_s27, 256  }
0x1a44   : > { %4500 = vsyncadd (!%p4181_p3), %s3390_s27, 4294967040  ;;  %s5327_s24 = sld [smem:[#allocation13_spill]]  ;;  %s5328_s4 = sld [smem:[#allocation12_spill]] }
0x1a45   : > { %s5329_s23 = sld [smem:[#allocation14_spill]]  ;;  %s5330_s21 = smov %s4507_s22 }
0x1a4a   : > { %p25_p2 = scmp.ge.s32.totalorder %s5327_s24, 4   ;;  %s5331_s22 = smov %s5328_s4 }
0x1a4c   :  { %27 = sbr.rel (!%p25_p2) target bundleno = 9 (0x9), region = 132 }
0x1a53   :  { %3395 = vsyncpa [#allocation3], 1 }
0x1a54   :  { %3397 = vsyncpa [#allocation3 + $0x1], 1 }
0x1a55   :  { %3398 = vsyncpa [#allocation4], 1 }
0x1a56   :  { %3400 = vsyncpa [#allocation4 + $0x1], 1 }
0x1a57   :  { %3401 = vsyncpa [#allocation7], 1 }

</bundles_post_ra>
